<compile_context>
chip_gen: v7x
topology: tpu7x:2x2x1
jax: 0.10.0
libtpu: 0.0.40
codegen_flags: <defaults>
</compile_context>

<pallas_src>
import math

import jax
import jax.numpy as jnp
from jax.experimental import pallas as pl
from jax.experimental.pallas import tpu as pltpu

_LANE = 128


def _round_up(x, m):
    return (x + m - 1) // m * m


def _make_kernel(num_heads, embed, e_pad, hd_pad, seq_len, batch_tile):
    rows = batch_tile * seq_len          # M dim of every row-wise matmul
    qkv_w = num_heads * hd_pad           # lane width of q/k/v and the context slab
    eps = 1e-5
    inv_e = 1.0 / embed                  # LayerNorm statistics use the TRUE embed dim

    def kernel(x_ref,
               wq_ref, bq_ref, wk_ref, bk_ref, wv_ref, bv_ref,
               wo_ref, bo_ref, g1_ref, be1_ref,
               w1_ref, b1_ref, w2_ref, b2_ref, g2_ref, be2_ref,
               o_ref, attn_ref):
        # Padded lanes of every activation are exact zeros by construction (zero-padded
        # inputs/weights/biases); the mask only keeps them out of the LN variance.
        lane_mask = (jax.lax.broadcasted_iota(jnp.int32, (1, e_pad), 1)
                     < embed).astype(jnp.float32)

        def layer_norm(z, gamma, beta):
            mu = jnp.sum(z, axis=-1, keepdims=True) * inv_e
            d = (z - mu) * lane_mask
            var = jnp.sum(d * d, axis=-1, keepdims=True) * inv_e
            return d * jax.lax.rsqrt(var + eps) * gamma + beta

        # x block: (B_TILE, L, E_pad) f32 -> (rows, E_pad) row slab.
        x = x_ref[...].reshape(rows, e_pad)
        xb = x.astype(jnp.bfloat16)

        # --- in-projections: bf16 MXU inputs, f32 accumulation.  1/sqrt(head_dim)
        #     is folded into wq/bq by the wrapper.  Cast to bf16 right away: q/k/v
        #     are only ever consumed as bf16 MXU operands. ---
        q = (jnp.dot(xb, wq_ref[...], preferred_element_type=jnp.float32)
             + bq_ref[...]).astype(jnp.bfloat16)
        k = (jnp.dot(xb, wk_ref[...], preferred_element_type=jnp.float32)
             + bk_ref[...]).astype(jnp.bfloat16)
        v = (jnp.dot(xb, wv_ref[...], preferred_element_type=jnp.float32)
             + bv_ref[...]).astype(jnp.bfloat16)

        q3 = q.reshape(batch_tile, seq_len, qkv_w)
        k3 = k.reshape(batch_tile, seq_len, qkv_w)
        v3 = v.reshape(batch_tile, seq_len, qkv_w)

        # --- multi-head attention: per head, batched-over-batch einsums on
        #     128-lane-aligned static slices; context written straight to VMEM
        #     scratch (no lane-axis concatenate, bounded live ranges). ---
        for h in range(num_heads):
            sl = slice(h * hd_pad, (h + 1) * hd_pad)       # 128-aligned
            s = jnp.einsum("bld,bmd->blm", q3[:, :, sl], k3[:, :, sl],
                           preferred_element_type=jnp.float32)   # (B_TILE, L, L)
            s = s - jnp.max(s, axis=-1, keepdims=True)
            p = jnp.exp(s)
            p = p * pl.reciprocal(jnp.sum(p, axis=-1, keepdims=True), approx=True)
            ctx = jnp.einsum("blm,bmd->bld", p.astype(jnp.bfloat16), v3[:, :, sl],
                             preferred_element_type=jnp.float32)  # (B_TILE, L, hd_pad)
            attn_ref[:, :, sl] = ctx.astype(jnp.bfloat16)

        # --- out projection + residual + LayerNorm 1 (f32 stats) ---
        attn = attn_ref[...].reshape(rows, qkv_w)
        attn_out = (jnp.dot(attn, wo_ref[...], preferred_element_type=jnp.float32)
                    + bo_ref[...])
        y1 = layer_norm(x + attn_out, g1_ref[...], be1_ref[...])

        # --- feed-forward (E -> 4E -> E) + residual + LayerNorm 2 ---
        # NOTE: for large E on v7x, tile the 4E hidden dim over an extra grid axis.
        h1 = (jnp.dot(y1.astype(jnp.bfloat16), w1_ref[...],
                      preferred_element_type=jnp.float32) + b1_ref[...])
        h1 = jnp.maximum(h1, 0.0).astype(jnp.bfloat16)
        ff = (jnp.dot(h1, w2_ref[...], preferred_element_type=jnp.float32)
              + b2_ref[...])
        y2 = layer_norm(y1 + ff, g2_ref[...], be2_ref[...])

        # Lane-dense store (last dim is a multiple of 128).
        o_ref[...] = y2.reshape(batch_tile, seq_len, e_pad).astype(o_ref.dtype)

    return kernel


def _choose_batch_tile(n, seq_len, target_rows=512, min_grid_steps=2):
    """Largest divisor of N giving <= target_rows rows per step while keeping the
    (parallel) grid at >= min_grid_steps steps (megacore / pipelining)."""
    best = 1
    for d in range(1, n + 1):
        if n % d:
            continue
        if d * seq_len > target_rows:
            continue
        if d > 1 and n // d < min_grid_steps:
            continue
        best = d
    return best


def _vmem_limit_bytes():
    """~75% of physical VMEM (≈48 MiB on v7x, ≈96 MiB on v5e/v6e)."""
    cap = 64 * 1024 * 1024
    try:
        cap = int(pltpu.get_tpu_info().vmem_capacity_bytes)
    except Exception:
        pass
    return (cap * 3) // 4


def _pad_axis(a, axis, target):
    pad = target - a.shape[axis]
    if pad == 0:
        return a
    widths = [(0, 0)] * a.ndim
    widths[axis] = (0, pad)
    return jnp.pad(a, widths)


def _pad_in_proj(w, b, num_heads, hd, hd_pad, e_pad):
    """(E, E) in-proj weight -> (E_pad, H*hd_pad) with each head's columns starting
    at a 128-lane boundary; padded rows/columns are zero."""
    e_in = w.shape[0]
    w_p = jnp.zeros((e_pad, num_heads * hd_pad), w.dtype)
    b_p = jnp.zeros((1, num_heads * hd_pad), b.dtype)
    for h in range(num_heads):
        w_p = w_p.at[:e_in, h * hd_pad:h * hd_pad + hd].set(w[:, h * hd:(h + 1) * hd])
        b_p = b_p.at[0, h * hd_pad:h * hd_pad + hd].set(b[0, h * hd:(h + 1) * hd])
    return w_p, b_p


def _pad_out_proj(w, num_heads, hd, hd_pad, e_pad):
    """(E, E) out-proj weight -> (H*hd_pad, E_pad) matching the padded head layout."""
    e_out = w.shape[1]
    w_p = jnp.zeros((num_heads * hd_pad, e_pad), w.dtype)
    for h in range(num_heads):
        w_p = w_p.at[h * hd_pad:h * hd_pad + hd, :e_out].set(w[h * hd:(h + 1) * hd, :])
    return w_p


def transformer_block_batch_first(xb, params, num_heads):
    """xb: (N, L, E) float32 — batch-first entry point (no HBM transposes)."""
    N, L, E = xb.shape
    hd = E // num_heads
    hd_pad = _round_up(hd, _LANE)        # pad each head to a whole 128-lane group
    e_pad = _round_up(E, _LANE)
    f_pad = _round_up(4 * E, _LANE)
    scale = 1.0 / math.sqrt(hd)
    bt = _choose_batch_tile(N, L)

    w16 = jnp.bfloat16

    # Weights in bf16 (bf16-native MXU, half the VMEM/DMA); biases/LN affine in f32.
    # Softmax scale folded into Wq/bq.  All padding is zeros, so padded lanes stay
    # exactly zero through the whole block.
    wq_p, bq_p = _pad_in_proj(params["wq"] * scale, params["bq"] * scale,
                              num_heads, hd, hd_pad, e_pad)
    wk_p, bk_p = _pad_in_proj(params["wk"], params["bk"], num_heads, hd, hd_pad, e_pad)
    wv_p, bv_p = _pad_in_proj(params["wv"], params["bv"], num_heads, hd, hd_pad, e_pad)
    wo_p = _pad_out_proj(params["wo"], num_heads, hd, hd_pad, e_pad)

    param_list = [
        wq_p.astype(w16), bq_p,
        wk_p.astype(w16), bk_p,
        wv_p.astype(w16), bv_p,
        wo_p.astype(w16), _pad_axis(params["bo"], 1, e_pad),
        _pad_axis(params["g1"], 1, e_pad), _pad_axis(params["be1"], 1, e_pad),
        _pad_axis(_pad_axis(params["w1"], 0, e_pad), 1, f_pad).astype(w16),
        _pad_axis(params["b1"], 1, f_pad),
        _pad_axis(_pad_axis(params["w2"], 0, f_pad), 1, e_pad).astype(w16),
        _pad_axis(params["b2"], 1, e_pad),
        _pad_axis(params["g2"], 1, e_pad), _pad_axis(params["be2"], 1, e_pad),
    ]

    x_p = _pad_axis(xb, 2, e_pad)        # lane-dense activations

    kernel = _make_kernel(num_heads, E, e_pad, hd_pad, L, bt)

    def build(single_buffer_weights):
        in_specs = [pl.BlockSpec((bt, L, e_pad), lambda b: (b, 0, 0))]
        for p in param_list:
            if single_buffer_weights:
                # Grid-invariant operands: no double-buffering (halves weight residency).
                spec = pl.BlockSpec(p.shape, lambda b: (0, 0),
                                    pipeline_mode=pl.Buffered(1))
            else:
                spec = pl.BlockSpec(p.shape, lambda b: (0, 0))
            in_specs.append(spec)
        return pl.pallas_call(
            kernel,
            out_shape=jax.ShapeDtypeStruct((N, L, e_pad), xb.dtype),
            grid_spec=pltpu.PrefetchScalarGridSpec(
                num_scalar_prefetch=0,
                grid=(N // bt,),
                in_specs=in_specs,
                out_specs=pl.BlockSpec((bt, L, e_pad), lambda b: (b, 0, 0)),
                scratch_shapes=[
                    pltpu.VMEM((bt, L, num_heads * hd_pad), jnp.bfloat16),
                ],
            ),
            compiler_params=pltpu.CompilerParams(
                dimension_semantics=("parallel",),
                vmem_limit_bytes=_vmem_limit_bytes(),
            ),
        )

    out_p = None
    last_err = None
    for single_buffer in (True, False):
        try:
            out_p = build(single_buffer)(x_p, *param_list)
            break
        except Exception as e:  # pipeline_mode=pl.Buffered(1) unsupported -> default specs
            last_err = e
    if out_p is None:
        raise last_err

    # Drop the lane padding.  Production callers that control layout should keep the
    # padded (lane-dense) activations end-to-end and skip this slice.
    return out_p[..., :E] if e_pad != E else out_p


def transformer_block(x, params, num_heads):
    """x: (L, N, E) float32 — PyTorch nn.MultiheadAttention default layout.

    Transposes at the boundary; callers that already hold batch-first activations
    should call transformer_block_batch_first directly to skip the HBM round trips.
    """
    out = transformer_block_batch_first(jnp.transpose(x, (1, 0, 2)), params, num_heads)
    return jnp.transpose(out, (1, 0, 2))


def _init_params(key, embed):
    """Deterministic synthetic parameters with the same shapes nn.MultiheadAttention /
    LayerNorm / Linear would hold.  Linear weights are stored pre-transposed (in, out)."""
    ks = jax.random.split(key, 8)
    s = 0.05
    p = {}
    p["wq"] = s * jax.random.normal(ks[0], (embed, embed), jnp.float32)
    p["wk"] = s * jax.random.normal(ks[1], (embed, embed), jnp.float32)
    p["wv"] = s * jax.random.normal(ks[2], (embed, embed), jnp.float32)
    p["bq"] = jnp.zeros((1, embed), jnp.float32)
    p["bk"] = jnp.zeros((1, embed), jnp.float32)
    p["bv"] = jnp.zeros((1, embed), jnp.float32)
    p["wo"] = s * jax.random.normal(ks[3], (embed, embed), jnp.float32)
    p["bo"] = s * jax.random.normal(ks[4], (1, embed), jnp.float32)
    p["g1"] = jnp.ones((1, embed), jnp.float32)
    p["be1"] = jnp.zeros((1, embed), jnp.float32)
    p["w1"] = s * jax.random.normal(ks[5], (embed, 4 * embed), jnp.float32)
    p["b1"] = s * jax.random.normal(ks[6], (1, 4 * embed), jnp.float32)
    p["w2"] = s * jax.random.normal(ks[7], (4 * embed, embed), jnp.float32)
    p["b2"] = jnp.zeros((1, embed), jnp.float32)
    p["g2"] = jnp.ones((1, embed), jnp.float32)
    p["be2"] = jnp.zeros((1, embed), jnp.float32)
    return p


def _reference(x, p, num_heads):
    """Pure-JAX f32 reference reproducing PyTorch MHA + LN + FF semantics."""
    L, N, E = x.shape
    hd = E // num_heads
    xb = jnp.transpose(x, (1, 0, 2))  # (N, L, E)

    def ln(z, g, b):
        mu = jnp.mean(z, axis=-1, keepdims=True)
        var = jnp.mean((z - mu) ** 2, axis=-1, keepdims=True)
        return (z - mu) * jax.lax.rsqrt(var + 1e-5) * g + b

    q = xb @ p["wq"] + p["bq"]
    k = xb @ p["wk"] + p["bk"]
    v = xb @ p["wv"] + p["bv"]
    q = q.reshape(N, L, num_heads, hd).transpose(0, 2, 1, 3)
    k = k.reshape(N, L, num_heads, hd).transpose(0, 2, 1, 3)
    v = v.reshape(N, L, num_heads, hd).transpose(0, 2, 1, 3)
    s = jnp.einsum("nhqd,nhkd->nhqk", q, k) / math.sqrt(hd)
    a = jax.nn.softmax(s, axis=-1)
    o = jnp.einsum("nhqk,nhkd->nhqd", a, v).transpose(0, 2, 1, 3).reshape(N, L, E)
    o = o @ p["wo"] + p["bo"]
    y1 = ln(xb + o, p["g1"], p["be1"])
    ff = jnp.maximum(y1 @ p["w1"] + p["b1"], 0.0) @ p["w2"] + p["b2"]
    y2 = ln(y1 + ff, p["g2"], p["be2"])
    return jnp.transpose(y2, (1, 0, 2))


if __name__ == "__main__":
    embedding_size = 32
    heads = 4
    seq_len = 8
    batch = 2

    key = jax.random.PRNGKey(0)
    k_x, k_p = jax.random.split(key)
    x = jax.random.normal(k_x, (seq_len, batch, embedding_size), jnp.float32)
    params = _init_params(k_p, embedding_size)

    out = transformer_block(x, params, heads)
    out = jax.block_until_ready(out)

    ref = _reference(x, params, heads)
    assert out.shape == (seq_len, batch, embedding_size)
    # bf16 matmul inputs + approx softmax reciprocal vs. an f32 reference -> loose tol.
    err = float(jnp.max(jnp.abs(out - ref)))
    assert jnp.allclose(out, ref, atol=2e-2, rtol=2e-2), f"max abs err {err}"

    print("KERNEL_OK")
</pallas_src>

<mosaic_0001>
module attributes {stable_mosaic.version = 11 : i64} {
  func.func @kernel(%arg0: i32, %arg1: memref<1x8x128xf32, #tpu.memory_space<vmem>>, %arg2: memref<128x512xbf16, #tpu.memory_space<vmem>>, %arg3: memref<1x512xf32, #tpu.memory_space<vmem>>, %arg4: memref<128x512xbf16, #tpu.memory_space<vmem>>, %arg5: memref<1x512xf32, #tpu.memory_space<vmem>>, %arg6: memref<128x512xbf16, #tpu.memory_space<vmem>>, %arg7: memref<1x512xf32, #tpu.memory_space<vmem>>, %arg8: memref<512x128xbf16, #tpu.memory_space<vmem>>, %arg9: memref<1x128xf32, #tpu.memory_space<vmem>>, %arg10: memref<1x128xf32, #tpu.memory_space<vmem>>, %arg11: memref<1x128xf32, #tpu.memory_space<vmem>>, %arg12: memref<128x128xbf16, #tpu.memory_space<vmem>>, %arg13: memref<1x128xf32, #tpu.memory_space<vmem>>, %arg14: memref<128x128xbf16, #tpu.memory_space<vmem>>, %arg15: memref<1x128xf32, #tpu.memory_space<vmem>>, %arg16: memref<1x128xf32, #tpu.memory_space<vmem>>, %arg17: memref<1x128xf32, #tpu.memory_space<vmem>>, %arg18: memref<1x8x128xf32, #tpu.memory_space<vmem>>, %arg19: memref<1x8x512xbf16, #tpu.memory_space<vmem>>) attributes {dimension_semantics = [#tpu.dimension_semantics<parallel>], iteration_bounds = array<i64: 2>, scalar_prefetch = 0 : i64, scratch_operands = 1 : i64, tpu.core_type = #tpu.core_type<tc>, window_params = [{transform_indices = @transform_0, window_bounds = array<i64: 1, 8, 128>}, {pipeline_mode = #tpu.pipeline_mode<synchronous>, transform_indices = @transform_1, window_bounds = array<i64: 128, 512>}, {pipeline_mode = #tpu.pipeline_mode<synchronous>, transform_indices = @transform_2, window_bounds = array<i64: 1, 512>}, {pipeline_mode = #tpu.pipeline_mode<synchronous>, transform_indices = @transform_3, window_bounds = array<i64: 128, 512>}, {pipeline_mode = #tpu.pipeline_mode<synchronous>, transform_indices = @transform_4, window_bounds = array<i64: 1, 512>}, {pipeline_mode = #tpu.pipeline_mode<synchronous>, transform_indices = @transform_5, window_bounds = array<i64: 128, 512>}, {pipeline_mode = #tpu.pipeline_mode<synchronous>, transform_indices = @transform_6, window_bounds = array<i64: 1, 512>}, {pipeline_mode = #tpu.pipeline_mode<synchronous>, transform_indices = @transform_7, window_bounds = array<i64: 512, 128>}, {pipeline_mode = #tpu.pipeline_mode<synchronous>, transform_indices = @transform_8, window_bounds = array<i64: 1, 128>}, {pipeline_mode = #tpu.pipeline_mode<synchronous>, transform_indices = @transform_9, window_bounds = array<i64: 1, 128>}, {pipeline_mode = #tpu.pipeline_mode<synchronous>, transform_indices = @transform_10, window_bounds = array<i64: 1, 128>}, {pipeline_mode = #tpu.pipeline_mode<synchronous>, transform_indices = @transform_11, window_bounds = array<i64: 128, 128>}, {pipeline_mode = #tpu.pipeline_mode<synchronous>, transform_indices = @transform_12, window_bounds = array<i64: 1, 128>}, {pipeline_mode = #tpu.pipeline_mode<synchronous>, transform_indices = @transform_13, window_bounds = array<i64: 128, 128>}, {pipeline_mode = #tpu.pipeline_mode<synchronous>, transform_indices = @transform_14, window_bounds = array<i64: 1, 128>}, {pipeline_mode = #tpu.pipeline_mode<synchronous>, transform_indices = @transform_15, window_bounds = array<i64: 1, 128>}, {pipeline_mode = #tpu.pipeline_mode<synchronous>, transform_indices = @transform_16, window_bounds = array<i64: 1, 128>}, {transform_indices = @transform_17, window_bounds = array<i64: 1, 8, 128>}]} {
    %0 = tpu.iota {dimensions = array<i32: 1>} : vector<1x128xi32>
    %c32_i32 = arith.constant 32 : i32
    %1 = vector.broadcast %c32_i32 : i32 to vector<1x128xi32>
    %2 = arith.cmpi slt, %0, %1 : vector<1x128xi32>
    %3 = arith.extui %2 : vector<1x128xi1> to vector<1x128xi32>
    %4 = arith.sitofp %3 : vector<1x128xi32> to vector<1x128xf32>
    %c0 = arith.constant 0 : index
    %c0_0 = arith.constant 0 : index
    %c0_1 = arith.constant 0 : index
    %5 = vector.load %arg1[%c0, %c0_0, %c0_1] : memref<1x8x128xf32, #tpu.memory_space<vmem>>, vector<1x8x128xf32>
    %6 = vector.shape_cast %5 : vector<1x8x128xf32> to vector<8x128xf32>
    %7 = arith.truncf %6 : vector<8x128xf32> to vector<8x128xbf16>
    %c0_2 = arith.constant 0 : index
    %c0_3 = arith.constant 0 : index
    %8 = vector.load %arg2[%c0_2, %c0_3] : memref<128x512xbf16, #tpu.memory_space<vmem>>, vector<128x512xbf16>
    %cst = arith.constant dense<0.000000e+00> : vector<8x512xf32>
    %9 = tpu.matmul %7, %8, %cst {dimension_numbers = #tpu.dot_dimension_numbers<[1], [0], [0], [1], [0, 0, 1, 1], [], []>} : vector<8x128xbf16>, vector<128x512xbf16>, vector<8x512xf32> -> vector<8x512xf32>
    %c0_4 = arith.constant 0 : index
    %c0_5 = arith.constant 0 : index
    %10 = vector.load %arg3[%c0_4, %c0_5] : memref<1x512xf32, #tpu.memory_space<vmem>>, vector<1x512xf32>
    %11 = vector.broadcast %10 : vector<1x512xf32> to vector<8x512xf32>
    %12 = arith.addf %9, %11 : vector<8x512xf32>
    %13 = arith.truncf %12 : vector<8x512xf32> to vector<8x512xbf16>
    %c0_6 = arith.constant 0 : index
    %c0_7 = arith.constant 0 : index
    %14 = vector.load %arg4[%c0_6, %c0_7] : memref<128x512xbf16, #tpu.memory_space<vmem>>, vector<128x512xbf16>
    %cst_8 = arith.constant dense<0.000000e+00> : vector<8x512xf32>
    %15 = tpu.matmul %7, %14, %cst_8 {dimension_numbers = #tpu.dot_dimension_numbers<[1], [0], [0], [1], [0, 0, 1, 1], [], []>} : vector<8x128xbf16>, vector<128x512xbf16>, vector<8x512xf32> -> vector<8x512xf32>
    %c0_9 = arith.constant 0 : index
    %c0_10 = arith.constant 0 : index
    %16 = vector.load %arg5[%c0_9, %c0_10] : memref<1x512xf32, #tpu.memory_space<vmem>>, vector<1x512xf32>
    %17 = vector.broadcast %16 : vector<1x512xf32> to vector<8x512xf32>
    %18 = arith.addf %15, %17 : vector<8x512xf32>
    %19 = arith.truncf %18 : vector<8x512xf32> to vector<8x512xbf16>
    %c0_11 = arith.constant 0 : index
    %c0_12 = arith.constant 0 : index
    %20 = vector.load %arg6[%c0_11, %c0_12] : memref<128x512xbf16, #tpu.memory_space<vmem>>, vector<128x512xbf16>
    %cst_13 = arith.constant dense<0.000000e+00> : vector<8x512xf32>
    %21 = tpu.matmul %7, %20, %cst_13 {dimension_numbers = #tpu.dot_dimension_numbers<[1], [0], [0], [1], [0, 0, 1, 1], [], []>} : vector<8x128xbf16>, vector<128x512xbf16>, vector<8x512xf32> -> vector<8x512xf32>
    %c0_14 = arith.constant 0 : index
    %c0_15 = arith.constant 0 : index
    %22 = vector.load %arg7[%c0_14, %c0_15] : memref<1x512xf32, #tpu.memory_space<vmem>>, vector<1x512xf32>
    %23 = vector.broadcast %22 : vector<1x512xf32> to vector<8x512xf32>
    %24 = arith.addf %21, %23 : vector<8x512xf32>
    %25 = arith.truncf %24 : vector<8x512xf32> to vector<8x512xbf16>
    %26 = vector.shape_cast %13 : vector<8x512xbf16> to vector<1x8x512xbf16>
    %27 = vector.shape_cast %19 : vector<8x512xbf16> to vector<1x8x512xbf16>
    %28 = vector.shape_cast %25 : vector<8x512xbf16> to vector<1x8x512xbf16>
    %29 = vector.extract_strided_slice %26 {offsets = [0, 0, 0], sizes = [1, 8, 128], strides = [1, 1, 1]} : vector<1x8x512xbf16> to vector<1x8x128xbf16>
    %30 = vector.extract_strided_slice %27 {offsets = [0, 0, 0], sizes = [1, 8, 128], strides = [1, 1, 1]} : vector<1x8x512xbf16> to vector<1x8x128xbf16>
    "tpu.trace_start"() <{level = 10 : i32, message = "bld,bmd->blm"}> : () -> ()
    %cst_16 = arith.constant dense<0.000000e+00> : vector<1x8x8xf32>
    %31 = tpu.matmul %29, %30, %cst_16 {dimension_numbers = #tpu.dot_dimension_numbers<[2], [2], [1], [1], [0, 0, 0, 1, 1, 1], [0], [0]>} : vector<1x8x128xbf16>, vector<1x8x128xbf16>, vector<1x8x8xf32> -> vector<1x8x8xf32>
    "tpu.trace_stop"() : () -> ()
    %cst_17 = arith.constant dense<0xFF800000> : vector<1x8xf32>
    %32 = vector.multi_reduction <maximumf>, %31, %cst_17 [2] : vector<1x8x8xf32> to vector<1x8xf32>
    %33 = vector.shape_cast %32 : vector<1x8xf32> to vector<1x8x1xf32>
    %34 = vector.broadcast %33 : vector<1x8x1xf32> to vector<1x8x8xf32>
    %35 = arith.subf %31, %34 : vector<1x8x8xf32>
    %36 = math.exp %35 : vector<1x8x8xf32>
    %cst_18 = arith.constant dense<0.000000e+00> : vector<1x8xf32>
    %37 = vector.multi_reduction <add>, %36, %cst_18 [2] : vector<1x8x8xf32> to vector<1x8xf32>
    %38 = vector.shape_cast %37 : vector<1x8xf32> to vector<1x8x1xf32>
    %39 = tpu.reciprocal %38 {approx = true} : vector<1x8x1xf32> -> vector<1x8x1xf32>
    %40 = vector.broadcast %39 : vector<1x8x1xf32> to vector<1x8x8xf32>
    %41 = arith.mulf %36, %40 : vector<1x8x8xf32>
    %42 = arith.truncf %41 : vector<1x8x8xf32> to vector<1x8x8xbf16>
    %43 = vector.extract_strided_slice %28 {offsets = [0, 0, 0], sizes = [1, 8, 128], strides = [1, 1, 1]} : vector<1x8x512xbf16> to vector<1x8x128xbf16>
    "tpu.trace_start"() <{level = 10 : i32, message = "blm,bmd->bld"}> : () -> ()
    %cst_19 = arith.constant dense<0.000000e+00> : vector<1x8x128xf32>
    %44 = tpu.matmul %42, %43, %cst_19 {dimension_numbers = #tpu.dot_dimension_numbers<[2], [1], [1], [2], [0, 0, 0, 1, 1, 2], [0], [0]>} : vector<1x8x8xbf16>, vector<1x8x128xbf16>, vector<1x8x128xf32> -> vector<1x8x128xf32>
    "tpu.trace_stop"() : () -> ()
    %45 = arith.truncf %44 : vector<1x8x128xf32> to vector<1x8x128xbf16>
    %c0_20 = arith.constant 0 : index
    %c0_21 = arith.constant 0 : index
    %c0_22 = arith.constant 0 : index
    %46 = vector.load %arg19[%c0_20, %c0_21, %c0_22] : memref<1x8x512xbf16, #tpu.memory_space<vmem>>, vector<1x8x128xbf16>
    tpu.vector_store %arg19[%c0_20, %c0_21, %c0_22], %45 {strides = array<i32>} : memref<1x8x512xbf16, #tpu.memory_space<vmem>>, vector<1x8x128xbf16>,
    %47 = vector.extract_strided_slice %26 {offsets = [0, 0, 128], sizes = [1, 8, 128], strides = [1, 1, 1]} : vector<1x8x512xbf16> to vector<1x8x128xbf16>
    %48 = vector.extract_strided_slice %27 {offsets = [0, 0, 128], sizes = [1, 8, 128], strides = [1, 1, 1]} : vector<1x8x512xbf16> to vector<1x8x128xbf16>
    "tpu.trace_start"() <{level = 10 : i32, message = "bld,bmd->blm"}> : () -> ()
    %cst_23 = arith.constant dense<0.000000e+00> : vector<1x8x8xf32>
    %49 = tpu.matmul %47, %48, %cst_23 {dimension_numbers = #tpu.dot_dimension_numbers<[2], [2], [1], [1], [0, 0, 0, 1, 1, 1], [0], [0]>} : vector<1x8x128xbf16>, vector<1x8x128xbf16>, vector<1x8x8xf32> -> vector<1x8x8xf32>
    "tpu.trace_stop"() : () -> ()
    %cst_24 = arith.constant dense<0xFF800000> : vector<1x8xf32>
    %50 = vector.multi_reduction <maximumf>, %49, %cst_24 [2] : vector<1x8x8xf32> to vector<1x8xf32>
    %51 = vector.shape_cast %50 : vector<1x8xf32> to vector<1x8x1xf32>
    %52 = vector.broadcast %51 : vector<1x8x1xf32> to vector<1x8x8xf32>
    %53 = arith.subf %49, %52 : vector<1x8x8xf32>
    %54 = math.exp %53 : vector<1x8x8xf32>
    %cst_25 = arith.constant dense<0.000000e+00> : vector<1x8xf32>
    %55 = vector.multi_reduction <add>, %54, %cst_25 [2] : vector<1x8x8xf32> to vector<1x8xf32>
    %56 = vector.shape_cast %55 : vector<1x8xf32> to vector<1x8x1xf32>
    %57 = tpu.reciprocal %56 {approx = true} : vector<1x8x1xf32> -> vector<1x8x1xf32>
    %58 = vector.broadcast %57 : vector<1x8x1xf32> to vector<1x8x8xf32>
    %59 = arith.mulf %54, %58 : vector<1x8x8xf32>
    %60 = arith.truncf %59 : vector<1x8x8xf32> to vector<1x8x8xbf16>
    %61 = vector.extract_strided_slice %28 {offsets = [0, 0, 128], sizes = [1, 8, 128], strides = [1, 1, 1]} : vector<1x8x512xbf16> to vector<1x8x128xbf16>
    "tpu.trace_start"() <{level = 10 : i32, message = "blm,bmd->bld"}> : () -> ()
    %cst_26 = arith.constant dense<0.000000e+00> : vector<1x8x128xf32>
    %62 = tpu.matmul %60, %61, %cst_26 {dimension_numbers = #tpu.dot_dimension_numbers<[2], [1], [1], [2], [0, 0, 0, 1, 1, 2], [0], [0]>} : vector<1x8x8xbf16>, vector<1x8x128xbf16>, vector<1x8x128xf32> -> vector<1x8x128xf32>
    "tpu.trace_stop"() : () -> ()
    %63 = arith.truncf %62 : vector<1x8x128xf32> to vector<1x8x128xbf16>
    %c0_27 = arith.constant 0 : index
    %c0_28 = arith.constant 0 : index
    %c128 = arith.constant 128 : index
    %64 = vector.load %arg19[%c0_27, %c0_28, %c128] : memref<1x8x512xbf16, #tpu.memory_space<vmem>>, vector<1x8x128xbf16>
    tpu.vector_store %arg19[%c0_27, %c0_28, %c128], %63 {strides = array<i32>} : memref<1x8x512xbf16, #tpu.memory_space<vmem>>, vector<1x8x128xbf16>,
    %65 = vector.extract_strided_slice %26 {offsets = [0, 0, 256], sizes = [1, 8, 128], strides = [1, 1, 1]} : vector<1x8x512xbf16> to vector<1x8x128xbf16>
    %66 = vector.extract_strided_slice %27 {offsets = [0, 0, 256], sizes = [1, 8, 128], strides = [1, 1, 1]} : vector<1x8x512xbf16> to vector<1x8x128xbf16>
    "tpu.trace_start"() <{level = 10 : i32, message = "bld,bmd->blm"}> : () -> ()
    %cst_29 = arith.constant dense<0.000000e+00> : vector<1x8x8xf32>
    %67 = tpu.matmul %65, %66, %cst_29 {dimension_numbers = #tpu.dot_dimension_numbers<[2], [2], [1], [1], [0, 0, 0, 1, 1, 1], [0], [0]>} : vector<1x8x128xbf16>, vector<1x8x128xbf16>, vector<1x8x8xf32> -> vector<1x8x8xf32>
    "tpu.trace_stop"() : () -> ()
    %cst_30 = arith.constant dense<0xFF800000> : vector<1x8xf32>
    %68 = vector.multi_reduction <maximumf>, %67, %cst_30 [2] : vector<1x8x8xf32> to vector<1x8xf32>
    %69 = vector.shape_cast %68 : vector<1x8xf32> to vector<1x8x1xf32>
    %70 = vector.broadcast %69 : vector<1x8x1xf32> to vector<1x8x8xf32>
    %71 = arith.subf %67, %70 : vector<1x8x8xf32>
    %72 = math.exp %71 : vector<1x8x8xf32>
    %cst_31 = arith.constant dense<0.000000e+00> : vector<1x8xf32>
    %73 = vector.multi_reduction <add>, %72, %cst_31 [2] : vector<1x8x8xf32> to vector<1x8xf32>
    %74 = vector.shape_cast %73 : vector<1x8xf32> to vector<1x8x1xf32>
    %75 = tpu.reciprocal %74 {approx = true} : vector<1x8x1xf32> -> vector<1x8x1xf32>
    %76 = vector.broadcast %75 : vector<1x8x1xf32> to vector<1x8x8xf32>
    %77 = arith.mulf %72, %76 : vector<1x8x8xf32>
    %78 = arith.truncf %77 : vector<1x8x8xf32> to vector<1x8x8xbf16>
    %79 = vector.extract_strided_slice %28 {offsets = [0, 0, 256], sizes = [1, 8, 128], strides = [1, 1, 1]} : vector<1x8x512xbf16> to vector<1x8x128xbf16>
    "tpu.trace_start"() <{level = 10 : i32, message = "blm,bmd->bld"}> : () -> ()
    %cst_32 = arith.constant dense<0.000000e+00> : vector<1x8x128xf32>
    %80 = tpu.matmul %78, %79, %cst_32 {dimension_numbers = #tpu.dot_dimension_numbers<[2], [1], [1], [2], [0, 0, 0, 1, 1, 2], [0], [0]>} : vector<1x8x8xbf16>, vector<1x8x128xbf16>, vector<1x8x128xf32> -> vector<1x8x128xf32>
    "tpu.trace_stop"() : () -> ()
    %81 = arith.truncf %80 : vector<1x8x128xf32> to vector<1x8x128xbf16>
    %c0_33 = arith.constant 0 : index
    %c0_34 = arith.constant 0 : index
    %c256 = arith.constant 256 : index
    %82 = vector.load %arg19[%c0_33, %c0_34, %c256] : memref<1x8x512xbf16, #tpu.memory_space<vmem>>, vector<1x8x128xbf16>
    tpu.vector_store %arg19[%c0_33, %c0_34, %c256], %81 {strides = array<i32>} : memref<1x8x512xbf16, #tpu.memory_space<vmem>>, vector<1x8x128xbf16>,
    %83 = vector.extract_strided_slice %26 {offsets = [0, 0, 384], sizes = [1, 8, 128], strides = [1, 1, 1]} : vector<1x8x512xbf16> to vector<1x8x128xbf16>
    %84 = vector.extract_strided_slice %27 {offsets = [0, 0, 384], sizes = [1, 8, 128], strides = [1, 1, 1]} : vector<1x8x512xbf16> to vector<1x8x128xbf16>
    "tpu.trace_start"() <{level = 10 : i32, message = "bld,bmd->blm"}> : () -> ()
    %cst_35 = arith.constant dense<0.000000e+00> : vector<1x8x8xf32>
    %85 = tpu.matmul %83, %84, %cst_35 {dimension_numbers = #tpu.dot_dimension_numbers<[2], [2], [1], [1], [0, 0, 0, 1, 1, 1], [0], [0]>} : vector<1x8x128xbf16>, vector<1x8x128xbf16>, vector<1x8x8xf32> -> vector<1x8x8xf32>
    "tpu.trace_stop"() : () -> ()
    %cst_36 = arith.constant dense<0xFF800000> : vector<1x8xf32>
    %86 = vector.multi_reduction <maximumf>, %85, %cst_36 [2] : vector<1x8x8xf32> to vector<1x8xf32>
    %87 = vector.shape_cast %86 : vector<1x8xf32> to vector<1x8x1xf32>
    %88 = vector.broadcast %87 : vector<1x8x1xf32> to vector<1x8x8xf32>
    %89 = arith.subf %85, %88 : vector<1x8x8xf32>
    %90 = math.exp %89 : vector<1x8x8xf32>
    %cst_37 = arith.constant dense<0.000000e+00> : vector<1x8xf32>
    %91 = vector.multi_reduction <add>, %90, %cst_37 [2] : vector<1x8x8xf32> to vector<1x8xf32>
    %92 = vector.shape_cast %91 : vector<1x8xf32> to vector<1x8x1xf32>
    %93 = tpu.reciprocal %92 {approx = true} : vector<1x8x1xf32> -> vector<1x8x1xf32>
    %94 = vector.broadcast %93 : vector<1x8x1xf32> to vector<1x8x8xf32>
    %95 = arith.mulf %90, %94 : vector<1x8x8xf32>
    %96 = arith.truncf %95 : vector<1x8x8xf32> to vector<1x8x8xbf16>
    %97 = vector.extract_strided_slice %28 {offsets = [0, 0, 384], sizes = [1, 8, 128], strides = [1, 1, 1]} : vector<1x8x512xbf16> to vector<1x8x128xbf16>
    "tpu.trace_start"() <{level = 10 : i32, message = "blm,bmd->bld"}> : () -> ()
    %cst_38 = arith.constant dense<0.000000e+00> : vector<1x8x128xf32>
    %98 = tpu.matmul %96, %97, %cst_38 {dimension_numbers = #tpu.dot_dimension_numbers<[2], [1], [1], [2], [0, 0, 0, 1, 1, 2], [0], [0]>} : vector<1x8x8xbf16>, vector<1x8x128xbf16>, vector<1x8x128xf32> -> vector<1x8x128xf32>
    "tpu.trace_stop"() : () -> ()
    %99 = arith.truncf %98 : vector<1x8x128xf32> to vector<1x8x128xbf16>
    %c0_39 = arith.constant 0 : index
    %c0_40 = arith.constant 0 : index
    %c384 = arith.constant 384 : index
    %100 = vector.load %arg19[%c0_39, %c0_40, %c384] : memref<1x8x512xbf16, #tpu.memory_space<vmem>>, vector<1x8x128xbf16>
    tpu.vector_store %arg19[%c0_39, %c0_40, %c384], %99 {strides = array<i32>} : memref<1x8x512xbf16, #tpu.memory_space<vmem>>, vector<1x8x128xbf16>,
    %c0_41 = arith.constant 0 : index
    %c0_42 = arith.constant 0 : index
    %c0_43 = arith.constant 0 : index
    %101 = vector.load %arg19[%c0_41, %c0_42, %c0_43] : memref<1x8x512xbf16, #tpu.memory_space<vmem>>, vector<1x8x512xbf16>
    %102 = vector.shape_cast %101 : vector<1x8x512xbf16> to vector<8x512xbf16>
    %c0_44 = arith.constant 0 : index
    %c0_45 = arith.constant 0 : index
    %103 = vector.load %arg8[%c0_44, %c0_45] : memref<512x128xbf16, #tpu.memory_space<vmem>>, vector<512x128xbf16>
    %cst_46 = arith.constant dense<0.000000e+00> : vector<8x128xf32>
    %104 = tpu.matmul %102, %103, %cst_46 {dimension_numbers = #tpu.dot_dimension_numbers<[1], [0], [0], [1], [0, 0, 1, 1], [], []>} : vector<8x512xbf16>, vector<512x128xbf16>, vector<8x128xf32> -> vector<8x128xf32>
    %c0_47 = arith.constant 0 : index
    %c0_48 = arith.constant 0 : index
    %105 = vector.load %arg9[%c0_47, %c0_48] : memref<1x128xf32, #tpu.memory_space<vmem>>, vector<1x128xf32>
    %106 = vector.broadcast %105 : vector<1x128xf32> to vector<8x128xf32>
    %107 = arith.addf %104, %106 : vector<8x128xf32>
    %108 = arith.addf %6, %107 : vector<8x128xf32>
    %c0_49 = arith.constant 0 : index
    %c0_50 = arith.constant 0 : index
    %109 = vector.load %arg10[%c0_49, %c0_50] : memref<1x128xf32, #tpu.memory_space<vmem>>, vector<1x128xf32>
    %c0_51 = arith.constant 0 : index
    %c0_52 = arith.constant 0 : index
    %110 = vector.load %arg11[%c0_51, %c0_52] : memref<1x128xf32, #tpu.memory_space<vmem>>, vector<1x128xf32>
    %cst_53 = arith.constant dense<0.000000e+00> : vector<8xf32>
    %111 = vector.multi_reduction <add>, %108, %cst_53 [1] : vector<8x128xf32> to vector<8xf32>
    %112 = vector.shape_cast %111 : vector<8xf32> to vector<8x1xf32>
    %cst_54 = arith.constant 3.125000e-02 : f32
    %113 = vector.broadcast %cst_54 : f32 to vector<8x1xf32>
    %114 = arith.mulf %112, %113 : vector<8x1xf32>
    %115 = vector.broadcast %114 : vector<8x1xf32> to vector<8x128xf32>
    %116 = arith.subf %108, %115 : vector<8x128xf32>
    %117 = vector.broadcast %4 : vector<1x128xf32> to vector<8x128xf32>
    %118 = arith.mulf %116, %117 : vector<8x128xf32>
    %119 = arith.mulf %118, %118 : vector<8x128xf32>
    %cst_55 = arith.constant dense<0.000000e+00> : vector<8xf32>
    %120 = vector.multi_reduction <add>, %119, %cst_55 [1] : vector<8x128xf32> to vector<8xf32>
    %121 = vector.shape_cast %120 : vector<8xf32> to vector<8x1xf32>
    %cst_56 = arith.constant 3.125000e-02 : f32
    %122 = vector.broadcast %cst_56 : f32 to vector<8x1xf32>
    %123 = arith.mulf %121, %122 : vector<8x1xf32>
    %cst_57 = arith.constant 9.99999974E-6 : f32
    %124 = vector.broadcast %cst_57 : f32 to vector<8x1xf32>
    %125 = arith.addf %123, %124 : vector<8x1xf32>
    %126 = math.rsqrt %125 : vector<8x1xf32>
    %127 = vector.broadcast %126 : vector<8x1xf32> to vector<8x128xf32>
    %128 = arith.mulf %118, %127 : vector<8x128xf32>
    %129 = vector.broadcast %109 : vector<1x128xf32> to vector<8x128xf32>
    %130 = arith.mulf %128, %129 : vector<8x128xf32>
    %131 = vector.broadcast %110 : vector<1x128xf32> to vector<8x128xf32>
    %132 = arith.addf %130, %131 : vector<8x128xf32>
    %133 = arith.truncf %132 : vector<8x128xf32> to vector<8x128xbf16>
    %c0_58 = arith.constant 0 : index
    %c0_59 = arith.constant 0 : index
    %134 = vector.load %arg12[%c0_58, %c0_59] : memref<128x128xbf16, #tpu.memory_space<vmem>>, vector<128x128xbf16>
    %cst_60 = arith.constant dense<0.000000e+00> : vector<8x128xf32>
    %135 = tpu.matmul %133, %134, %cst_60 {dimension_numbers = #tpu.dot_dimension_numbers<[1], [0], [0], [1], [0, 0, 1, 1], [], []>} : vector<8x128xbf16>, vector<128x128xbf16>, vector<8x128xf32> -> vector<8x128xf32>
    %c0_61 = arith.constant 0 : index
    %c0_62 = arith.constant 0 : index
    %136 = vector.load %arg13[%c0_61, %c0_62] : memref<1x128xf32, #tpu.memory_space<vmem>>, vector<1x128xf32>
    %137 = vector.broadcast %136 : vector<1x128xf32> to vector<8x128xf32>
    %138 = arith.addf %135, %137 : vector<8x128xf32>
    %cst_63 = arith.constant 0.000000e+00 : f32
    %139 = vector.broadcast %cst_63 : f32 to vector<8x128xf32>
    %140 = arith.maximumf %138, %139 : vector<8x128xf32>
    %141 = arith.truncf %140 : vector<8x128xf32> to vector<8x128xbf16>
    %c0_64 = arith.constant 0 : index
    %c0_65 = arith.constant 0 : index
    %142 = vector.load %arg14[%c0_64, %c0_65] : memref<128x128xbf16, #tpu.memory_space<vmem>>, vector<128x128xbf16>
    %cst_66 = arith.constant dense<0.000000e+00> : vector<8x128xf32>
    %143 = tpu.matmul %141, %142, %cst_66 {dimension_numbers = #tpu.dot_dimension_numbers<[1], [0], [0], [1], [0, 0, 1, 1], [], []>} : vector<8x128xbf16>, vector<128x128xbf16>, vector<8x128xf32> -> vector<8x128xf32>
    %c0_67 = arith.constant 0 : index
    %c0_68 = arith.constant 0 : index
    %144 = vector.load %arg15[%c0_67, %c0_68] : memref<1x128xf32, #tpu.memory_space<vmem>>, vector<1x128xf32>
    %145 = vector.broadcast %144 : vector<1x128xf32> to vector<8x128xf32>
    %146 = arith.addf %143, %145 : vector<8x128xf32>
    %147 = arith.addf %132, %146 : vector<8x128xf32>
    %c0_69 = arith.constant 0 : index
    %c0_70 = arith.constant 0 : index
    %148 = vector.load %arg16[%c0_69, %c0_70] : memref<1x128xf32, #tpu.memory_space<vmem>>, vector<1x128xf32>
    %c0_71 = arith.constant 0 : index
    %c0_72 = arith.constant 0 : index
    %149 = vector.load %arg17[%c0_71, %c0_72] : memref<1x128xf32, #tpu.memory_space<vmem>>, vector<1x128xf32>
    %cst_73 = arith.constant dense<0.000000e+00> : vector<8xf32>
    %150 = vector.multi_reduction <add>, %147, %cst_73 [1] : vector<8x128xf32> to vector<8xf32>
    %151 = vector.shape_cast %150 : vector<8xf32> to vector<8x1xf32>
    %cst_74 = arith.constant 3.125000e-02 : f32
    %152 = vector.broadcast %cst_74 : f32 to vector<8x1xf32>
    %153 = arith.mulf %151, %152 : vector<8x1xf32>
    %154 = vector.broadcast %153 : vector<8x1xf32> to vector<8x128xf32>
    %155 = arith.subf %147, %154 : vector<8x128xf32>
    %156 = vector.broadcast %4 : vector<1x128xf32> to vector<8x128xf32>
    %157 = arith.mulf %155, %156 : vector<8x128xf32>
    %158 = arith.mulf %157, %157 : vector<8x128xf32>
    %cst_75 = arith.constant dense<0.000000e+00> : vector<8xf32>
    %159 = vector.multi_reduction <add>, %158, %cst_75 [1] : vector<8x128xf32> to vector<8xf32>
    %160 = vector.shape_cast %159 : vector<8xf32> to vector<8x1xf32>
    %cst_76 = arith.constant 3.125000e-02 : f32
    %161 = vector.broadcast %cst_76 : f32 to vector<8x1xf32>
    %162 = arith.mulf %160, %161 : vector<8x1xf32>
    %cst_77 = arith.constant 9.99999974E-6 : f32
    %163 = vector.broadcast %cst_77 : f32 to vector<8x1xf32>
    %164 = arith.addf %162, %163 : vector<8x1xf32>
    %165 = math.rsqrt %164 : vector<8x1xf32>
    %166 = vector.broadcast %165 : vector<8x1xf32> to vector<8x128xf32>
    %167 = arith.mulf %157, %166 : vector<8x128xf32>
    %168 = vector.broadcast %148 : vector<1x128xf32> to vector<8x128xf32>
    %169 = arith.mulf %167, %168 : vector<8x128xf32>
    %170 = vector.broadcast %149 : vector<1x128xf32> to vector<8x128xf32>
    %171 = arith.addf %169, %170 : vector<8x128xf32>
    %172 = vector.shape_cast %171 : vector<8x128xf32> to vector<1x8x128xf32>
    %c0_78 = arith.constant 0 : index
    %c0_79 = arith.constant 0 : index
    %c0_80 = arith.constant 0 : index
    %173 = vector.load %arg18[%c0_78, %c0_79, %c0_80] : memref<1x8x128xf32, #tpu.memory_space<vmem>>, vector<1x8x128xf32>
    tpu.vector_store %arg18[%c0_78, %c0_79, %c0_80], %172 {strides = array<i32>} : memref<1x8x128xf32, #tpu.memory_space<vmem>>, vector<1x8x128xf32>,
    return
  }
  func.func @transform_0(%arg0: i32) -> (i32, i32, i32) {
    %c0_i32 = arith.constant 0 : i32
    %c0_i32_0 = arith.constant 0 : i32
    %c0_i32_1 = arith.constant 0 : i32
    return %arg0, %c0_i32, %c0_i32_0 : i32, i32, i32
  }
  func.func @transform_1(%arg0: i32) -> (i32, i32) {
    %c0_i32 = arith.constant 0 : i32
    %c0_i32_0 = arith.constant 0 : i32
    %c0_i32_1 = arith.constant 0 : i32
    return %c0_i32, %c0_i32_0 : i32, i32
  }
  func.func @transform_2(%arg0: i32) -> (i32, i32) {
    %c0_i32 = arith.constant 0 : i32
    %c0_i32_0 = arith.constant 0 : i32
    %c0_i32_1 = arith.constant 0 : i32
    return %c0_i32, %c0_i32_0 : i32, i32
  }
  func.func @transform_3(%arg0: i32) -> (i32, i32) {
    %c0_i32 = arith.constant 0 : i32
    %c0_i32_0 = arith.constant 0 : i32
    %c0_i32_1 = arith.constant 0 : i32
    return %c0_i32, %c0_i32_0 : i32, i32
  }
  func.func @transform_4(%arg0: i32) -> (i32, i32) {
    %c0_i32 = arith.constant 0 : i32
    %c0_i32_0 = arith.constant 0 : i32
    %c0_i32_1 = arith.constant 0 : i32
    return %c0_i32, %c0_i32_0 : i32, i32
  }
  func.func @transform_5(%arg0: i32) -> (i32, i32) {
    %c0_i32 = arith.constant 0 : i32
    %c0_i32_0 = arith.constant 0 : i32
    %c0_i32_1 = arith.constant 0 : i32
    return %c0_i32, %c0_i32_0 : i32, i32
  }
  func.func @transform_6(%arg0: i32) -> (i32, i32) {
    %c0_i32 = arith.constant 0 : i32
    %c0_i32_0 = arith.constant 0 : i32
    %c0_i32_1 = arith.constant 0 : i32
    return %c0_i32, %c0_i32_0 : i32, i32
  }
  func.func @transform_7(%arg0: i32) -> (i32, i32) {
    %c0_i32 = arith.constant 0 : i32
    %c0_i32_0 = arith.constant 0 : i32
    %c0_i32_1 = arith.constant 0 : i32
    return %c0_i32, %c0_i32_0 : i32, i32
  }
  func.func @transform_8(%arg0: i32) -> (i32, i32) {
    %c0_i32 = arith.constant 0 : i32
    %c0_i32_0 = arith.constant 0 : i32
    %c0_i32_1 = arith.constant 0 : i32
    return %c0_i32, %c0_i32_0 : i32, i32
  }
  func.func @transform_9(%arg0: i32) -> (i32, i32) {
    %c0_i32 = arith.constant 0 : i32
    %c0_i32_0 = arith.constant 0 : i32
    %c0_i32_1 = arith.constant 0 : i32
    return %c0_i32, %c0_i32_0 : i32, i32
  }
  func.func @transform_10(%arg0: i32) -> (i32, i32) {
    %c0_i32 = arith.constant 0 : i32
    %c0_i32_0 = arith.constant 0 : i32
    %c0_i32_1 = arith.constant 0 : i32
    return %c0_i32, %c0_i32_0 : i32, i32
  }
  func.func @transform_11(%arg0: i32) -> (i32, i32) {
    %c0_i32 = arith.constant 0 : i32
    %c0_i32_0 = arith.constant 0 : i32
    %c0_i32_1 = arith.constant 0 : i32
    return %c0_i32, %c0_i32_0 : i32, i32
  }
  func.func @transform_12(%arg0: i32) -> (i32, i32) {
    %c0_i32 = arith.constant 0 : i32
    %c0_i32_0 = arith.constant 0 : i32
    %c0_i32_1 = arith.constant 0 : i32
    return %c0_i32, %c0_i32_0 : i32, i32
  }
  func.func @transform_13(%arg0: i32) -> (i32, i32) {
    %c0_i32 = arith.constant 0 : i32
    %c0_i32_0 = arith.constant 0 : i32
    %c0_i32_1 = arith.constant 0 : i32
    return %c0_i32, %c0_i32_0 : i32, i32
  }
  func.func @transform_14(%arg0: i32) -> (i32, i32) {
    %c0_i32 = arith.constant 0 : i32
    %c0_i32_0 = arith.constant 0 : i32
    %c0_i32_1 = arith.constant 0 : i32
    return %c0_i32, %c0_i32_0 : i32, i32
  }
  func.func @transform_15(%arg0: i32) -> (i32, i32) {
    %c0_i32 = arith.constant 0 : i32
    %c0_i32_0 = arith.constant 0 : i32
    %c0_i32_1 = arith.constant 0 : i32
    return %c0_i32, %c0_i32_0 : i32, i32
  }
  func.func @transform_16(%arg0: i32) -> (i32, i32) {
    %c0_i32 = arith.constant 0 : i32
    %c0_i32_0 = arith.constant 0 : i32
    %c0_i32_1 = arith.constant 0 : i32
    return %c0_i32, %c0_i32_0 : i32, i32
  }
  func.func @transform_17(%arg0: i32) -> (i32, i32, i32) {
    %c0_i32 = arith.constant 0 : i32
    %c0_i32_0 = arith.constant 0 : i32
    %c0_i32_1 = arith.constant 0 : i32
    return %arg0, %c0_i32, %c0_i32_0 : i32, i32, i32
  }
}

module attributes {stable_mosaic.version = 11 : i64} {
  func.func @kernel(%arg0: i32, %arg1: memref<1x8x128xf32, #tpu.memory_space<vmem>>, %arg2: memref<128x512xbf16, #tpu.memory_space<vmem>>, %arg3: memref<1x512xf32, #tpu.memory_space<vmem>>, %arg4: memref<128x512xbf16, #tpu.memory_space<vmem>>, %arg5: memref<1x512xf32, #tpu.memory_space<vmem>>, %arg6: memref<128x512xbf16, #tpu.memory_space<vmem>>, %arg7: memref<1x512xf32, #tpu.memory_space<vmem>>, %arg8: memref<512x128xbf16, #tpu.memory_space<vmem>>, %arg9: memref<1x128xf32, #tpu.memory_space<vmem>>, %arg10: memref<1x128xf32, #tpu.memory_space<vmem>>, %arg11: memref<1x128xf32, #tpu.memory_space<vmem>>, %arg12: memref<128x128xbf16, #tpu.memory_space<vmem>>, %arg13: memref<1x128xf32, #tpu.memory_space<vmem>>, %arg14: memref<128x128xbf16, #tpu.memory_space<vmem>>, %arg15: memref<1x128xf32, #tpu.memory_space<vmem>>, %arg16: memref<1x128xf32, #tpu.memory_space<vmem>>, %arg17: memref<1x128xf32, #tpu.memory_space<vmem>>, %arg18: memref<1x8x128xf32, #tpu.memory_space<vmem>>, %arg19: memref<1x8x512xbf16, #tpu.memory_space<vmem>>) attributes {dimension_semantics = [#tpu.dimension_semantics<parallel>], iteration_bounds = array<i64: 2>, scalar_prefetch = 0 : i64, scratch_operands = 1 : i64, tpu.core_type = #tpu.core_type<tc>, window_params = [{transform_indices = @transform_0, window_bounds = array<i64: 1, 8, 128>}, {pipeline_mode = #tpu.pipeline_mode<synchronous>, transform_indices = @transform_1, window_bounds = array<i64: 128, 512>}, {pipeline_mode = #tpu.pipeline_mode<synchronous>, transform_indices = @transform_2, window_bounds = array<i64: 1, 512>}, {pipeline_mode = #tpu.pipeline_mode<synchronous>, transform_indices = @transform_3, window_bounds = array<i64: 128, 512>}, {pipeline_mode = #tpu.pipeline_mode<synchronous>, transform_indices = @transform_4, window_bounds = array<i64: 1, 512>}, {pipeline_mode = #tpu.pipeline_mode<synchronous>, transform_indices = @transform_5, window_bounds = array<i64: 128, 512>}, {pipeline_mode = #tpu.pipeline_mode<synchronous>, transform_indices = @transform_6, window_bounds = array<i64: 1, 512>}, {pipeline_mode = #tpu.pipeline_mode<synchronous>, transform_indices = @transform_7, window_bounds = array<i64: 512, 128>}, {pipeline_mode = #tpu.pipeline_mode<synchronous>, transform_indices = @transform_8, window_bounds = array<i64: 1, 128>}, {pipeline_mode = #tpu.pipeline_mode<synchronous>, transform_indices = @transform_9, window_bounds = array<i64: 1, 128>}, {pipeline_mode = #tpu.pipeline_mode<synchronous>, transform_indices = @transform_10, window_bounds = array<i64: 1, 128>}, {pipeline_mode = #tpu.pipeline_mode<synchronous>, transform_indices = @transform_11, window_bounds = array<i64: 128, 128>}, {pipeline_mode = #tpu.pipeline_mode<synchronous>, transform_indices = @transform_12, window_bounds = array<i64: 1, 128>}, {pipeline_mode = #tpu.pipeline_mode<synchronous>, transform_indices = @transform_13, window_bounds = array<i64: 128, 128>}, {pipeline_mode = #tpu.pipeline_mode<synchronous>, transform_indices = @transform_14, window_bounds = array<i64: 1, 128>}, {pipeline_mode = #tpu.pipeline_mode<synchronous>, transform_indices = @transform_15, window_bounds = array<i64: 1, 128>}, {pipeline_mode = #tpu.pipeline_mode<synchronous>, transform_indices = @transform_16, window_bounds = array<i64: 1, 128>}, {transform_indices = @transform_17, window_bounds = array<i64: 1, 8, 128>}]} {
    %0 = tpu.iota {dimensions = array<i32: 1>} : vector<1x128xi32>
    %c32_i32 = arith.constant 32 : i32
    %1 = vector.broadcast %c32_i32 : i32 to vector<1x128xi32>
    %2 = arith.cmpi slt, %0, %1 : vector<1x128xi32>
    %3 = arith.extui %2 : vector<1x128xi1> to vector<1x128xi32>
    %4 = arith.sitofp %3 : vector<1x128xi32> to vector<1x128xf32>
    %c0 = arith.constant 0 : index
    %c0_0 = arith.constant 0 : index
    %c0_1 = arith.constant 0 : index
    %5 = vector.load %arg1[%c0, %c0_0, %c0_1] : memref<1x8x128xf32, #tpu.memory_space<vmem>>, vector<1x8x128xf32>
    %6 = vector.shape_cast %5 : vector<1x8x128xf32> to vector<8x128xf32>
    %7 = arith.truncf %6 : vector<8x128xf32> to vector<8x128xbf16>
    %c0_2 = arith.constant 0 : index
    %c0_3 = arith.constant 0 : index
    %8 = vector.load %arg2[%c0_2, %c0_3] : memref<128x512xbf16, #tpu.memory_space<vmem>>, vector<128x512xbf16>
    %cst = arith.constant dense<0.000000e+00> : vector<8x512xf32>
    %9 = tpu.matmul %7, %8, %cst {dimension_numbers = #tpu.dot_dimension_numbers<[1], [0], [0], [1], [0, 0, 1, 1], [], []>} : vector<8x128xbf16>, vector<128x512xbf16>, vector<8x512xf32> -> vector<8x512xf32>
    %c0_4 = arith.constant 0 : index
    %c0_5 = arith.constant 0 : index
    %10 = vector.load %arg3[%c0_4, %c0_5] : memref<1x512xf32, #tpu.memory_space<vmem>>, vector<1x512xf32>
    %11 = vector.broadcast %10 : vector<1x512xf32> to vector<8x512xf32>
    %12 = arith.addf %9, %11 : vector<8x512xf32>
    %13 = arith.truncf %12 : vector<8x512xf32> to vector<8x512xbf16>
    %c0_6 = arith.constant 0 : index
    %c0_7 = arith.constant 0 : index
    %14 = vector.load %arg4[%c0_6, %c0_7] : memref<128x512xbf16, #tpu.memory_space<vmem>>, vector<128x512xbf16>
    %cst_8 = arith.constant dense<0.000000e+00> : vector<8x512xf32>
    %15 = tpu.matmul %7, %14, %cst_8 {dimension_numbers = #tpu.dot_dimension_numbers<[1], [0], [0], [1], [0, 0, 1, 1], [], []>} : vector<8x128xbf16>, vector<128x512xbf16>, vector<8x512xf32> -> vector<8x512xf32>
    %c0_9 = arith.constant 0 : index
    %c0_10 = arith.constant 0 : index
    %16 = vector.load %arg5[%c0_9, %c0_10] : memref<1x512xf32, #tpu.memory_space<vmem>>, vector<1x512xf32>
    %17 = vector.broadcast %16 : vector<1x512xf32> to vector<8x512xf32>
    %18 = arith.addf %15, %17 : vector<8x512xf32>
    %19 = arith.truncf %18 : vector<8x512xf32> to vector<8x512xbf16>
    %c0_11 = arith.constant 0 : index
    %c0_12 = arith.constant 0 : index
    %20 = vector.load %arg6[%c0_11, %c0_12] : memref<128x512xbf16, #tpu.memory_space<vmem>>, vector<128x512xbf16>
    %cst_13 = arith.constant dense<0.000000e+00> : vector<8x512xf32>
    %21 = tpu.matmul %7, %20, %cst_13 {dimension_numbers = #tpu.dot_dimension_numbers<[1], [0], [0], [1], [0, 0, 1, 1], [], []>} : vector<8x128xbf16>, vector<128x512xbf16>, vector<8x512xf32> -> vector<8x512xf32>
    %c0_14 = arith.constant 0 : index
    %c0_15 = arith.constant 0 : index
    %22 = vector.load %arg7[%c0_14, %c0_15] : memref<1x512xf32, #tpu.memory_space<vmem>>, vector<1x512xf32>
    %23 = vector.broadcast %22 : vector<1x512xf32> to vector<8x512xf32>
    %24 = arith.addf %21, %23 : vector<8x512xf32>
    %25 = arith.truncf %24 : vector<8x512xf32> to vector<8x512xbf16>
    %26 = vector.shape_cast %13 : vector<8x512xbf16> to vector<1x8x512xbf16>
    %27 = vector.shape_cast %19 : vector<8x512xbf16> to vector<1x8x512xbf16>
    %28 = vector.shape_cast %25 : vector<8x512xbf16> to vector<1x8x512xbf16>
    %29 = vector.extract_strided_slice %26 {offsets = [0, 0, 0], sizes = [1, 8, 128], strides = [1, 1, 1]} : vector<1x8x512xbf16> to vector<1x8x128xbf16>
    %30 = vector.extract_strided_slice %27 {offsets = [0, 0, 0], sizes = [1, 8, 128], strides = [1, 1, 1]} : vector<1x8x512xbf16> to vector<1x8x128xbf16>
    "tpu.trace_start"() <{level = 10 : i32, message = "bld,bmd->blm"}> : () -> ()
    %cst_16 = arith.constant dense<0.000000e+00> : vector<1x8x8xf32>
    %31 = tpu.matmul %29, %30, %cst_16 {dimension_numbers = #tpu.dot_dimension_numbers<[2], [2], [1], [1], [0, 0, 0, 1, 1, 1], [0], [0]>} : vector<1x8x128xbf16>, vector<1x8x128xbf16>, vector<1x8x8xf32> -> vector<1x8x8xf32>
    "tpu.trace_stop"() : () -> ()
    %cst_17 = arith.constant dense<0xFF800000> : vector<1x8xf32>
    %32 = vector.multi_reduction <maximumf>, %31, %cst_17 [2] : vector<1x8x8xf32> to vector<1x8xf32>
    %33 = vector.shape_cast %32 : vector<1x8xf32> to vector<1x8x1xf32>
    %34 = vector.broadcast %33 : vector<1x8x1xf32> to vector<1x8x8xf32>
    %35 = arith.subf %31, %34 : vector<1x8x8xf32>
    %36 = math.exp %35 : vector<1x8x8xf32>
    %cst_18 = arith.constant dense<0.000000e+00> : vector<1x8xf32>
    %37 = vector.multi_reduction <add>, %36, %cst_18 [2] : vector<1x8x8xf32> to vector<1x8xf32>
    %38 = vector.shape_cast %37 : vector<1x8xf32> to vector<1x8x1xf32>
    %39 = tpu.reciprocal %38 {approx = true} : vector<1x8x1xf32> -> vector<1x8x1xf32>
    %40 = vector.broadcast %39 : vector<1x8x1xf32> to vector<1x8x8xf32>
    %41 = arith.mulf %36, %40 : vector<1x8x8xf32>
    %42 = arith.truncf %41 : vector<1x8x8xf32> to vector<1x8x8xbf16>
    %43 = vector.extract_strided_slice %28 {offsets = [0, 0, 0], sizes = [1, 8, 128], strides = [1, 1, 1]} : vector<1x8x512xbf16> to vector<1x8x128xbf16>
    "tpu.trace_start"() <{level = 10 : i32, message = "blm,bmd->bld"}> : () -> ()
    %cst_19 = arith.constant dense<0.000000e+00> : vector<1x8x128xf32>
    %44 = tpu.matmul %42, %43, %cst_19 {dimension_numbers = #tpu.dot_dimension_numbers<[2], [1], [1], [2], [0, 0, 0, 1, 1, 2], [0], [0]>} : vector<1x8x8xbf16>, vector<1x8x128xbf16>, vector<1x8x128xf32> -> vector<1x8x128xf32>
    "tpu.trace_stop"() : () -> ()
    %45 = arith.truncf %44 : vector<1x8x128xf32> to vector<1x8x128xbf16>
    %c0_20 = arith.constant 0 : index
    %c0_21 = arith.constant 0 : index
    %c0_22 = arith.constant 0 : index
    %46 = vector.load %arg19[%c0_20, %c0_21, %c0_22] : memref<1x8x512xbf16, #tpu.memory_space<vmem>>, vector<1x8x128xbf16>
    tpu.vector_store %arg19[%c0_20, %c0_21, %c0_22], %45 {strides = array<i32>} : memref<1x8x512xbf16, #tpu.memory_space<vmem>>, vector<1x8x128xbf16>,
    %47 = vector.extract_strided_slice %26 {offsets = [0, 0, 128], sizes = [1, 8, 128], strides = [1, 1, 1]} : vector<1x8x512xbf16> to vector<1x8x128xbf16>
    %48 = vector.extract_strided_slice %27 {offsets = [0, 0, 128], sizes = [1, 8, 128], strides = [1, 1, 1]} : vector<1x8x512xbf16> to vector<1x8x128xbf16>
    "tpu.trace_start"() <{level = 10 : i32, message = "bld,bmd->blm"}> : () -> ()
    %cst_23 = arith.constant dense<0.000000e+00> : vector<1x8x8xf32>
    %49 = tpu.matmul %47, %48, %cst_23 {dimension_numbers = #tpu.dot_dimension_numbers<[2], [2], [1], [1], [0, 0, 0, 1, 1, 1], [0], [0]>} : vector<1x8x128xbf16>, vector<1x8x128xbf16>, vector<1x8x8xf32> -> vector<1x8x8xf32>
    "tpu.trace_stop"() : () -> ()
    %cst_24 = arith.constant dense<0xFF800000> : vector<1x8xf32>
    %50 = vector.multi_reduction <maximumf>, %49, %cst_24 [2] : vector<1x8x8xf32> to vector<1x8xf32>
    %51 = vector.shape_cast %50 : vector<1x8xf32> to vector<1x8x1xf32>
    %52 = vector.broadcast %51 : vector<1x8x1xf32> to vector<1x8x8xf32>
    %53 = arith.subf %49, %52 : vector<1x8x8xf32>
    %54 = math.exp %53 : vector<1x8x8xf32>
    %cst_25 = arith.constant dense<0.000000e+00> : vector<1x8xf32>
    %55 = vector.multi_reduction <add>, %54, %cst_25 [2] : vector<1x8x8xf32> to vector<1x8xf32>
    %56 = vector.shape_cast %55 : vector<1x8xf32> to vector<1x8x1xf32>
    %57 = tpu.reciprocal %56 {approx = true} : vector<1x8x1xf32> -> vector<1x8x1xf32>
    %58 = vector.broadcast %57 : vector<1x8x1xf32> to vector<1x8x8xf32>
    %59 = arith.mulf %54, %58 : vector<1x8x8xf32>
    %60 = arith.truncf %59 : vector<1x8x8xf32> to vector<1x8x8xbf16>
    %61 = vector.extract_strided_slice %28 {offsets = [0, 0, 128], sizes = [1, 8, 128], strides = [1, 1, 1]} : vector<1x8x512xbf16> to vector<1x8x128xbf16>
    "tpu.trace_start"() <{level = 10 : i32, message = "blm,bmd->bld"}> : () -> ()
    %cst_26 = arith.constant dense<0.000000e+00> : vector<1x8x128xf32>
    %62 = tpu.matmul %60, %61, %cst_26 {dimension_numbers = #tpu.dot_dimension_numbers<[2], [1], [1], [2], [0, 0, 0, 1, 1, 2], [0], [0]>} : vector<1x8x8xbf16>, vector<1x8x128xbf16>, vector<1x8x128xf32> -> vector<1x8x128xf32>
    "tpu.trace_stop"() : () -> ()
    %63 = arith.truncf %62 : vector<1x8x128xf32> to vector<1x8x128xbf16>
    %c0_27 = arith.constant 0 : index
    %c0_28 = arith.constant 0 : index
    %c128 = arith.constant 128 : index
    %64 = vector.load %arg19[%c0_27, %c0_28, %c128] : memref<1x8x512xbf16, #tpu.memory_space<vmem>>, vector<1x8x128xbf16>
    tpu.vector_store %arg19[%c0_27, %c0_28, %c128], %63 {strides = array<i32>} : memref<1x8x512xbf16, #tpu.memory_space<vmem>>, vector<1x8x128xbf16>,
    %65 = vector.extract_strided_slice %26 {offsets = [0, 0, 256], sizes = [1, 8, 128], strides = [1, 1, 1]} : vector<1x8x512xbf16> to vector<1x8x128xbf16>
    %66 = vector.extract_strided_slice %27 {offsets = [0, 0, 256], sizes = [1, 8, 128], strides = [1, 1, 1]} : vector<1x8x512xbf16> to vector<1x8x128xbf16>
    "tpu.trace_start"() <{level = 10 : i32, message = "bld,bmd->blm"}> : () -> ()
    %cst_29 = arith.constant dense<0.000000e+00> : vector<1x8x8xf32>
    %67 = tpu.matmul %65, %66, %cst_29 {dimension_numbers = #tpu.dot_dimension_numbers<[2], [2], [1], [1], [0, 0, 0, 1, 1, 1], [0], [0]>} : vector<1x8x128xbf16>, vector<1x8x128xbf16>, vector<1x8x8xf32> -> vector<1x8x8xf32>
    "tpu.trace_stop"() : () -> ()
    %cst_30 = arith.constant dense<0xFF800000> : vector<1x8xf32>
    %68 = vector.multi_reduction <maximumf>, %67, %cst_30 [2] : vector<1x8x8xf32> to vector<1x8xf32>
    %69 = vector.shape_cast %68 : vector<1x8xf32> to vector<1x8x1xf32>
    %70 = vector.broadcast %69 : vector<1x8x1xf32> to vector<1x8x8xf32>
    %71 = arith.subf %67, %70 : vector<1x8x8xf32>
    %72 = math.exp %71 : vector<1x8x8xf32>
    %cst_31 = arith.constant dense<0.000000e+00> : vector<1x8xf32>
    %73 = vector.multi_reduction <add>, %72, %cst_31 [2] : vector<1x8x8xf32> to vector<1x8xf32>
    %74 = vector.shape_cast %73 : vector<1x8xf32> to vector<1x8x1xf32>
    %75 = tpu.reciprocal %74 {approx = true} : vector<1x8x1xf32> -> vector<1x8x1xf32>
    %76 = vector.broadcast %75 : vector<1x8x1xf32> to vector<1x8x8xf32>
    %77 = arith.mulf %72, %76 : vector<1x8x8xf32>
    %78 = arith.truncf %77 : vector<1x8x8xf32> to vector<1x8x8xbf16>
    %79 = vector.extract_strided_slice %28 {offsets = [0, 0, 256], sizes = [1, 8, 128], strides = [1, 1, 1]} : vector<1x8x512xbf16> to vector<1x8x128xbf16>
    "tpu.trace_start"() <{level = 10 : i32, message = "blm,bmd->bld"}> : () -> ()
    %cst_32 = arith.constant dense<0.000000e+00> : vector<1x8x128xf32>
    %80 = tpu.matmul %78, %79, %cst_32 {dimension_numbers = #tpu.dot_dimension_numbers<[2], [1], [1], [2], [0, 0, 0, 1, 1, 2], [0], [0]>} : vector<1x8x8xbf16>, vector<1x8x128xbf16>, vector<1x8x128xf32> -> vector<1x8x128xf32>
    "tpu.trace_stop"() : () -> ()
    %81 = arith.truncf %80 : vector<1x8x128xf32> to vector<1x8x128xbf16>
    %c0_33 = arith.constant 0 : index
    %c0_34 = arith.constant 0 : index
    %c256 = arith.constant 256 : index
    %82 = vector.load %arg19[%c0_33, %c0_34, %c256] : memref<1x8x512xbf16, #tpu.memory_space<vmem>>, vector<1x8x128xbf16>
    tpu.vector_store %arg19[%c0_33, %c0_34, %c256], %81 {strides = array<i32>} : memref<1x8x512xbf16, #tpu.memory_space<vmem>>, vector<1x8x128xbf16>,
    %83 = vector.extract_strided_slice %26 {offsets = [0, 0, 384], sizes = [1, 8, 128], strides = [1, 1, 1]} : vector<1x8x512xbf16> to vector<1x8x128xbf16>
    %84 = vector.extract_strided_slice %27 {offsets = [0, 0, 384], sizes = [1, 8, 128], strides = [1, 1, 1]} : vector<1x8x512xbf16> to vector<1x8x128xbf16>
    "tpu.trace_start"() <{level = 10 : i32, message = "bld,bmd->blm"}> : () -> ()
    %cst_35 = arith.constant dense<0.000000e+00> : vector<1x8x8xf32>
    %85 = tpu.matmul %83, %84, %cst_35 {dimension_numbers = #tpu.dot_dimension_numbers<[2], [2], [1], [1], [0, 0, 0, 1, 1, 1], [0], [0]>} : vector<1x8x128xbf16>, vector<1x8x128xbf16>, vector<1x8x8xf32> -> vector<1x8x8xf32>
    "tpu.trace_stop"() : () -> ()
    %cst_36 = arith.constant dense<0xFF800000> : vector<1x8xf32>
    %86 = vector.multi_reduction <maximumf>, %85, %cst_36 [2] : vector<1x8x8xf32> to vector<1x8xf32>
    %87 = vector.shape_cast %86 : vector<1x8xf32> to vector<1x8x1xf32>
    %88 = vector.broadcast %87 : vector<1x8x1xf32> to vector<1x8x8xf32>
    %89 = arith.subf %85, %88 : vector<1x8x8xf32>
    %90 = math.exp %89 : vector<1x8x8xf32>
    %cst_37 = arith.constant dense<0.000000e+00> : vector<1x8xf32>
    %91 = vector.multi_reduction <add>, %90, %cst_37 [2] : vector<1x8x8xf32> to vector<1x8xf32>
    %92 = vector.shape_cast %91 : vector<1x8xf32> to vector<1x8x1xf32>
    %93 = tpu.reciprocal %92 {approx = true} : vector<1x8x1xf32> -> vector<1x8x1xf32>
    %94 = vector.broadcast %93 : vector<1x8x1xf32> to vector<1x8x8xf32>
    %95 = arith.mulf %90, %94 : vector<1x8x8xf32>
    %96 = arith.truncf %95 : vector<1x8x8xf32> to vector<1x8x8xbf16>
    %97 = vector.extract_strided_slice %28 {offsets = [0, 0, 384], sizes = [1, 8, 128], strides = [1, 1, 1]} : vector<1x8x512xbf16> to vector<1x8x128xbf16>
    "tpu.trace_start"() <{level = 10 : i32, message = "blm,bmd->bld"}> : () -> ()
    %cst_38 = arith.constant dense<0.000000e+00> : vector<1x8x128xf32>
    %98 = tpu.matmul %96, %97, %cst_38 {dimension_numbers = #tpu.dot_dimension_numbers<[2], [1], [1], [2], [0, 0, 0, 1, 1, 2], [0], [0]>} : vector<1x8x8xbf16>, vector<1x8x128xbf16>, vector<1x8x128xf32> -> vector<1x8x128xf32>
    "tpu.trace_stop"() : () -> ()
    %99 = arith.truncf %98 : vector<1x8x128xf32> to vector<1x8x128xbf16>
    %c0_39 = arith.constant 0 : index
    %c0_40 = arith.constant 0 : index
    %c384 = arith.constant 384 : index
    %100 = vector.load %arg19[%c0_39, %c0_40, %c384] : memref<1x8x512xbf16, #tpu.memory_space<vmem>>, vector<1x8x128xbf16>
    tpu.vector_store %arg19[%c0_39, %c0_40, %c384], %99 {strides = array<i32>} : memref<1x8x512xbf16, #tpu.memory_space<vmem>>, vector<1x8x128xbf16>,
    %c0_41 = arith.constant 0 : index
    %c0_42 = arith.constant 0 : index
    %c0_43 = arith.constant 0 : index
    %101 = vector.load %arg19[%c0_41, %c0_42, %c0_43] : memref<1x8x512xbf16, #tpu.memory_space<vmem>>, vector<1x8x512xbf16>
    %102 = vector.shape_cast %101 : vector<1x8x512xbf16> to vector<8x512xbf16>
    %c0_44 = arith.constant 0 : index
    %c0_45 = arith.constant 0 : index
    %103 = vector.load %arg8[%c0_44, %c0_45] : memref<512x128xbf16, #tpu.memory_space<vmem>>, vector<512x128xbf16>
    %cst_46 = arith.constant dense<0.000000e+00> : vector<8x128xf32>
    %104 = tpu.matmul %102, %103, %cst_46 {dimension_numbers = #tpu.dot_dimension_numbers<[1], [0], [0], [1], [0, 0, 1, 1], [], []>} : vector<8x512xbf16>, vector<512x128xbf16>, vector<8x128xf32> -> vector<8x128xf32>
    %c0_47 = arith.constant 0 : index
    %c0_48 = arith.constant 0 : index
    %105 = vector.load %arg9[%c0_47, %c0_48] : memref<1x128xf32, #tpu.memory_space<vmem>>, vector<1x128xf32>
    %106 = vector.broadcast %105 : vector<1x128xf32> to vector<8x128xf32>
    %107 = arith.addf %104, %106 : vector<8x128xf32>
    %108 = arith.addf %6, %107 : vector<8x128xf32>
    %c0_49 = arith.constant 0 : index
    %c0_50 = arith.constant 0 : index
    %109 = vector.load %arg10[%c0_49, %c0_50] : memref<1x128xf32, #tpu.memory_space<vmem>>, vector<1x128xf32>
    %c0_51 = arith.constant 0 : index
    %c0_52 = arith.constant 0 : index
    %110 = vector.load %arg11[%c0_51, %c0_52] : memref<1x128xf32, #tpu.memory_space<vmem>>, vector<1x128xf32>
    %cst_53 = arith.constant dense<0.000000e+00> : vector<8xf32>
    %111 = vector.multi_reduction <add>, %108, %cst_53 [1] : vector<8x128xf32> to vector<8xf32>
    %112 = vector.shape_cast %111 : vector<8xf32> to vector<8x1xf32>
    %cst_54 = arith.constant 3.125000e-02 : f32
    %113 = vector.broadcast %cst_54 : f32 to vector<8x1xf32>
    %114 = arith.mulf %112, %113 : vector<8x1xf32>
    %115 = vector.broadcast %114 : vector<8x1xf32> to vector<8x128xf32>
    %116 = arith.subf %108, %115 : vector<8x128xf32>
    %117 = vector.broadcast %4 : vector<1x128xf32> to vector<8x128xf32>
    %118 = arith.mulf %116, %117 : vector<8x128xf32>
    %119 = arith.mulf %118, %118 : vector<8x128xf32>
    %cst_55 = arith.constant dense<0.000000e+00> : vector<8xf32>
    %120 = vector.multi_reduction <add>, %119, %cst_55 [1] : vector<8x128xf32> to vector<8xf32>
    %121 = vector.shape_cast %120 : vector<8xf32> to vector<8x1xf32>
    %cst_56 = arith.constant 3.125000e-02 : f32
    %122 = vector.broadcast %cst_56 : f32 to vector<8x1xf32>
    %123 = arith.mulf %121, %122 : vector<8x1xf32>
    %cst_57 = arith.constant 9.99999974E-6 : f32
    %124 = vector.broadcast %cst_57 : f32 to vector<8x1xf32>
    %125 = arith.addf %123, %124 : vector<8x1xf32>
    %126 = math.rsqrt %125 : vector<8x1xf32>
    %127 = vector.broadcast %126 : vector<8x1xf32> to vector<8x128xf32>
    %128 = arith.mulf %118, %127 : vector<8x128xf32>
    %129 = vector.broadcast %109 : vector<1x128xf32> to vector<8x128xf32>
    %130 = arith.mulf %128, %129 : vector<8x128xf32>
    %131 = vector.broadcast %110 : vector<1x128xf32> to vector<8x128xf32>
    %132 = arith.addf %130, %131 : vector<8x128xf32>
    %133 = arith.truncf %132 : vector<8x128xf32> to vector<8x128xbf16>
    %c0_58 = arith.constant 0 : index
    %c0_59 = arith.constant 0 : index
    %134 = vector.load %arg12[%c0_58, %c0_59] : memref<128x128xbf16, #tpu.memory_space<vmem>>, vector<128x128xbf16>
    %cst_60 = arith.constant dense<0.000000e+00> : vector<8x128xf32>
    %135 = tpu.matmul %133, %134, %cst_60 {dimension_numbers = #tpu.dot_dimension_numbers<[1], [0], [0], [1], [0, 0, 1, 1], [], []>} : vector<8x128xbf16>, vector<128x128xbf16>, vector<8x128xf32> -> vector<8x128xf32>
    %c0_61 = arith.constant 0 : index
    %c0_62 = arith.constant 0 : index
    %136 = vector.load %arg13[%c0_61, %c0_62] : memref<1x128xf32, #tpu.memory_space<vmem>>, vector<1x128xf32>
    %137 = vector.broadcast %136 : vector<1x128xf32> to vector<8x128xf32>
    %138 = arith.addf %135, %137 : vector<8x128xf32>
    %cst_63 = arith.constant 0.000000e+00 : f32
    %139 = vector.broadcast %cst_63 : f32 to vector<8x128xf32>
    %140 = arith.maximumf %138, %139 : vector<8x128xf32>
    %141 = arith.truncf %140 : vector<8x128xf32> to vector<8x128xbf16>
    %c0_64 = arith.constant 0 : index
    %c0_65 = arith.constant 0 : index
    %142 = vector.load %arg14[%c0_64, %c0_65] : memref<128x128xbf16, #tpu.memory_space<vmem>>, vector<128x128xbf16>
    %cst_66 = arith.constant dense<0.000000e+00> : vector<8x128xf32>
    %143 = tpu.matmul %141, %142, %cst_66 {dimension_numbers = #tpu.dot_dimension_numbers<[1], [0], [0], [1], [0, 0, 1, 1], [], []>} : vector<8x128xbf16>, vector<128x128xbf16>, vector<8x128xf32> -> vector<8x128xf32>
    %c0_67 = arith.constant 0 : index
    %c0_68 = arith.constant 0 : index
    %144 = vector.load %arg15[%c0_67, %c0_68] : memref<1x128xf32, #tpu.memory_space<vmem>>, vector<1x128xf32>
    %145 = vector.broadcast %144 : vector<1x128xf32> to vector<8x128xf32>
    %146 = arith.addf %143, %145 : vector<8x128xf32>
    %147 = arith.addf %132, %146 : vector<8x128xf32>
    %c0_69 = arith.constant 0 : index
    %c0_70 = arith.constant 0 : index
    %148 = vector.load %arg16[%c0_69, %c0_70] : memref<1x128xf32, #tpu.memory_space<vmem>>, vector<1x128xf32>
    %c0_71 = arith.constant 0 : index
    %c0_72 = arith.constant 0 : index
    %149 = vector.load %arg17[%c0_71, %c0_72] : memref<1x128xf32, #tpu.memory_space<vmem>>, vector<1x128xf32>
    %cst_73 = arith.constant dense<0.000000e+00> : vector<8xf32>
    %150 = vector.multi_reduction <add>, %147, %cst_73 [1] : vector<8x128xf32> to vector<8xf32>
    %151 = vector.shape_cast %150 : vector<8xf32> to vector<8x1xf32>
    %cst_74 = arith.constant 3.125000e-02 : f32
    %152 = vector.broadcast %cst_74 : f32 to vector<8x1xf32>
    %153 = arith.mulf %151, %152 : vector<8x1xf32>
    %154 = vector.broadcast %153 : vector<8x1xf32> to vector<8x128xf32>
    %155 = arith.subf %147, %154 : vector<8x128xf32>
    %156 = vector.broadcast %4 : vector<1x128xf32> to vector<8x128xf32>
    %157 = arith.mulf %155, %156 : vector<8x128xf32>
    %158 = arith.mulf %157, %157 : vector<8x128xf32>
    %cst_75 = arith.constant dense<0.000000e+00> : vector<8xf32>
    %159 = vector.multi_reduction <add>, %158, %cst_75 [1] : vector<8x128xf32> to vector<8xf32>
    %160 = vector.shape_cast %159 : vector<8xf32> to vector<8x1xf32>
    %cst_76 = arith.constant 3.125000e-02 : f32
    %161 = vector.broadcast %cst_76 : f32 to vector<8x1xf32>
    %162 = arith.mulf %160, %161 : vector<8x1xf32>
    %cst_77 = arith.constant 9.99999974E-6 : f32
    %163 = vector.broadcast %cst_77 : f32 to vector<8x1xf32>
    %164 = arith.addf %162, %163 : vector<8x1xf32>
    %165 = math.rsqrt %164 : vector<8x1xf32>
    %166 = vector.broadcast %165 : vector<8x1xf32> to vector<8x128xf32>
    %167 = arith.mulf %157, %166 : vector<8x128xf32>
    %168 = vector.broadcast %148 : vector<1x128xf32> to vector<8x128xf32>
    %169 = arith.mulf %167, %168 : vector<8x128xf32>
    %170 = vector.broadcast %149 : vector<1x128xf32> to vector<8x128xf32>
    %171 = arith.addf %169, %170 : vector<8x128xf32>
    %172 = vector.shape_cast %171 : vector<8x128xf32> to vector<1x8x128xf32>
    %c0_78 = arith.constant 0 : index
    %c0_79 = arith.constant 0 : index
    %c0_80 = arith.constant 0 : index
    %173 = vector.load %arg18[%c0_78, %c0_79, %c0_80] : memref<1x8x128xf32, #tpu.memory_space<vmem>>, vector<1x8x128xf32>
    tpu.vector_store %arg18[%c0_78, %c0_79, %c0_80], %172 {strides = array<i32>} : memref<1x8x128xf32, #tpu.memory_space<vmem>>, vector<1x8x128xf32>,
    return
  }
  func.func @transform_0(%arg0: i32) -> (i32, i32, i32) {
    %c0_i32 = arith.constant 0 : i32
    %c0_i32_0 = arith.constant 0 : i32
    %c0_i32_1 = arith.constant 0 : i32
    return %arg0, %c0_i32, %c0_i32_0 : i32, i32, i32
  }
  func.func @transform_1(%arg0: i32) -> (i32, i32) {
    %c0_i32 = arith.constant 0 : i32
    %c0_i32_0 = arith.constant 0 : i32
    %c0_i32_1 = arith.constant 0 : i32
    return %c0_i32, %c0_i32_0 : i32, i32
  }
  func.func @transform_2(%arg0: i32) -> (i32, i32) {
    %c0_i32 = arith.constant 0 : i32
    %c0_i32_0 = arith.constant 0 : i32
    %c0_i32_1 = arith.constant 0 : i32
    return %c0_i32, %c0_i32_0 : i32, i32
  }
  func.func @transform_3(%arg0: i32) -> (i32, i32) {
    %c0_i32 = arith.constant 0 : i32
    %c0_i32_0 = arith.constant 0 : i32
    %c0_i32_1 = arith.constant 0 : i32
    return %c0_i32, %c0_i32_0 : i32, i32
  }
  func.func @transform_4(%arg0: i32) -> (i32, i32) {
    %c0_i32 = arith.constant 0 : i32
    %c0_i32_0 = arith.constant 0 : i32
    %c0_i32_1 = arith.constant 0 : i32
    return %c0_i32, %c0_i32_0 : i32, i32
  }
  func.func @transform_5(%arg0: i32) -> (i32, i32) {
    %c0_i32 = arith.constant 0 : i32
    %c0_i32_0 = arith.constant 0 : i32
    %c0_i32_1 = arith.constant 0 : i32
    return %c0_i32, %c0_i32_0 : i32, i32
  }
  func.func @transform_6(%arg0: i32) -> (i32, i32) {
    %c0_i32 = arith.constant 0 : i32
    %c0_i32_0 = arith.constant 0 : i32
    %c0_i32_1 = arith.constant 0 : i32
    return %c0_i32, %c0_i32_0 : i32, i32
  }
  func.func @transform_7(%arg0: i32) -> (i32, i32) {
    %c0_i32 = arith.constant 0 : i32
    %c0_i32_0 = arith.constant 0 : i32
    %c0_i32_1 = arith.constant 0 : i32
    return %c0_i32, %c0_i32_0 : i32, i32
  }
  func.func @transform_8(%arg0: i32) -> (i32, i32) {
    %c0_i32 = arith.constant 0 : i32
    %c0_i32_0 = arith.constant 0 : i32
    %c0_i32_1 = arith.constant 0 : i32
    return %c0_i32, %c0_i32_0 : i32, i32
  }
  func.func @transform_9(%arg0: i32) -> (i32, i32) {
    %c0_i32 = arith.constant 0 : i32
    %c0_i32_0 = arith.constant 0 : i32
    %c0_i32_1 = arith.constant 0 : i32
    return %c0_i32, %c0_i32_0 : i32, i32
  }
  func.func @transform_10(%arg0: i32) -> (i32, i32) {
    %c0_i32 = arith.constant 0 : i32
    %c0_i32_0 = arith.constant 0 : i32
    %c0_i32_1 = arith.constant 0 : i32
    return %c0_i32, %c0_i32_0 : i32, i32
  }
  func.func @transform_11(%arg0: i32) -> (i32, i32) {
    %c0_i32 = arith.constant 0 : i32
    %c0_i32_0 = arith.constant 0 : i32
    %c0_i32_1 = arith.constant 0 : i32
    return %c0_i32, %c0_i32_0 : i32, i32
  }
  func.func @transform_12(%arg0: i32) -> (i32, i32) {
    %c0_i32 = arith.constant 0 : i32
    %c0_i32_0 = arith.constant 0 : i32
    %c0_i32_1 = arith.constant 0 : i32
    return %c0_i32, %c0_i32_0 : i32, i32
  }
  func.func @transform_13(%arg0: i32) -> (i32, i32) {
    %c0_i32 = arith.constant 0 : i32
    %c0_i32_0 = arith.constant 0 : i32
    %c0_i32_1 = arith.constant 0 : i32
    return %c0_i32, %c0_i32_0 : i32, i32
  }
  func.func @transform_14(%arg0: i32) -> (i32, i32) {
    %c0_i32 = arith.constant 0 : i32
    %c0_i32_0 = arith.constant 0 : i32
    %c0_i32_1 = arith.constant 0 : i32
    return %c0_i32, %c0_i32_0 : i32, i32
  }
  func.func @transform_15(%arg0: i32) -> (i32, i32) {
    %c0_i32 = arith.constant 0 : i32
    %c0_i32_0 = arith.constant 0 : i32
    %c0_i32_1 = arith.constant 0 : i32
    return %c0_i32, %c0_i32_0 : i32, i32
  }
  func.func @transform_16(%arg0: i32) -> (i32, i32) {
    %c0_i32 = arith.constant 0 : i32
    %c0_i32_0 = arith.constant 0 : i32
    %c0_i32_1 = arith.constant 0 : i32
    return %c0_i32, %c0_i32_0 : i32, i32
  }
  func.func @transform_17(%arg0: i32) -> (i32, i32, i32) {
    %c0_i32 = arith.constant 0 : i32
    %c0_i32_0 = arith.constant 0 : i32
    %c0_i32_1 = arith.constant 0 : i32
    return %arg0, %c0_i32, %c0_i32_0 : i32, i32, i32
  }
}

</mosaic_0001>

<bundles_post_ra>
// kernel: tpu_custom_call.1
= control target key start
LH: loop header
LB: loop body
LE: loop exit
PB: predicated region body
PF: predicated region fallthrough
CT: control target
= control target key end

     0   :  { %s4286_s0 = inlined_call_operand.hbm [shape: f32[2,8,128], index: 0, kind: input, shape index: {}]   ;;  %s4287_s1 = inlined_call_operand.hbm [shape: bf16[128,512], index: 1, kind: input, shape index: {}]   ;;  %s4288_s2 = inlined_call_operand.vmem [shape: f32[1,512], index: 2, kind: input, shape index: {}]   ;;  %s4289_s3 = inlined_call_operand.hbm [shape: bf16[128,512], index: 3, kind: input, shape index: {}]   ;;  %s4290_s4 = inlined_call_operand.vmem [shape: f32[1,512], index: 4, kind: input, shape index: {}]   ;;  %s4291_s5 = inlined_call_operand.hbm [shape: bf16[128,512], index: 5, kind: input, shape index: {}]   ;;  %s4292_s6 = inlined_call_operand.vmem [shape: f32[1,512], index: 6, kind: input, shape index: {}]   ;;  %s4293_s7 = inlined_call_operand.hbm [shape: bf16[512,128], index: 7, kind: input, shape index: {}]   ;;  %s4294_s8 = inlined_call_operand.vmem [shape: f32[1,128], index: 8, kind: input, shape index: {}]   ;;  %s4295_s9 = inlined_call_operand.vmem [shape: f32[1,128], index: 9, kind: input, shape index: {}]   ;;  %s4296_s10 = inlined_call_operand.vmem [shape: f32[1,128], index: 10, kind: input, shape index: {}]   ;;  %s4297_s11 = inlined_call_operand.hbm [shape: bf16[128,128], index: 11, kind: input, shape index: {}]   ;;  %s4298_s12 = inlined_call_operand.vmem [shape: f32[1,128], index: 12, kind: input, shape index: {}]   ;;  %s4299_s13 = inlined_call_operand.hbm [shape: bf16[128,128], index: 13, kind: input, shape index: {}]   ;;  %s4300_s14 = inlined_call_operand.vmem [shape: f32[1,128], index: 14, kind: input, shape index: {}]   ;;  %s4301_s15 = inlined_call_operand.vmem [shape: f32[1,128], index: 15, kind: input, shape index: {}]   ;;  %s4302_s16 = inlined_call_operand.vmem [shape: f32[1,128], index: 16, kind: input, shape index: {}]   ;;  %s4303_s17 = inlined_call_operand.hbm [shape: f32[2,8,128], index: 17, kind: output, shape index: {}]  }
   0x1   :  { %4313 = sst [smem:[#allocation21_spill]] %s4286_s0 }
   0x2   :  { %4314 = sst [smem:[#allocation22_spill]] %s4287_s1 }
   0x3   :  { %4315 = sst [smem:[#allocation23_spill]] %s4288_s2 }
   0x4   :  { %4316 = sst [smem:[#allocation24_spill]] %s4291_s5 }
   0x5   :  { %4317 = sst [smem:[#allocation25_spill]] %s4294_s8 }
   0x6   :  { %4318 = sst [smem:[#allocation26_spill]] %s4295_s9 }
   0x7   :  { %4319 = sst [smem:[#allocation27_spill]] %s4296_s10 }
   0x8   :  { %4320 = sst [smem:[#allocation28_spill]] %s4298_s12 }
   0x9   :  { %4321 = sst [smem:[#allocation29_spill]] %s4300_s14 }
   0xa   :  { %4322 = sst [smem:[#allocation30_spill]] %s4301_s15 }
   0xb   :  { %4323 = sst [smem:[#allocation31_spill]] %s4302_s16 }
   0xc   :  { %4324 = sst [smem:[#allocation32_spill]] %s4303_s17 }
   0xd   :  { %22 = vsyncpa [#allocation4], 0 }
   0xe   :  { %24 = vsyncpa [#allocation4 + $0x1], 0 }
   0xf   :  { %25 = vsyncpa [#allocation7], 0 }
  0x10   :  { %26 = vsyncpa [#allocation10], 0 }
  0x11   :  { %27 = vsyncpa [#allocation13], 0 }
  0x12   :  { %28 = vsyncpa [#allocation5], 0 }
  0x13   :  { %30 = vsyncpa [#allocation5 + $0x1], 0  ;;  %s3809_s24 = smov 0   ;;  %s3811_s25 = smov 0  }
  0x14   :  { %s3813_s26 = smov 0   ;;  %s3815_s27 = smov 0  }
  0x15 LB: > { %s3704_s28 = smov [#allocation6]   ;;  %s3830_s0 = sadd.s32 4294967295, %s3702_s27   ;;  %s3702_s27 = sphi %s3815_s27, %s4361_s27   ;;  %s3698_s26 = sphi %s3813_s26, %s4360_s26   ;;  %s3694_s25 = sphi %s3811_s25, %s4359_s25   ;;  %s3690_s24 = sphi %s3809_s24, %s4358_s24  }
  0x16   : > { %s441_s29 = sshll.u32 %s3704_s28, 4  ;;  %p2746_p0 = scmp.ge.s32.totalorder %s3702_s27, 1  ;;  %s3835_s29 = int_to_ptr.vmem [resolvable:$true] %s441_s29 }
  0x17   : > { %p4307_p1 = scmp.eq.s32.totalorder %s3830_s0, 0  ;;  %p429_p2 = scmp.lt.s32.totalorder %s3702_s27, 3 }
  0x18   : > { %s3705_s18 = smov [#allocation9]   ;;  %s3706_s20 = smov [#allocation12]  }
  0x19   : > { %p3837_p3 = pnand %p2746_p0, %p429_p2  ;;  %s473_s19 = sshll.u32 %s3705_s18, 4  ;;  %s3850_s19 = int_to_ptr.vmem [resolvable:$true] %s473_s19 }
  0x1a   : > { %s3852_s21 = sshll.u32 %s3706_s20, 4  ;;  %s4327_s28 = sld [smem:[#allocation22_spill]]  ;;  %s512_s21 = int_to_ptr.vmem [resolvable:$true] %s3852_s21 }
  0x1b   : > { %s4325_s30 = scalar_select %p3837_p3, 1, 0 }
  0x1c   : > { %p3123_p5 = pneg %p3837_p3 }
  0x1e   : > { %p3846_p6 = pnand %p3123_p5, %p4307_p1 }
  0x20   : > { %s3426_s17 = scalar_lea.hbm %s4327_s28, 4096  ;;  %p3862_p8 = pneg %p3846_p6 }
  0x21   : > { %p3427_p7 = scmp.ne.s32.totalorder %s4327_s28, %s3426_s17  ;;  %p3433_p11 = scmp.lt.u32.totalorder %s3426_s17, %s4327_s28 }
  0x23   : > { %p3429_p9 = pnand %p3862_p8, %p3427_p7 }
  0x25   : > { %p3430_p10 = pneg %p3429_p9 }
  0x27   : > { %p3435_p12 = pnand %p3433_p11, %p3430_p10 }
  0x29   : > { %3438 = shalt.err (!%p3435_p12)
}
  0x2a   : > { %s3439_s15 = scalar_lea.vmem %s3835_s29, 4096  ;;  %p3447_p5 = scmp.lt.s32.totalorder %s3835_s29, %s3835_s29 }
  0x2b   : > { %p3440_p13 = scmp.ne.s32.totalorder %s3835_s29, %s3439_s15  ;;  %p3448_p4 = scmp.lt.s32.totalorder %s3439_s15, %s3439_s15 }
  0x2d   : > { %p3442_p0 = pnand %p3440_p13, %p3862_p8  ;;  %p3449_p7 = por %p3448_p4, %p3447_p5 }
  0x2f   : > { %p3443_p2 = pneg %p3442_p0 }
  0x31   : > { %p3450_p9 = pnand %p3449_p7, %p3443_p2 }
  0x33   : > { %3453 = shalt.err (!%p3450_p9)
}
  0x34   : > { %s4309_s16 = smov 256   ;;  %s4310_s14 = smov 16  }
  0x35   : > { %3126 = dma.hbm_to_vmem [thread:$0]  (!%p3846_p6), %s4327_s28, 4096, %s3835_s29, [#allocation7], %s4309_s16, %s4309_s16, %s4310_s14  }
  0x36   : > { %s4329_s5 = sld [smem:[#allocation24_spill]] }
  0x3c   : > { %s3454_s15 = scalar_lea.hbm %s4329_s5, 4096 }
  0x3d   : > { %p3455_p4 = scmp.ne.s32.totalorder %s4329_s5, %s3454_s15  ;;  %p3461_p12 = scmp.lt.u32.totalorder %s3454_s15, %s4329_s5 }
  0x3f   : > { %p3457_p10 = pnand %p3455_p4, %p3862_p8 }
  0x41   : > { %p3458_p11 = pneg %p3457_p10 }
  0x43   : > { %p3463_p13 = pnand %p3461_p12, %p3458_p11 }
  0x45   : > { %3466 = shalt.err (!%p3463_p13)
}
  0x46   : > { %s3467_s29 = scalar_lea.vmem %s3850_s19, 4096  ;;  %p3475_p7 = scmp.lt.s32.totalorder %s3850_s19, %s3850_s19 }
  0x47   : > { %p3468_p0 = scmp.ne.s32.totalorder %s3850_s19, %s3467_s29  ;;  %p3476_p9 = scmp.lt.s32.totalorder %s3467_s29, %s3467_s29 }
  0x49   : > { %p3470_p2 = pnand %p3468_p0, %p3862_p8  ;;  %p3477_p4 = por %p3476_p9, %p3475_p7 }
  0x4b   : > { %p3471_p5 = pneg %p3470_p2 }
  0x4d   : > { %p3478_p10 = pnand %p3477_p4, %p3471_p5 }
  0x4f   : > { %3481 = shalt.err (!%p3478_p10)
}
  0x50   : > { %3132 = dma.hbm_to_vmem [thread:$0]  (!%p3846_p6), %s4329_s5, 4096, %s3850_s19, [#allocation10], %s4309_s16, %s4309_s16, %s4310_s14  }
  0x51   : > { %s3482_s17 = scalar_lea.hbm %s4297_s11, 1024 }
  0x52   : > { %p3483_p11 = scmp.ne.s32.totalorder %s4297_s11, %s3482_s17  ;;  %p3489_p0 = scmp.lt.u32.totalorder %s3482_s17, %s4297_s11 }
  0x54   : > { %p3485_p12 = pnand %p3483_p11, %p3862_p8 }
  0x56   : > { %p3486_p13 = pneg %p3485_p12 }
  0x58   : > { %p3491_p2 = pnand %p3489_p0, %p3486_p13 }
  0x5a   : > { %3494 = shalt.err (!%p3491_p2)
}
  0x5b   : > { %s3495_s29 = scalar_lea.vmem %s512_s21, 1024  ;;  %p3503_p4 = scmp.lt.s32.totalorder %s512_s21, %s512_s21 }
  0x5c   : > { %p3496_p5 = scmp.ne.s32.totalorder %s512_s21, %s3495_s29  ;;  %p3504_p10 = scmp.lt.s32.totalorder %s3495_s29, %s3495_s29 }
  0x5e   : > { %p3498_p7 = pnand %p3496_p5, %p3862_p8  ;;  %p3505_p1 = por %p3504_p10, %p3503_p4 }
  0x60   : > { %p3499_p9 = pneg %p3498_p7 }
  0x62   : > { %p3506_p3 = pnand %p3505_p1, %p3499_p9 }
  0x64   : > { %3509 = shalt.err (!%p3506_p3)
}
  0x65   : > { %s3709_s19 = smov 64   ;;  %s3710_s8 = smov 4  }
  0x66   : > { %3138 = dma.hbm_to_vmem [thread:$0]  (!%p3846_p6), %s4297_s11, 1024, %s512_s21, [#allocation13], %s3709_s19, %s3709_s19, %s3710_s8  }
  0x67   : > { %s3711_s12 = smov [#allocation8]   ;;  %s3712_s22 = smov [#allocation11]  }
  0x68   : > { %s457_s17 = sshll.u32 %s3711_s12, 4  ;;  %s489_s23 = sshll.u32 %s3712_s22, 4  ;;  %s458_s17 = int_to_ptr.vmem [resolvable:$true] %s457_s17  ;;  %s490_s23 = int_to_ptr.vmem [resolvable:$true] %s489_s23 }
  0x69   : > { %s3510_s29 = scalar_lea.hbm %s4289_s3, 4096 }
  0x6a   : > { %p3511_p1 = scmp.ne.s32.totalorder %s4289_s3, %s3510_s29  ;;  %p3517_p12 = scmp.lt.u32.totalorder %s3510_s29, %s4289_s3 }
  0x6c   : > { %p3513_p3 = pnand %p3511_p1, %p3862_p8 }
  0x6e   : > { %p3514_p11 = pneg %p3513_p3 }
  0x70   : > { %p3519_p13 = pnand %p3517_p12, %p3514_p11 }
  0x72   : > { %3522 = shalt.err (!%p3519_p13)
}
  0x73   : > { %s3523_s21 = scalar_lea.vmem %s458_s17, 4096  ;;  %p3531_p7 = scmp.lt.s32.totalorder %s458_s17, %s458_s17 }
  0x74   : > { %p3524_p0 = scmp.ne.s32.totalorder %s458_s17, %s3523_s21  ;;  %p3532_p9 = scmp.lt.s32.totalorder %s3523_s21, %s3523_s21 }
  0x76   : > { %p3526_p2 = pnand %p3524_p0, %p3862_p8  ;;  %p3533_p4 = por %p3532_p9, %p3531_p7 }
  0x78   : > { %p3527_p5 = pneg %p3526_p2 }
  0x7a   : > { %p3534_p10 = pnand %p3533_p4, %p3527_p5 }
  0x7c   : > { %3537 = shalt.err (!%p3534_p10)
}
  0x7d   : > { %s4330_s16 = smov 16   ;;  %s4331_s14 = smov 256  }
  0x7e   : > { %3129 = dma.hbm_to_vmem [thread:$0]  (!%p3846_p6), %s4289_s3, 4096, %s458_s17, [#allocation7], %s4331_s14, %s4331_s14, %s4330_s16  }
  0x7f   : > { %s3538_s12 = scalar_lea.hbm %s4293_s7, 4096 }
  0x80   : > { %p3539_p1 = scmp.ne.s32.totalorder %s4293_s7, %s3538_s12  ;;  %p3545_p12 = scmp.lt.u32.totalorder %s3538_s12, %s4293_s7 }
  0x82   : > { %p3541_p3 = pnand %p3539_p1, %p3862_p8 }
  0x84   : > { %p3542_p11 = pneg %p3541_p3 }
  0x86   : > { %p3547_p13 = pnand %p3545_p12, %p3542_p11 }
  0x88   : > { %3550 = shalt.err (!%p3547_p13)
}
  0x89   : > { %s3551_s21 = scalar_lea.vmem %s490_s23, 4096  ;;  %p3559_p7 = scmp.lt.s32.totalorder %s490_s23, %s490_s23 }
  0x8a   : > { %p3552_p0 = scmp.ne.s32.totalorder %s490_s23, %s3551_s21  ;;  %p3560_p9 = scmp.lt.s32.totalorder %s3551_s21, %s3551_s21 }
  0x8c   : > { %p3554_p2 = pnand %p3552_p0, %p3862_p8  ;;  %p3561_p4 = por %p3560_p9, %p3559_p7 }
  0x8e   : > { %p3555_p5 = pneg %p3554_p2 }
  0x90   : > { %p3562_p10 = pnand %p3561_p4, %p3555_p5 }
  0x92   : > { %3565 = shalt.err (!%p3562_p10)
}
  0x93   : > { %3135 = dma.hbm_to_vmem [thread:$0]  (!%p3846_p6), %s4293_s7, 4096, %s490_s23, [#allocation10], %s3709_s19, %s3709_s19, %s3710_s8  }
  0x94   : > { %s3713_s14 = smov [#allocation14]   ;;  %s3566_s10 = scalar_lea.hbm %s4299_s13, 1024 }
  0x95   : > { %s527_s5 = sshll.u32 %s3713_s14, 4  ;;  %p3567_p1 = scmp.ne.s32.totalorder %s4299_s13, %s3566_s10  ;;  %s528_s5 = int_to_ptr.vmem [resolvable:$true] %s527_s5 }
  0x96   : > { %p3573_p12 = scmp.lt.u32.totalorder %s3566_s10, %s4299_s13 }
  0x97   : > { %p3569_p3 = pnand %p3567_p1, %p3862_p8 }
  0x99   : > { %p3570_p11 = pneg %p3569_p3 }
  0x9b   : > { %p3575_p13 = pnand %p3573_p12, %p3570_p11 }
  0x9d   : > { %3578 = shalt.err (!%p3575_p13)
}
  0x9e   : > { %s3579_s23 = scalar_lea.vmem %s528_s5, 1024  ;;  %p3587_p7 = scmp.lt.s32.totalorder %s528_s5, %s528_s5 }
  0x9f   : > { %p3580_p0 = scmp.ne.s32.totalorder %s528_s5, %s3579_s23  ;;  %p3588_p9 = scmp.lt.s32.totalorder %s3579_s23, %s3579_s23 }
  0xa1   : > { %p3582_p2 = pnand %p3580_p0, %p3862_p8  ;;  %p3589_p4 = por %p3588_p9, %p3587_p7 }
  0xa3   : > { %p3583_p5 = pneg %p3582_p2 }
  0xa5   : > { %p3590_p10 = pnand %p3589_p4, %p3583_p5 }
  0xa7   : > { %3593 = shalt.err (!%p3590_p10)
}
  0xa8   : > { %3141 = dma.hbm_to_vmem [thread:$0]  (!%p3846_p6), %s4299_s13, 1024, %s528_s5, [#allocation13], %s3709_s19, %s3709_s19, %s3710_s8  }
  0xa9   : > { %s2745_s1 = sadd.s32 4294967294, %s3702_s27   ;;  %s3999_s18 = sadd.s32 1, %s3702_s27  }
  0xaa   : > { %s40_s17 = ssub.s32 %s3702_s27, %s3999_s18  ;;  %s43_s16 = sadd.s32 1, %s3698_s26 }
  0xab   : > { %p41_p8 = scmp.eq.s32.totalorder %s40_s17, 0  ;;  %p50_p1 = scmp.ne.s32.totalorder %s3698_s26, %s3694_s25 }
  0xac   : > { %p51_p3 = scmp.eq.s32.totalorder %s3702_s27, 0  ;;  %p56_p11 = scmp.ne.s32.totalorder %s3694_s25, %s3690_s24 }
  0xad   : > { %s4010_s14 = scalar_select %p41_p8, %s3698_s26, %s43_s16  }
  0xae   : > { %p4012_p12 = por %p51_p3, %p50_p1  ;;  %p4333_p13 = scmp.eq.s32.totalorder %s3830_s0, 0 }
  0xaf   : > { %p416_p0 = scmp.eq.s32.totalorder %s3830_s0, 1  ;;  %p422_p2 = scmp.eq.s32.totalorder %s2745_s1, 1 }
  0xb0   : > { %p4018_p6 = por %p4333_p13, %p56_p11  ;;  %p3156_p5 = scmp.lt.s32.totalorder %s3702_s27, 2 }
  0xb1   : > { %s550_s8 = sand.u32 1, %s3698_s26   ;;  %p4025_p7 = por %p416_p0, %p50_p1 }
  0xb2   : > { %p4029_p9 = por %p422_p2, %p56_p11  ;;  %s2754_s10 = sshll.u32 %s550_s8, 3 }
  0xb3   : > { %s4335_s5 = scalar_select %p4025_p7, 1, 0 }
  0xb4   : > { %s4336_s9 = scalar_select %p4029_p9, 1, 0 }
  0xb5   : > { %s2755_s12 = sshll.u32 %s3702_s27, 7  ;;  %s4337_s15 = sld [smem:[#allocation21_spill]] }
  0xb6   : > { %s554_s29 = scalar_lea.vmem [#allocation3], %s2754_s10  ;;  %p4043_p4 = pnand %p3156_p5, %p4012_p12 }
  0xb7   : > { %s561_s21 = sshll.u32 %s554_s29, 4  ;;  %s551_s17 = scalar_lea.sflag [#allocation4], %s550_s8  ;;  %s4039_s21 = int_to_ptr.vmem [resolvable:$true] %s561_s21 }
  0xb8   : > { %p3596_p8 = pneg %p4043_p4 }
  0xbb   : > { %s4037_s23 = scalar_lea.hbm %s4337_s15, %s2755_s12  ;;  %s3599_s22 = scalar_lea.hbm %s4337_s15, 256 }
  0xbc   : > { %s3594_s16 = scalar_lea.hbm %s4037_s23, 128  ;;  %p3600_p11 = scmp.lt.u32.totalorder %s4037_s23, %s4337_s15 }
  0xbd   : > { %p3595_p10 = scmp.ne.s32.totalorder %s4037_s23, %s3594_s16  ;;  %p3601_p12 = scmp.lt.u32.totalorder %s3599_s22, %s3594_s16 }
  0xbe   : > { %p3603_p0 = scmp.lt.u32.totalorder %s3594_s16, %s4037_s23 }
  0xbf   : > { %p3597_p1 = pnand %p3596_p8, %p3595_p10  ;;  %p3602_p13 = por %p3601_p12, %p3600_p11 }
  0xc1   : > { %p3598_p3 = pneg %p3597_p1  ;;  %p3604_p2 = por %p3603_p0, %p3602_p13 }
  0xc3   : > { %p3605_p5 = pnand %p3604_p2, %p3598_p3 }
  0xc5   : > { %3608 = shalt.err (!%p3605_p5)
}
  0xc6   : > { %s3609_s8 = scalar_lea.vmem %s4039_s21, 128  ;;  %s3714_s29 = smov [#allocation3]  }
  0xc7   : > { %p3610_p10 = scmp.ne.s32.totalorder %s4039_s21, %s3609_s8  ;;  %s3614_s10 = sshll.u32 %s3714_s29, 4  ;;  %s3615_s10 = int_to_ptr.vmem [resolvable:$false] %s3614_s10 }
  0xc8   : > { %s3616_s12 = scalar_lea.vmem %s3615_s10, 256  ;;  %p3617_p7 = scmp.lt.s32.totalorder %s4039_s21, %s3615_s10 }
  0xc9   : > { %p3612_p1 = pnand %p3610_p10, %p3596_p8  ;;  %p3618_p11 = scmp.lt.s32.totalorder %s3616_s12, %s3609_s8 }
  0xcb   : > { %p3613_p9 = pneg %p3612_p1  ;;  %p3619_p12 = por %p3618_p11, %p3617_p7 }
  0xcd   : > { %p3620_p13 = pnand %p3619_p12, %p3613_p9 }
  0xcf   : > { %3623 = shalt.err (!%p3620_p13)
}
  0xd0   : > { %3145 = dma.hbm_to_vmem [thread:$0]  (!%p4043_p4), %s4037_s23, 128, %s4039_s21, %s551_s17  }
  0xd1   : > { %p4339_p3 = scmp.ne.s32.totalorder %s4325_s30, 0 }
  0xd2   : > { %s4075_s16 = sand.u32 (!%p4339_p3), 1, %s3694_s25  }
  0xd3   : > { %570 = sbr.rel (%p4339_p3) target bundleno = 2589 (0xa1d), region = 88  ;;  %s2757_s22 = sshll.u32 (!%p4339_p3), %s4075_s16, 3 }
  0xd4   : > { %s573_s28 = scalar_lea.sflag (!%p4339_p3), [#allocation4], %s4075_s16  ;;  %s4081_s20 = scalar_lea.vmem (!%p4339_p3), [#allocation3], %s2757_s22 }
  0xda   : > { %3669 = dma.done.wait (%p4018_p6), %s573_s28, 128  }
  0xdb   : > { %3671 = vsyncadd (%p4018_p6), %s573_s28, 4294967168  ;;  %p4340_p7 = scmp.eq.s32.totalorder %s3830_s0, 0 }
  0xdd   : > { %3673 = dma.done.wait (%p4340_p7), [#allocation7], 8192   ;;  %p4341_p9 = pmov %p4340_p7 }
  0xde   : > { %p4342_p4 = pmov %p4340_p7 }
  0xdf   : > { %3675 = vsyncadd (%p4341_p9), [#allocation7], 4294959104 }
  0xe0   : > { %3677 = dma.done.wait (%p4342_p4), [#allocation10], 8192   ;;  %p4343_p8 = pmov %p4342_p4 }
  0xe1   : > { %p4344_p0 = pmov %p4342_p4 }
  0xe2   : > { %3679 = vsyncadd (%p4343_p8), [#allocation10], 4294959104 }
  0xe3   : > { %3681 = dma.done.wait (%p4344_p0), [#allocation13], 2048   ;;  %p4345_p2 = pmov %p4344_p0 }
  0xe4   : > { %v3715_v0 = vmov 0   ;;  %v3209_v1 = vld [vmem:[#allocation6 + $0x4] ss:$16 sps:$4 sm:$0xff]   ;;  %v3211_v2 = vld [vmem:[#allocation6] ss:$16 sps:$4 sm:$0xff]   ;;  %vm3717_vm0 = vmmov 0  }
  0xe5   : > { %3683 = vsyncadd (%p4345_p2), [#allocation13], 4294965248  ;;  %905 = vmatprep.mubr.bf16.mxu0 %v3715_v0  ;;  %946 = vmatprep.mubr.bf16.mxu1 %v3715_v0  ;;  %v3212_v3 = vld [vmem:[#allocation6 + $0x24] ss:$16 sps:$4 sm:$0xff]   ;;  %v3214_v4 = vld [vmem:[#allocation6 + $0x20] ss:$16 sps:$4 sm:$0xff]  }
  0xe6   : > { %873 = vmatprep.subr.bf16.mxu0 %v3209_v1  ;;  %v3215_v5 = vld [vmem:[#allocation6 + $0x44] ss:$16 sps:$4 sm:$0xff]   ;;  %v3221_v6 = vld [vmem:[#allocation6 + $0xc] ss:$16 sps:$4 sm:$0xff]   ;;  %v3223_v7 = vld [vmem:[#allocation6 + $0x8] ss:$16 sps:$4 sm:$0xff]  }
  0xe7   : > { %874 = vmatpush1.bf16.msra.mxu0 %v3211_v2  ;;  %v3217_v8 = vld [vmem:[#allocation6 + $0x40] ss:$16 sps:$4 sm:$0xff]   ;;  %v3218_v9 = vld [vmem:[#allocation6 + $0x64] ss:$16 sps:$4 sm:$0xff]   ;;  %914 = vmatprep.subr.bf16.mxu1 %v3221_v6  ;;  %v3227_v10 = vld [vmem:[#allocation6 + $0x2c] ss:$16 sps:$4 sm:$0xff]  }
  0xe8   : > { %875 = vmatprep.subr.bf16.mxu0 %v3212_v3  ;;  %915 = vmatpush1.bf16.msra.mxu1 %v3223_v7  ;;  %v3229_v11 = vld [vmem:[#allocation6 + $0x28] ss:$16 sps:$4 sm:$0xff]   ;;  %v3220_v12 = vld [vmem:[#allocation6 + $0x60] ss:$16 sps:$4 sm:$0xff]   ;;  %v3233_v13 = vld [vmem:[#allocation6 + $0x4c] ss:$16 sps:$4 sm:$0xff]  }
  0xe9   : > { %916 = vmatprep.subr.bf16.mxu1 %v3227_v10  ;;  %v3224_v14 = vld [vmem:[#allocation6 + $0x84] ss:$16 sps:$4 sm:$0xff]   ;;  %v3235_v15 = vld [vmem:[#allocation6 + $0x48] ss:$16 sps:$4 sm:$0xff]   ;;  %v3239_v16 = vld [vmem:[#allocation6 + $0x6c] ss:$16 sps:$4 sm:$0xff]  }
  0xea   : > { %v3226_v17 = vld [vmem:[#allocation6 + $0x80] ss:$16 sps:$4 sm:$0xff]   ;;  %v3230_v18 = vld [vmem:[#allocation6 + $0xa4] ss:$16 sps:$4 sm:$0xff]   ;;  %v3241_v19 = vld [vmem:[#allocation6 + $0x68] ss:$16 sps:$4 sm:$0xff]  }
  0xeb   : > { %876 = vmatpush1.bf16.msra.mxu0 %v3214_v4  ;;  %v3245_v20 = vld [vmem:[#allocation6 + $0x8c] ss:$16 sps:$4 sm:$0xff]   ;;  %v3232_v21 = vld [vmem:[#allocation6 + $0xa0] ss:$16 sps:$4 sm:$0xff]   ;;  %v3236_v22 = vld [vmem:[#allocation6 + $0xc4] ss:$16 sps:$4 sm:$0xff]  }
  0xec   : > { %877 = vmatprep.subr.bf16.mxu0 %v3215_v5  ;;  %917 = vmatpush1.bf16.msra.mxu1 %v3229_v11  ;;  %v3247_v23 = vld [vmem:[#allocation6 + $0x88] ss:$16 sps:$4 sm:$0xff]   ;;  %v3251_v24 = vld [vmem:[#allocation6 + $0xac] ss:$16 sps:$4 sm:$0xff]   ;;  %v3238_v25 = vld [vmem:[#allocation6 + $0xc0] ss:$16 sps:$4 sm:$0xff]  }
  0xed   : > { %918 = vmatprep.subr.bf16.mxu1 %v3233_v13  ;;  %v3242_v26 = vld [vmem:[#allocation6 + $0xe4] ss:$16 sps:$4 sm:$0xff]   ;;  %v3253_v27 = vld [vmem:[#allocation6 + $0xa8] ss:$16 sps:$4 sm:$0xff]   ;;  %v3244_v28 = vld [vmem:[#allocation6 + $0xe0] ss:$16 sps:$4 sm:$0xff]  }
  0xee   : > { %v3257_v29 = vld [vmem:[#allocation6 + $0xcc] ss:$16 sps:$4 sm:$0xff]   ;;  %v3250_v31 = vld [vmem:[#allocation8 + $0x4] ss:$16 sps:$4 sm:$0xff]   ;;  %v3259_v32 = vld [vmem:[#allocation6 + $0xc8] ss:$16 sps:$4 sm:$0xff]  }
  0xef   : > { %878 = vmatpush1.bf16.msra.mxu0 %v3217_v8  ;;  %v657_v30 = vld [vmem:[%s4081_s20] sm:$0xff]  ;;  %s4346_s2 = sld [smem:[#allocation23_spill]]  ;;  %vm1615_vm1 = vcmask 1043456   ;;  %vm1599_vm2 = vcmask 64512   ;;  %s4347_s10 = sld [smem:[#allocation25_spill]] }
  0xf0   : > { %879 = vmatprep.subr.bf16.mxu0 %v3218_v9  ;;  %919 = vmatpush1.bf16.msra.mxu1 %v3235_v15  ;;  %v4102_v33 = vpack.c.bf16 %v657_v30, %v657_v30  ;;  %v3263_v34 = vld [vmem:[#allocation6 + $0xec] ss:$16 sps:$4 sm:$0xff]   ;;  %v3248_v35 = vld [vmem:[#allocation8] ss:$16 sps:$4 sm:$0xff]   ;;  %v3256_v36 = vld [vmem:[#allocation8 + $0x24] ss:$16 sps:$4 sm:$0xff]  }
  0xf1   : > { %920 = vmatprep.subr.bf16.mxu1 %v3239_v16  ;;  %v3265_v37 = vld [vmem:[#allocation6 + $0xe8] ss:$16 sps:$4 sm:$0xff]   ;;  %v3271_v38 = vld [vmem:[#allocation8 + $0xc] ss:$16 sps:$4 sm:$0xff]   ;;  %v3254_v39 = vld [vmem:[#allocation8 + $0x20] ss:$16 sps:$4 sm:$0xff]  }
  0xf2   : > { %v3262_v40 = vld [vmem:[#allocation8 + $0x44] ss:$16 sps:$4 sm:$0xff]   ;;  %v3269_v41 = vld [vmem:[#allocation8 + $0x8] ss:$16 sps:$4 sm:$0xff]   ;;  %v3277_v42 = vld [vmem:[#allocation8 + $0x2c] ss:$16 sps:$4 sm:$0xff]  }
  0xf3   : > { %880 = vmatpush1.bf16.msra.mxu0 %v3220_v12  ;;  %v3260_v43 = vld [vmem:[#allocation8 + $0x40] ss:$16 sps:$4 sm:$0xff]   ;;  %v3268_v44 = vld [vmem:[#allocation8 + $0x64] ss:$16 sps:$4 sm:$0xff]   ;;  %v3275_v45 = vld [vmem:[#allocation8 + $0x28] ss:$16 sps:$4 sm:$0xff]  }
  0xf4   : > { %881 = vmatprep.subr.bf16.mxu0 %v3224_v14  ;;  %921 = vmatpush1.bf16.msra.mxu1 %v3241_v19  ;;  %v3266_v46 = vld [vmem:[#allocation8 + $0x60] ss:$16 sps:$4 sm:$0xff]   ;;  %v3283_v47 = vld [vmem:[#allocation8 + $0x4c] ss:$16 sps:$4 sm:$0xff]   ;;  %v3274_v48 = vld [vmem:[#allocation8 + $0x84] ss:$16 sps:$4 sm:$0xff]  }
  0xf5   : > { %922 = vmatprep.subr.bf16.mxu1 %v3245_v20  ;;  %v3281_v49 = vld [vmem:[#allocation8 + $0x48] ss:$16 sps:$4 sm:$0xff]   ;;  %v3289_v50 = vld [vmem:[#allocation8 + $0x6c] ss:$16 sps:$4 sm:$0xff]   ;;  %v3272_v51 = vld [vmem:[#allocation8 + $0x80] ss:$16 sps:$4 sm:$0xff]  }
  0xf6   : > { %v3280_v52 = vld [vmem:[#allocation8 + $0xa4] ss:$16 sps:$4 sm:$0xff]   ;;  %v3287_v53 = vld [vmem:[#allocation8 + $0x68] ss:$16 sps:$4 sm:$0xff]   ;;  %v3295_v54 = vld [vmem:[#allocation8 + $0x8c] ss:$16 sps:$4 sm:$0xff]  }
  0xf7   : > { %882 = vmatpush1.bf16.msra.mxu0 %v3226_v17  ;;  %v3278_v55 = vld [vmem:[#allocation8 + $0xa0] ss:$16 sps:$4 sm:$0xff]   ;;  %v3286_v56 = vld [vmem:[#allocation8 + $0xc4] ss:$16 sps:$4 sm:$0xff]   ;;  %v3293_v57 = vld [vmem:[#allocation8 + $0x88] ss:$16 sps:$4 sm:$0xff]  }
  0xf8   : > { %883 = vmatprep.subr.bf16.mxu0 %v3230_v18  ;;  %923 = vmatpush1.bf16.msra.mxu1 %v3247_v23  ;;  %v3298_v58 = vld [vmem:[#allocation8 + $0xac] ss:$16 sps:$4 sm:$0xff]   ;;  %v3284_v59 = vld [vmem:[#allocation8 + $0xc0] ss:$16 sps:$4 sm:$0xff]   ;;  %v3292_v60 = vld [vmem:[#allocation8 + $0xe4] ss:$16 sps:$4 sm:$0xff]  }
  0xf9   : > { %924 = vmatprep.subr.bf16.mxu1 %v3251_v24  ;;  %v3296_v61 = vld [vmem:[#allocation8 + $0xa8] ss:$16 sps:$4 sm:$0xff]   ;;  %v3301_v62 = vld [vmem:[#allocation8 + $0xcc] ss:$16 sps:$4 sm:$0xff]   ;;  %v3290_v63 = vld [vmem:[#allocation8 + $0xe0] ss:$16 sps:$4 sm:$0xff]  }
  0xfa   : > { %v3307_v1 = vld [vmem:[#allocation9 + $0x4] ss:$16 sps:$4 sm:$0xff]   ;;  %v3299_v2 = vld [vmem:[#allocation8 + $0xc8] ss:$16 sps:$4 sm:$0xff]   ;;  %v3304_v3 = vld [vmem:[#allocation8 + $0xec] ss:$16 sps:$4 sm:$0xff]  }
  0xfb   : > { %884 = vmatpush1.bf16.msra.mxu0 %v3232_v21  ;;  %v3305_v4 = vld [vmem:[#allocation9] ss:$16 sps:$4 sm:$0xff]   ;;  %v3302_v5 = vld [vmem:[#allocation8 + $0xe8] ss:$16 sps:$4 sm:$0xff]   ;;  %v3310_v6 = vld [vmem:[#allocation9 + $0x24] ss:$16 sps:$4 sm:$0xff]  }
  0xfc   : > { %885 = vmatprep.subr.bf16.mxu0 %v3236_v22  ;;  %925 = vmatpush1.bf16.msra.mxu1 %v3253_v27  ;;  %v3308_v7 = vld [vmem:[#allocation9 + $0x20] ss:$16 sps:$4 sm:$0xff]   ;;  %v3313_v9 = vld [vmem:[#allocation9 + $0x44] ss:$16 sps:$4 sm:$0xff]   ;;  %v3716_v19 = vmov 0.0   ;;  %s4349_s23 = sld [smem:[#allocation27_spill]] }
  0xfd   : > { %926 = vmatprep.subr.bf16.mxu1 %v3257_v29  ;;  %v3311_v8 = vld [vmem:[#allocation9 + $0x40] ss:$16 sps:$4 sm:$0xff]   ;;  %v3316_v10 = vld [vmem:[#allocation9 + $0x64] ss:$16 sps:$4 sm:$0xff]   ;;  %v3329_v20 = vld [vmem:[#allocation9 + $0x8] ss:$16 sps:$4 sm:$0xff]  }
  0xfe   : > { %v3314_v11 = vld [vmem:[#allocation9 + $0x60] ss:$16 sps:$4 sm:$0xff]   ;;  %v3319_v12 = vld [vmem:[#allocation9 + $0x84] ss:$16 sps:$4 sm:$0xff]   ;;  %v3331_v21 = vld [vmem:[#allocation9 + $0xc] ss:$16 sps:$4 sm:$0xff]  }
  0xff   : > { %886 = vmatpush1.bf16.msra.mxu0 %v3238_v25  ;;  %v3317_v13 = vld [vmem:[#allocation9 + $0x80] ss:$16 sps:$4 sm:$0xff]   ;;  %v3322_v14 = vld [vmem:[#allocation9 + $0xa4] ss:$16 sps:$4 sm:$0xff]   ;;  %v3334_v22 = vld [vmem:[#allocation9 + $0x2c] ss:$16 sps:$4 sm:$0xff]  }
 0x100   : > { %887 = vmatprep.subr.bf16.mxu0 %v3242_v26  ;;  %927 = vmatpush1.bf16.msra.mxu1 %v3259_v32  ;;  %v3320_v15 = vld [vmem:[#allocation9 + $0xa0] ss:$16 sps:$4 sm:$0xff]   ;;  %v3328_v17 = vld [vmem:[#allocation9 + $0xe4] ss:$16 sps:$4 sm:$0xff]   ;;  %v3332_v23 = vld [vmem:[#allocation9 + $0x28] ss:$16 sps:$4 sm:$0xff]  }
 0x101   : > { %928 = vmatprep.subr.bf16.mxu1 %v3263_v34  ;;  %v3323_v16 = vld [vmem:[#allocation9 + $0xc0] ss:$16 sps:$4 sm:$0xff]   ;;  %v3337_v24 = vld [vmem:[#allocation9 + $0x4c] ss:$16 sps:$4 sm:$0xff]   ;;  %v3335_v25 = vld [vmem:[#allocation9 + $0x48] ss:$16 sps:$4 sm:$0xff]  }
 0x102   : > { %v3326_v18 = vld [vmem:[#allocation9 + $0xe0] ss:$16 sps:$4 sm:$0xff]   ;;  %v3340_v26 = vld [vmem:[#allocation9 + $0x6c] ss:$16 sps:$4 sm:$0xff]   ;;  %v3338_v27 = vld [vmem:[#allocation9 + $0x68] ss:$16 sps:$4 sm:$0xff]  }
 0x103   : > { %888 = vmatpush1.bf16.msra.mxu0 %v3244_v28  ;;  %v3343_v28 = vld [vmem:[#allocation9 + $0x8c] ss:$16 sps:$4 sm:$0xff]   ;;  %v3341_v29 = vld [vmem:[#allocation9 + $0x88] ss:$16 sps:$4 sm:$0xff]   ;;  %s4350_s17 = sld [smem:[#allocation28_spill]]  ;;  %s2926_s21 = sshll.u32 %s3830_s0, 7 }
 0x104   : > { %1173 = vmatprep.subr.bf16.mxu0 %v3250_v31  ;;  %929 = vmatpush1.bf16.msra.mxu1 %v3265_v37  ;;  %v3346_v30 = vld [vmem:[#allocation9 + $0xac] ss:$16 sps:$4 sm:$0xff]   ;;  %v3344_v31 = vld [vmem:[#allocation9 + $0xa8] ss:$16 sps:$4 sm:$0xff]   ;;  %s650_s1 = scalar_lea.vmem [#allocation15], %s2757_s22  ;;  %s2605_s12 = scalar_lea.sflag [#allocation5], %s4075_s16 }
 0x105   : > { %1214 = vmatprep.subr.bf16.mxu1 %v3271_v38  ;;  %v3347_v32 = vld [vmem:[#allocation9 + $0xc8] ss:$16 sps:$4 sm:$0xff]   ;;  %v3349_v34 = vld [vmem:[#allocation9 + $0xcc] ss:$16 sps:$4 sm:$0xff]   ;;  %p4355_p5 = scmp.ne.s32.totalorder %s4335_s5, 0  ;;  %s3718_s0 = smov [#allocation15]  }
 0x106   : > { %906 = vmatmul.mubr.bf16.vlgmr.msra.gmra.mrb[0].mxu0 %v4102_v33  ;;  %s3628_s22 = sshll.u32 %s3718_s0, 4  ;;  %s3629_s22 = int_to_ptr.vmem [resolvable:$false] %s3628_s22 }
 0x107   : > { %1174 = vmatpush1.bf16.msra.mxu0 %v3248_v35  ;;  %1205 = vmatprep.mubr.bf16.mxu0 %v3715_v0  ;;  %v3352_v35 = vld [vmem:[#allocation9 + $0xec] ss:$16 sps:$4 sm:$0xff]  }
 0x108   : > { %1175 = vmatprep.subr.bf16.mxu0 %v3256_v36  ;;  %947 = vmatmul.mubr.bf16.vlgmr.msra.gmra.mrb[0].mxu1 %v4102_v33  ;;  %v3350_v36 = vld [vmem:[#allocation9 + $0xe8] ss:$16 sps:$4 sm:$0xff]  }
 0x109   : > { %1215 = vmatpush1.bf16.msra.mxu1 %v3269_v41  ;;  %1246 = vmatprep.mubr.bf16.mxu1 %v3715_v0 }
 0x10a   : > { %1216 = vmatprep.subr.bf16.mxu1 %v3277_v42 }
 0x10b   : > { %1176 = vmatpush1.bf16.msra.mxu0 %v3254_v39 }
 0x10c   : > { %1177 = vmatprep.subr.bf16.mxu0 %v3262_v40 }
 0x10d   : > { %1217 = vmatpush1.bf16.msra.mxu1 %v3275_v45  ;;  %v652_v45 = vlaneseq }
 0x10e   : > { %1218 = vmatprep.subr.bf16.mxu1 %v3283_v47  ;;  %v991_v47 = vld [vmem:[%s4290_s4] sm:$0xf] }
 0x10f   : > { %1178 = vmatpush1.bf16.msra.mxu0 %v3260_v43 }
 0x110   : > { %1179 = vmatprep.subr.bf16.mxu0 %v3268_v44 }
 0x111   : > { %1219 = vmatpush1.bf16.msra.mxu1 %v3281_v49 }
 0x112   : > { %1220 = vmatprep.subr.bf16.mxu1 %v3289_v50 }
 0x113   : > { %1180 = vmatpush1.bf16.msra.mxu0 %v3266_v46  ;;  %v694_v46 = vshrl.u32 %v652_v45, 7 }
 0x114   : > { %1181 = vmatprep.subr.bf16.mxu0 %v3274_v48 }
 0x115   : > { %1221 = vmatpush1.bf16.msra.mxu1 %v3287_v53  ;;  %v695_v48 = vsub.s32 0, %v694_v46 }
 0x116   : > { %1222 = vmatprep.subr.bf16.mxu1 %v3295_v54 }
 0x117   : > { %1182 = vmatpush1.bf16.msra.mxu0 %v3272_v51  ;;  %v996_v49 = vrot.slane %v991_v47, %v695_v48  ;;  %v4127_v51 = vsub.s32 1, %v694_v46 }
 0x118   : > { %1183 = vmatprep.subr.bf16.mxu0 %v3280_v52 }
 0x119   : > { %1223 = vmatpush1.bf16.msra.mxu1 %v3293_v57  ;;  %v1000_v57 = vrot.slane %v991_v47, %v4127_v51 }
 0x11a   : > { %1224 = vmatprep.subr.bf16.mxu1 %v3298_v58 }
 0x11b   : > { %1184 = vmatpush1.bf16.msra.mxu0 %v3278_v55 }
 0x11c   : > { %1185 = vmatprep.subr.bf16.mxu0 %v3286_v56 }
 0x11d   : > { %1225 = vmatpush1.bf16.msra.mxu1 %v3296_v61  ;;  %v4131_v61 = vsub.s32 2, %v694_v46 }
 0x11e   : > { %1226 = vmatprep.subr.bf16.mxu1 %v3301_v62 }
 0x11f   : > { %1186 = vmatpush1.bf16.msra.mxu0 %v3284_v59 }
 0x120   : > { %1187 = vmatprep.subr.bf16.mxu0 %v3292_v60 }
 0x121   : > { %1227 = vmatpush1.bf16.msra.mxu1 %v3299_v2  ;;  %v1004_v2 = vrot.slane %v991_v47, %v4131_v61 }
 0x122   : > { %1228 = vmatprep.subr.bf16.mxu1 %v3304_v3 }
 0x123   : > { %1188 = vmatpush1.bf16.msra.mxu0 %v3290_v63 }
 0x124   : > { %1473 = vmatprep.subr.bf16.mxu0 %v3307_v1 }
 0x125   : > { %1229 = vmatpush1.bf16.msra.mxu1 %v3302_v5 }
 0x126   : > { %1206 = vmatmul.mubr.bf16.vlgmr.msra.gmra.mrb[4].mxu0 %v4102_v33  ;;  %1514 = vmatprep.subr.bf16.mxu1 %v3331_v21  ;;  %v4151_v21 = vld [vmem:[%s4292_s6] sm:$0xf] }
 0x127   : > { %1474 = vmatpush1.bf16.msra.mxu0 %v3305_v4  ;;  %1505 = vmatprep.mubr.bf16.mxu0 %v3715_v0 }
 0x128   : > { %1247 = vmatmul.mubr.bf16.vlgmr.msra.gmra.mrb[4].mxu1 %v4102_v33  ;;  %1475 = vmatprep.subr.bf16.mxu0 %v3310_v6 }
 0x129   : > { %1546 = vmatprep.mubr.bf16.mxu1 %v3715_v0  ;;  %v3325_v0 = vld [vmem:[#allocation9 + $0xc4] ss:$16 sps:$4 sm:$0xff]   ;;  %1515 = vmatpush1.bf16.msra.mxu1 %v3329_v20 }
 0x12a   : > { %1516 = vmatprep.subr.bf16.mxu1 %v3334_v22  ;;  %v1296_v22 = vrot.slane %v4151_v21, %v695_v48 }
 0x12b   : > { %1476 = vmatpush1.bf16.msra.mxu0 %v3308_v7 }
 0x12c   : > { %1477 = vmatprep.subr.bf16.mxu0 %v3313_v9  ;;  %v4138_v9 = vsub.s32 3, %v694_v46 }
 0x12d   : > { %1517 = vmatpush1.bf16.msra.mxu1 %v3332_v23 }
 0x12e   : > { %1518 = vmatprep.subr.bf16.mxu1 %v3337_v24 }
 0x12f   : > { %1478 = vmatpush1.bf16.msra.mxu0 %v3311_v8 }
 0x130   : > { %1479 = vmatprep.subr.bf16.mxu0 %v3316_v10 }
 0x131   : > { %1519 = vmatpush1.bf16.msra.mxu1 %v3335_v25 }
 0x132   : > { %1520 = vmatprep.subr.bf16.mxu1 %v3340_v26 }
 0x133   : > { %1480 = vmatpush1.bf16.msra.mxu0 %v3314_v11 }
 0x134   : > { %1481 = vmatprep.subr.bf16.mxu0 %v3319_v12 }
 0x135   : > { %1521 = vmatpush1.bf16.msra.mxu1 %v3338_v27 }
 0x136   : > { %1522 = vmatprep.subr.bf16.mxu1 %v3343_v28 }
 0x137   : > { %1482 = vmatpush1.bf16.msra.mxu0 %v3317_v13  ;;  %v1008_v13 = vrot.slane %v991_v47, %v4138_v9 }
 0x138   : > { %1483 = vmatprep.subr.bf16.mxu0 %v3322_v14 }
 0x139   : > { %1523 = vmatpush1.bf16.msra.mxu1 %v3341_v29 }
 0x13a   : > { %1524 = vmatprep.subr.bf16.mxu1 %v3346_v30 }
 0x13b   : > { %1484 = vmatpush1.bf16.msra.mxu0 %v3320_v15 }
 0x13c   : > { %1485 = vmatprep.subr.bf16.mxu0 %v3325_v0 }
 0x13d   : > { %1525 = vmatpush1.bf16.msra.mxu1 %v3344_v31 }
 0x13e   : > { %1526 = vmatprep.subr.bf16.mxu1 %v3349_v34 }
 0x13f   : > { %1486 = vmatpush1.bf16.msra.mxu0 %v3323_v16 }
 0x140   : > { %1487 = vmatprep.subr.bf16.mxu0 %v3328_v17 }
 0x141   : > { %1527 = vmatpush1.bf16.msra.mxu1 %v3347_v32 }
 0x142   : > { %1528 = vmatprep.subr.bf16.mxu1 %v3352_v35 }
 0x143   : > { %1488 = vmatpush1.bf16.msra.mxu0 %v3326_v18 }
 0x144   : > { %3007 = vmatprep.subr.bf16.mxu0 %v3716_v19 }
 0x145   : > { %1529 = vmatpush1.bf16.msra.mxu1 %v3350_v36 }
 0x146   : > { %1506 = vmatmul.mubr.bf16.vlgmr.msra.gmra.mrb[8].mxu0 %v4102_v33  ;;  %3013 = vmatprep.subr.bf16.mxu1 %v3716_v19 }
 0x147   : > { %3009 = vmatprep.mubr.msk.bf16.mxu0 %vm3717_vm0, %v3716_v19 }
 0x148   : > { %1547 = vmatmul.mubr.bf16.vlgmr.msra.gmra.mrb[8].mxu1 %v4102_v33  ;;  %v691_v33 = vld [vmem:[%s4346_s2] sm:$0xf] }
 0x149   : > { %3015 = vmatprep.mubr.msk.bf16.mxu1 %vm3717_vm0, %v3716_v19  ;;  %v696_v54 = vrot.slane %v691_v33, %v695_v48  ;;  %v700_v5 = vrot.slane %v691_v33, %v4127_v51  ;;  %v704_v12 = vrot.slane %v691_v33, %v4131_v61  ;;  %v708_v16 = vrot.slane %v691_v33, %v4138_v9 }
 0x1d9   : > { %v907_v37 = vpop.f32.mrb[0].mxu0 }
 0x1da   : > { %v909_v38 = vpop.f32.mrb[1].mxu0  ;;  %v908_v59 = vadd.f32 %v907_v37, %v696_v54 }
 0x1db   : > { %v911_v39 = vpop.f32.mrb[2].mxu0  ;;  %v948_v41 = vpop.f32.mrb[0].mxu1  ;;  %v910_v8 = vadd.f32 %v909_v38, %v700_v5 }
 0x1dc   : > { %v912_v40 = vpop.f32.mrb[3].mxu0  ;;  %v950_v42 = vpop.f32.mrb[1].mxu1  ;;  %v955_v4 = vpack.c.bf16 %v908_v59, %v908_v59  ;;  %v949_v14 = vadd.f32 %v948_v41, %v704_v12 }
 0x1dd   : > { %v952_v43 = vpop.f32.mrb[2].mxu1  ;;  %v956_v11 = vpack.c.bf16 %v910_v8, %v910_v8  ;;  %v951_v18 = vadd.f32 %v950_v42, %v708_v16  ;;  %v3355_v16 = vld [vmem:[#allocation11 + $0x48] sm:$0xff]  }
 0x1de   : > { %v953_v44 = vpop.f32.mrb[3].mxu1  ;;  %v957_v0 = vpack.c.bf16 %v949_v14, %v949_v14 }
 0x1df   : > { %v958_v20 = vpack.c.bf16 %v951_v18, %v951_v18  ;;  %v3357_v18 = vld [vmem:[#allocation11 + $0x50] sm:$0xff]  }
 0x1f9   : > { %v1207_v50 = vpop.f32.mrb[4].mxu0 }
 0x1fa   : > { %v1208_v52 = vadd.f32 %v1207_v50, %v996_v49  ;;  %v1209_v53 = vpop.f32.mrb[5].mxu0 }
 0x1fb   : > { %v1211_v55 = vpop.f32.mrb[6].mxu0  ;;  %v1248_v60 = vpop.f32.mrb[4].mxu1  ;;  %v1210_v62 = vadd.f32 %v1209_v53, %v1000_v57 }
 0x1fc   : > { %v1255_v56 = vpack.c.bf16 %v1208_v52, %v1208_v52  ;;  %v1212_v58 = vpop.f32.mrb[7].mxu0  ;;  %v1250_v63 = vpop.f32.mrb[5].mxu1  ;;  %v1249_v7 = vadd.f32 %v1248_v60, %v1004_v2 }
 0x1fd   : > { %v1252_v1 = vpop.f32.mrb[6].mxu1  ;;  %v1256_v6 = vpack.c.bf16 %v1210_v62, %v1210_v62  ;;  %v1251_v15 = vadd.f32 %v1250_v63, %v1008_v13 }
 0x1fe   : > { %3008 = vmatpush3.bf16.xpose.msra.mxu0 %v1255_v56  ;;  %v1253_v3 = vpop.f32.mrb[7].mxu1  ;;  %v1257_v10 = vpack.c.bf16 %v1249_v7, %v1249_v7 }
 0x1ff   : > { %3019 = vmatprep.subr.bf16.mxu0 %v3716_v19  ;;  %v1258_v17 = vpack.c.bf16 %v1251_v15, %v1251_v15  ;;  %v3353_v15 = vld [vmem:[#allocation11 + $0x40] sm:$0xff]  }
 0x205   : > { %3010 = vmatmul.mubr.bf16.vlgmr.msra.gmra.mrb[12].mxu0 %v955_v4 }
 0x206   : > { %3020 = vmatpush3.bf16.xpose.msra.mxu0 %v1256_v6  ;;  %3021 = vmatprep.mubr.msk.bf16.mxu0 %vm3717_vm0, %v3716_v19 }
 0x207   : > { %3031 = vmatprep.subr.bf16.mxu0 %v3716_v19 }
 0x20d   : > { %3022 = vmatmul.mubr.bf16.vlgmr.msra.gmra.mrb[16].mxu0 %v956_v11 }
 0x20e   : > { %3032 = vmatpush3.bf16.xpose.msra.mxu0 %v1257_v10  ;;  %3033 = vmatprep.mubr.msk.bf16.mxu0 %vm3717_vm0, %v3716_v19 }
 0x20f   : > { %3043 = vmatprep.subr.bf16.mxu0 %v3716_v19 }
 0x215   : > { %3034 = vmatmul.mubr.bf16.vlgmr.msra.gmra.mrb[20].mxu0 %v957_v0  ;;  %v3354_v0 = vld [vmem:[#allocation11] sm:$0xff]  }
 0x216   : > { %3044 = vmatpush3.bf16.xpose.msra.mxu0 %v1258_v17  ;;  %3045 = vmatprep.mubr.msk.bf16.mxu0 %vm3717_vm0, %v3716_v19  ;;  %v3356_v17 = vld [vmem:[#allocation11 + $0x8] sm:$0xff]  }
 0x217   : > { %2945 = vmatprep.subr.bf16.mxu0 %v3353_v15 }
 0x219   : > { %v1507_v23 = vpop.f32.mrb[8].mxu0 }
 0x21a   : > { %v1508_v24 = vadd.f32 %v1507_v23, %v1296_v22  ;;  %v4154_v25 = vpop.f32.mrb[9].mxu0  ;;  %v1300_v23 = vrot.slane %v4151_v21, %v4127_v51 }
 0x21b   : > { %v1511_v26 = vpop.f32.mrb[10].mxu0  ;;  %v1548_v11 = vpop.f32.mrb[8].mxu1 }
 0x21c   : > { %v1555_v27 = vpack.c.bf16 %v1508_v24, %v1508_v24  ;;  %v1512_v28 = vpop.f32.mrb[11].mxu0  ;;  %v1550_v12 = vpop.f32.mrb[9].mxu1  ;;  %v1510_v24 = vadd.f32 %v4154_v25, %v1300_v23 }
 0x21d   : > { %3046 = vmatmul.mubr.bf16.vlgmr.msra.gmra.mrb[24].mxu0 %v958_v20  ;;  %v1552_v13 = vpop.f32.mrb[10].mxu1  ;;  %v3358_v20 = vld [vmem:[#allocation11 + $0x10] sm:$0xff]  }
 0x21e   : > { %v1617_v29 = vsel %vm1615_vm1, %v1555_v27, 0  ;;  %v1553_v14 = vpop.f32.mrb[11].mxu1  ;;  %2946 = vmatpush3.bf16.msra.mxu0 %v3354_v0  ;;  %v1304_v27 = vrot.slane %v4151_v21, %v4131_v61 }
 0x21f   : > { %3014 = vmatpush3.bf16.msra.mxu1 %v1617_v29  ;;  %2947 = vmatprep.subr.bf16.mxu0 %v3355_v16  ;;  %v1556_v29 = vpack.c.bf16 %v1510_v24, %v1510_v24 }
 0x220   : > { %3025 = vmatprep.subr.bf16.mxu1 %v3716_v19 }
 0x222   : > { %2948 = vmatpush3.bf16.msra.mxu0 %v3356_v17 }
 0x223   : > { %2949 = vmatprep.subr.bf16.mxu0 %v3357_v18 }
 0x226   : > { %2950 = vmatpush3.bf16.msra.mxu0 %v3358_v20 }
 0x2d8   : > { %v1593_v30 = vpop.f32.mrb[12].mxu0 }
 0x2d9   : > { %v3011_v31 = vpop.f32.mrb[13].mxu0  ;;  %v1600_v32 = vsel %vm1599_vm2, %v1593_v30, -inf }
 0x2da   : > { %1601 = vmax.xlane.f32.xlu0 %v1600_v32  ;;  %v1596_v34 = vpop.f32.mrb[14].mxu0  ;;  %v1549_v31 = vadd.f32 %v1548_v11, %v1304_v27  ;;  %v3385_v11 = vld [vmem:[#allocation11 + $0xf8] sm:$0xff]  }
 0x2db   : > { %v3012_v35 = vpop.f32.mrb[15].mxu0  ;;  %v1717_v34 = vsel %vm1615_vm1, %v1556_v29, 0 }
 0x2dc   : > { %v1557_v51 = vpack.c.bf16 %v1549_v31, %v1549_v31 }
 0x2e0   : > { %v1695_v36 = vpop.f32.mrb[16].mxu0 }
 0x2e1   : > { %v3023_v37 = vpop.f32.mrb[17].mxu0  ;;  %v1701_v38 = vsel %vm1599_vm2, %v1695_v36, -inf }
 0x2e2   : > { %1702 = vmax.xlane.f32.xlu0 %v1701_v38  ;;  %v1698_v39 = vpop.f32.mrb[18].mxu0  ;;  %v1817_v37 = vsel %vm1615_vm1, %v1557_v51, 0 }
 0x2e3   : > { %v3024_v40 = vpop.f32.mrb[19].mxu0 }
 0x2e8   : > { %v1795_v41 = vpop.f32.mrb[20].mxu0 }
 0x2e9   : > { %v3035_v42 = vpop.f32.mrb[21].mxu0  ;;  %v1801_v43 = vsel %vm1599_vm2, %v1795_v41, -inf }
 0x2ea   : > { %1802 = vmax.xlane.f32.xlu1 %v1801_v43  ;;  %v1798_v44 = vpop.f32.mrb[22].mxu0 }
 0x2eb   : > { %v3036_v46 = vpop.f32.mrb[23].mxu0 }
 0x2f0   : > { %v1895_v47 = vpop.f32.mrb[24].mxu0 }
 0x2f1   : > { %v3047_v48 = vpop.f32.mrb[25].mxu0  ;;  %v1901_v49 = vsel %vm1599_vm2, %v1895_v47, -inf }
 0x2f2   : > { %1902 = vmax.xlane.f32.xlu1 %v1901_v49  ;;  %v1898_v33 = vpop.f32.mrb[26].mxu0  ;;  %v3359_v48 = vld [vmem:[#allocation11 + $0x58] sm:$0xff]  }
 0x2f3   : > { %v3048_v50 = vpop.f32.mrb[27].mxu0  ;;  %v3360_v49 = vld [vmem:[#allocation11 + $0x18] sm:$0xff]   ;;  %2951 = vmatprep.subr.bf16.mxu0 %v3359_v48  ;;  %v3361_v33 = vld [vmem:[#allocation11 + $0x60] sm:$0xff]  }
 0x2f4   : > { %v3362_v50 = vld [vmem:[#allocation11 + $0xc0] sm:$0xff]   ;;  %2952 = vmatpush3.bf16.msra.mxu0 %v3360_v49 }
 0x2f5   : > { %2953 = vmatprep.subr.bf16.mxu0 %v3361_v33 }
 0x367   : > { %v1602_v52 = vpop.xlane.xlu0 %1601 }
 0x368   : > { %v1603_v53 = vsub.f32 %v1593_v30, %v1602_v52  ;;  %v3363_v52 = vld [vmem:[#allocation11 + $0x20] sm:$0xff]  }
 0x369   : > { %2954 = vmatpush3.bf16.msra.mxu0 %v3363_v52 }
 0x36a   : > { %v1604_v54 = vmul.f32 1.442695, %v1603_v53  ;;  %v3364_v53 = vld [vmem:[#allocation11 + $0x80] sm:$0xff]  }
 0x36c   : > { %3405 = vpow2.f32 %v1604_v54  ;;  %v3365_v54 = vld [vmem:[#allocation11 + $0x68] sm:$0xff]  }
 0x36d   : > { %2955 = vmatprep.subr.bf16.mxu0 %v3365_v54  ;;  %v3390_v54 = vld [vmem:[#allocation12 + $0x8] sm:$0xff]  }
 0x36f   : > { %v1703_v55 = vpop.xlane.xlu0 %1702 }
 0x370   : > { %v1704_v56 = vsub.f32 %v1695_v36, %v1703_v55  ;;  %v1308_v36 = vrot.slane %v4151_v21, %v4138_v9  ;;  %v3366_v55 = vld [vmem:[#allocation11 + $0xc8] sm:$0xff]  }
 0x372   : > { %v1705_v57 = vmul.f32 1.442695, %v1704_v56  ;;  %v1551_v39 = vadd.f32 %v1550_v12, %v1308_v36  ;;  %v3367_v56 = vld [vmem:[#allocation11 + $0x28] sm:$0xff]   ;;  %v3386_v12 = vld [vmem:[#allocation11 + $0xb8] sm:$0xff]  }
 0x373   : > { %2956 = vmatpush3.bf16.msra.mxu0 %v3367_v56 }
 0x374   : > { %3407 = vpow2.f32 %v1705_v57  ;;  %v1558_v43 = vpack.c.bf16 %v1551_v39, %v1551_v39  ;;  %v3368_v57 = vld [vmem:[#allocation11 + $0x88] sm:$0xff]  }
 0x376   : > { %v3406_v58 = vpop.eup %3405  ;;  %v1917_v9 = vsel %vm1615_vm1, %v1558_v43, 0 }
 0x377   : > { %v1803_v59 = vpop.xlane.xlu1 %1802  ;;  %v1606_v60 = vsel %vm1599_vm2, %v3406_v58, 0.0 }
 0x378   : > { %v1804_v62 = vsub.f32 %v1795_v41, %v1803_v59  ;;  %1607 = vadd.xlane.f32.xlu0 %v1606_v60  ;;  %v3370_v59 = vld [vmem:[#allocation11 + $0xd0] sm:$0xff]  }
 0x379   : > { %v3371_v60 = vld [vmem:[#allocation11 + $0x30] sm:$0xff]  }
 0x37a   : > { %v1805_v63 = vmul.f32 1.442695, %v1804_v62  ;;  %v3372_v62 = vld [vmem:[#allocation11 + $0x90] sm:$0xff]  }
 0x37c   : > { %3409 = vpow2.f32 %v1805_v63  ;;  %v3373_v63 = vld [vmem:[#allocation11 + $0x78] sm:$0xff]  }
 0x37e   : > { %v3408_v1 = vpop.eup %3407 }
 0x37f   : > { %v1903_v2 = vpop.xlane.xlu1 %1902  ;;  %v1707_v3 = vsel %vm1599_vm2, %v3408_v1, 0.0 }
 0x380   : > { %v1904_v4 = vsub.f32 %v1895_v47, %v1903_v2  ;;  %1708 = vadd.xlane.f32.xlu1 %v1707_v3  ;;  %v3375_v2 = vld [vmem:[#allocation11 + $0x38] sm:$0xff]  }
 0x381   : > { %v3376_v3 = vld [vmem:[#allocation11 + $0x98] sm:$0xff]  }
 0x382   : > { %v1905_v5 = vmul.f32 1.442695, %v1904_v4  ;;  %v3379_v4 = vld [vmem:[#allocation11 + $0xe0] sm:$0xff]  }
 0x384   : > { %3411 = vpow2.f32 %v1905_v5  ;;  %v3380_v5 = vld [vmem:[#allocation11 + $0xa0] sm:$0xff]  }
 0x386   : > { %v3410_v6 = vpop.eup %3409 }
 0x387   : > { %v1807_v7 = vsel %vm1599_vm2, %v3410_v6, 0.0 }
 0x388   : > { %1808 = vadd.xlane.f32.xlu0 %v1807_v7  ;;  %v3382_v7 = vld [vmem:[#allocation11 + $0xa8] sm:$0xff]  }
 0x38e   : > { %v3412_v8 = vpop.eup %3411 }
 0x38f   : > { %v1907_v10 = vsel %vm1599_vm2, %v3412_v8, 0.0 }
 0x390   : > { %1908 = vadd.xlane.f32.xlu1 %v1907_v10  ;;  %v3384_v10 = vld [vmem:[#allocation11 + $0xb0] sm:$0xff]  }
 0x405   : > { %v1608_v22 = vpop.xlane.xlu0 %1607 }
 0x406   : > { %3413 = vrcp.f32 %v1608_v22 }
 0x40d   : > { %v1709_v26 = vpop.xlane.xlu1 %1708 }
 0x40e   : > { %3415 = vrcp.f32 %v1709_v26 }
 0x410   : > { %v3414_v28 = vpop.eup %3413 }
 0x411   : > { %v1610_v30 = vmul.f32 %v3414_v28, %v3406_v58  ;;  %v3369_v58 = vld [vmem:[#allocation11 + $0x70] sm:$0xff]  }
 0x412   : > { %2957 = vmatprep.subr.bf16.mxu0 %v3369_v58 }
 0x413   : > { %v1611_v32 = vpack.c.bf16 %v1610_v30, %v1610_v30  ;;  %2958 = vmatpush3.bf16.msra.mxu0 %v3371_v60 }
 0x414   : > { %2959 = vmatprep.subr.bf16.mxu0 %v3373_v63  ;;  %v3391_v63 = vld [vmem:[#allocation12 + $0x10] sm:$0xff]  }
 0x415   : > { %3016 = vmatmul.mubr.msk.bf16.vlgmr.msra.gmra.mrb[12].mxu1 %vm1599_vm2, %v1611_v32  ;;  %v1809_v35 = vpop.xlane.xlu0 %1808 }
 0x416   : > { %3026 = vmatpush3.bf16.msra.mxu1 %v1717_v34  ;;  %3417 = vrcp.f32 %v1809_v35  ;;  %3027 = vmatprep.mubr.msk.bf16.mxu1 %vm3717_vm0, %v3716_v19 }
 0x417   : > { %3037 = vmatprep.subr.bf16.mxu1 %v3716_v19  ;;  %2960 = vmatpush3.bf16.msra.mxu0 %v3375_v2  ;;  %v3394_v2 = vld [vmem:[#allocation12 + $0x28] sm:$0xff]  }
 0x418   : > { %v3416_v25 = vpop.eup %3415  ;;  %3055 = vmatprep.subr.bf16.mxu0 %v3716_v19 }
 0x419   : > { %v1711_v61 = vmul.f32 %v3416_v25, %v3408_v1  ;;  %v3374_v1 = vld [vmem:[#allocation11 + $0xd8] sm:$0xff]  }
 0x41b   : > { %v1712_v38 = vpack.c.bf16 %v1711_v61, %v1711_v61 }
 0x41d   : > { %3028 = vmatmul.mubr.msk.bf16.vlgmr.msra.gmra.mrb[16].mxu1 %vm1599_vm2, %v1712_v38  ;;  %v1909_v40 = vpop.xlane.xlu1 %1908 }
 0x41e   : > { %3419 = vrcp.f32 %v1909_v40  ;;  %3038 = vmatpush3.bf16.msra.mxu1 %v1817_v37  ;;  %3039 = vmatprep.mubr.msk.bf16.mxu1 %vm3717_vm0, %v3716_v19 }
 0x41f   : > { %3049 = vmatprep.subr.bf16.mxu1 %v3716_v19 }
 0x420   : > { %v3418_v41 = vpop.eup %3417 }
 0x421   : > { %v1811_v42 = vmul.f32 %v3418_v41, %v3410_v6  ;;  %v3381_v6 = vld [vmem:[#allocation11 + $0xe8] sm:$0xff]  }
 0x423   : > { %v1812_v44 = vpack.c.bf16 %v1811_v42, %v1811_v42 }
 0x425   : > { %3040 = vmatmul.mubr.msk.bf16.vlgmr.msra.gmra.mrb[20].mxu1 %vm1599_vm2, %v1812_v44  ;;  %v2866_v44 = vld [vmem:[%s4347_s10] ss:$0 sm:$0xff]  ;;  %s4351_s10 = sld [smem:[#allocation29_spill]] }
 0x426   : > { %3050 = vmatpush3.bf16.msra.mxu1 %v1917_v9  ;;  %3051 = vmatprep.mubr.msk.bf16.mxu1 %vm3717_vm0, %v3716_v19 }
 0x427   : > { %2967 = vmatprep.subr.bf16.mxu1 %v3362_v50  ;;  %v3425_v50 = vld [vmem:[%s4081_s20] sm:$0xff]  ;;  %s4348_s20 = sld [smem:[#allocation26_spill]] }
 0x428   : > { %v3420_v21 = vpop.eup %3419 }
 0x429   : > { %v1911_v46 = vmul.f32 %v3420_v21, %v3412_v8  ;;  %v3383_v8 = vld [vmem:[#allocation11 + $0xf0] sm:$0xff]  }
 0x42b   : > { %v1912_v47 = vpack.c.bf16 %v1911_v46, %v1911_v46 }
 0x42d   : > { %3052 = vmatmul.mubr.msk.bf16.vlgmr.msra.gmra.mrb[24].mxu1 %vm1599_vm2, %v1912_v47 }
 0x42e   : > { %2968 = vmatpush3.bf16.msra.mxu1 %v3364_v53  ;;  %v3389_v53 = vld [vmem:[#allocation12] sm:$0xff]  }
 0x42f   : > { %2969 = vmatprep.subr.bf16.mxu1 %v3366_v55  ;;  %v653_v55 = vand.u32 127, %v652_v45  ;;  %v3393_v45 = vld [vmem:[#allocation12 + $0x20] sm:$0xff]  }
 0x431   : > { %vm654_vm3 = vcmp.lt.s32.totalorder %v653_v55, 32 }
 0x432   : > { %2970 = vmatpush3.bf16.msra.mxu1 %v3368_v57  ;;  %v4202_v58 = vsel %vm654_vm3, 1.0, %v3716_v19 }
 0x433   : > { %2971 = vmatprep.subr.bf16.mxu1 %v3370_v59 }
 0x436   : > { %2972 = vmatpush3.bf16.msra.mxu1 %v3372_v62 }
 0x437   : > { %2973 = vmatprep.subr.bf16.mxu1 %v3374_v1  ;;  %v3392_v1 = vld [vmem:[#allocation12 + $0x18] sm:$0xff]  }
 0x43a   : > { %2974 = vmatpush3.bf16.msra.mxu1 %v3376_v3  ;;  %v3395_v3 = vld [vmem:[#allocation12 + $0x30] sm:$0xff]  }
 0x43b   : > { %2975 = vmatprep.subr.bf16.mxu1 %v3379_v4  ;;  %v3396_v4 = vld [vmem:[#allocation12 + $0x38] sm:$0xff]  }
 0x43e   : > { %2976 = vmatpush3.bf16.msra.mxu1 %v3380_v5  ;;  %v3397_v5 = vld [vmem:[#allocation14] sm:$0xff]  }
 0x43f   : > { %2977 = vmatprep.subr.bf16.mxu1 %v3381_v6  ;;  %v3398_v6 = vld [vmem:[#allocation14 + $0x8] sm:$0xff]  }
 0x442   : > { %2978 = vmatpush3.bf16.msra.mxu1 %v3382_v7  ;;  %v3399_v7 = vld [vmem:[#allocation14 + $0x10] sm:$0xff]  }
 0x443   : > { %2979 = vmatprep.subr.bf16.mxu1 %v3383_v8  ;;  %v3400_v8 = vld [vmem:[#allocation14 + $0x18] sm:$0xff]  }
 0x446   : > { %2980 = vmatpush3.bf16.msra.mxu1 %v3384_v10  ;;  %v3401_v10 = vld [vmem:[#allocation14 + $0x20] sm:$0xff]  }
 0x447   : > { %2981 = vmatprep.subr.bf16.mxu1 %v3385_v11  ;;  %v3402_v11 = vld [vmem:[#allocation14 + $0x28] sm:$0xff]  }
 0x44a   : > { %2982 = vmatpush3.bf16.msra.mxu1 %v3386_v12 }
 0x44b   : > { %3075 = vmatprep.subr.bf16.mxu1 %v3716_v19 }
 0x4e8   : > { %v1653_v13 = vpop.f32.mrb[12].mxu1 }
 0x4e9   : > { %v1659_v14 = vpack.c.bf16 %v1653_v13, %v1653_v13  ;;  %v3017_v15 = vpop.f32.mrb[13].mxu1 }
 0x4ea   : > { %v1656_v0 = vpop.f32.mrb[14].mxu1 }
 0x4eb   : > { %1660 = vst [vmem:[#allocation2] sm:$0xf] %v1659_v14  ;;  %v3018_v16 = vpop.f32.mrb[15].mxu1  ;;  %v2903_v0 = vld [vmem:[%s4348_s20] ss:$0 sm:$0xff]  ;;  %s4352_s20 = sld [smem:[#allocation30_spill]] }
 0x4f0   : > { %v1753_v17 = vpop.f32.mrb[16].mxu1 }
 0x4f1   : > { %v1759_v18 = vpack.c.bf16 %v1753_v17, %v1753_v17  ;;  %v3029_v20 = vpop.f32.mrb[17].mxu1  ;;  %v2904_v17 = vld [vmem:[%s4349_s23] ss:$0 sm:$0xff]  ;;  %s4353_s23 = sld [smem:[#allocation31_spill]] }
 0x4f2   : > { %v1756_v22 = vpop.f32.mrb[18].mxu1 }
 0x4f3   : > { %1760 = vst [vmem:[#allocation2 + $0x4] sm:$0xf] %v1759_v18  ;;  %v3030_v23 = vpop.f32.mrb[19].mxu1 }
 0x4f4   : > { %v3403_v23 = vld [vmem:[#allocation14 + $0x30] sm:$0xff]  }
 0x4f8   : > { %v1853_v24 = vpop.f32.mrb[20].mxu1 }
 0x4f9   : > { %v1859_v26 = vpack.c.bf16 %v1853_v24, %v1853_v24  ;;  %v3041_v27 = vpop.f32.mrb[21].mxu1  ;;  %v3404_v24 = vld [vmem:[#allocation14 + $0x38] sm:$0xff]  }
 0x4fa   : > { %v1856_v28 = vpop.f32.mrb[22].mxu1  ;;  %v1961_v29 = vld [vmem:[#allocation2] sm:$0xff] }
 0x4fb   : > { %1860 = vst [vmem:[#allocation2 + $0x8] sm:$0xf] %v1859_v26  ;;  %v3042_v30 = vpop.f32.mrb[23].mxu1  ;;  %v2867_v31 = vcombine.low %v1961_v29, %v1961_v29  ;;  %v2868_v32 = vcombine.high %v1961_v29, %v1961_v29  ;;  %v2905_v26 = vld [vmem:[%s4350_s17] ss:$0 sm:$0xff]  ;;  %s2618_s17 = sshll.u32 %s650_s1, 4  ;;  %s4244_s17 = int_to_ptr.vmem [resolvable:$true] %s2618_s17 }
 0x4fc   : > { %s3624_s28 = scalar_lea.vmem %s4244_s17, 128  ;;  %p3631_p11 = scmp.lt.s32.totalorder %s4244_s17, %s3629_s22 }
 0x4fd   : > { %2272 = vmatprep.mubr.bf16.mxu0 %v2868_v32  ;;  %p3625_p6 = scmp.ne.s32.totalorder %s4244_s17, %s3624_s28 }
 0x4fe   : > { %2273 = vmatmul.mubr.bf16.vlgmr.msra.gmra.mrb[28].mxu0 %v2867_v31 }
 0x4ff   : > { %3071 = vmatprep.mubr.msk.bf16.mxu0 %vm3717_vm0, %v3716_v19  ;;  %3056 = vmatpush3.bf16.msra.mxu0 %v3389_v53  ;;  %p3626_p10 = pnand %p3625_p6, %p4355_p5 }
 0x500   : > { %v1953_v34 = vpop.f32.mrb[24].mxu1  ;;  %3057 = vmatprep.subr.bf16.mxu0 %v3716_v19 }
 0x501   : > { %v1959_v35 = vpack.c.bf16 %v1953_v34, %v1953_v34  ;;  %v3053_v51 = vpop.f32.mrb[25].mxu1  ;;  %p3627_p1 = pneg %p3626_p10 }
 0x502   : > { %v1956_v25 = vpop.f32.mrb[26].mxu1 }
 0x503   : > { %1960 = vst [vmem:[#allocation2 + $0xc] sm:$0xf] %v1959_v35  ;;  %v3054_v61 = vpop.f32.mrb[27].mxu1  ;;  %3058 = vmatpush3.bf16.msra.mxu0 %v3390_v54  ;;  %v2914_v35 = vld [vmem:[%s4351_s10] ss:$0 sm:$0xff]  ;;  %s4354_s10 = sld [smem:[#allocation32_spill]] }
 0x504   : > { %3059 = vmatprep.subr.bf16.mxu0 %v3716_v19 }
 0x507   : > { %3060 = vmatpush3.bf16.msra.mxu0 %v3391_v63 }
 0x508   : > { %3061 = vmatprep.subr.bf16.mxu0 %v3716_v19 }
 0x509   : > { %s4242_s2 = scalar_lea.hbm %s4354_s10, %s2926_s21 }
 0x50a   : > { %v1962_v36 = vld [vmem:[#allocation2 + $0x8] sm:$0xff] }
 0x50b   : > { %v2869_v37 = vcombine.low %v1962_v36, %v1962_v36  ;;  %v2870_v38 = vcombine.high %v1962_v36, %v1962_v36  ;;  %3062 = vmatpush3.bf16.msra.mxu0 %v3392_v1 }
 0x50c   : > { %3063 = vmatprep.subr.bf16.mxu0 %v3716_v19 }
 0x50d   : > { %2312 = vmatprep.mubr.bf16.mxu1 %v2870_v38 }
 0x50e   : > { %2313 = vmatmul.mubr.bf16.vlgmr.msra.gmra.mrb[28].mxu1 %v2869_v37 }
 0x50f   : > { %3091 = vmatprep.mubr.msk.bf16.mxu1 %vm3717_vm0, %v3716_v19  ;;  %3064 = vmatpush3.bf16.msra.mxu0 %v3393_v45 }
 0x510   : > { %3065 = vmatprep.subr.bf16.mxu0 %v3716_v19  ;;  %3076 = vmatpush3.bf16.msra.mxu1 %v3397_v5 }
 0x511   : > { %3077 = vmatprep.subr.bf16.mxu1 %v3716_v19 }
 0x513   : > { %3066 = vmatpush3.bf16.msra.mxu0 %v3394_v2 }
 0x514   : > { %3067 = vmatprep.subr.bf16.mxu0 %v3716_v19  ;;  %3078 = vmatpush3.bf16.msra.mxu1 %v3398_v6 }
 0x515   : > { %3079 = vmatprep.subr.bf16.mxu1 %v3716_v19 }
 0x517   : > { %3068 = vmatpush3.bf16.msra.mxu0 %v3395_v3 }
 0x518   : > { %3069 = vmatprep.subr.bf16.mxu0 %v3716_v19  ;;  %3080 = vmatpush3.bf16.msra.mxu1 %v3399_v7 }
 0x519   : > { %3081 = vmatprep.subr.bf16.mxu1 %v3716_v19 }
 0x51b   : > { %3070 = vmatpush3.bf16.msra.mxu0 %v3396_v4 }
 0x51c   : > { %3082 = vmatpush3.bf16.msra.mxu1 %v3400_v8 }
 0x51d   : > { %3083 = vmatprep.subr.bf16.mxu1 %v3716_v19 }
 0x520   : > { %3084 = vmatpush3.bf16.msra.mxu1 %v3401_v10 }
 0x521   : > { %3085 = vmatprep.subr.bf16.mxu1 %v3716_v19 }
 0x524   : > { %3086 = vmatpush3.bf16.msra.mxu1 %v3402_v11 }
 0x525   : > { %3087 = vmatprep.subr.bf16.mxu1 %v3716_v19 }
 0x528   : > { %3088 = vmatpush3.bf16.msra.mxu1 %v3403_v23 }
 0x529   : > { %3089 = vmatprep.subr.bf16.mxu1 %v3716_v19 }
 0x52c   : > { %3090 = vmatpush3.bf16.msra.mxu1 %v3404_v24 }
 0x5d1   : > { %v2961_v39 = vpop.f32.mrb[28].mxu0 }
 0x5d2   : > { %v2962_v40 = vpop.f32.mrb[29].mxu0 }
 0x5d3   : > { %v2963_v41 = vadd.f32 %v2962_v40, %v2961_v39  ;;  %v2964_v42 = vpop.f32.mrb[30].mxu0 }
 0x5d4   : > { %v2965_v43 = vpop.f32.mrb[31].mxu0 }
 0x5d5   : > { %v2275_v46 = vadd.f32 %v2963_v41, %v2866_v44 }
 0x5e1   : > { %v2983_v9 = vpop.f32.mrb[28].mxu1 }
 0x5e2   : > { %v2984_v21 = vpop.f32.mrb[29].mxu1 }
 0x5e3   : > { %v2985_v47 = vadd.f32 %v2984_v21, %v2983_v9  ;;  %v2986_v48 = vpop.f32.mrb[30].mxu1 }
 0x5e4   : > { %v2987_v49 = vpop.f32.mrb[31].mxu1  ;;  %v2924_v48 = vld [vmem:[%s4353_s23] ss:$0 sm:$0xff] }
 0x5e5   : > { %v2315_v33 = vadd.f32 %v2985_v47, %v2275_v46  ;;  %v2923_v46 = vld [vmem:[%s4352_s20] ss:$0 sm:$0xff]  ;;  %s3630_s20 = scalar_lea.vmem %s3629_s22, 256 }
 0x5e6   : > { %p3632_p12 = scmp.lt.s32.totalorder %s3630_s20, %s3624_s28 }
 0x5e7   : > { %v2320_v52 = vadd.f32 %v3425_v50, %v2315_v33 }
 0x5e8   : > { %p3633_p13 = por %p3632_p12, %p3631_p11 }
 0x5e9   : > { %2323 = vadd.xlane.f32.xlu0 %v2320_v52 }
 0x5ea   : > { %p3634_p3 = pnand %p3633_p13, %p3627_p1 }
 0x676   : > { %v2324_v56 = vpop.xlane.xlu0 %2323 }
 0x677   : > { %v2325_v57 = vmul.f32 0.03125, %v2324_v56 }
 0x679   : > { %v2326_v59 = vsub.f32 %v2320_v52, %v2325_v57 }
 0x67b   : > { %v2327_v60 = vmul.f32 %v4202_v58, %v2326_v59 }
 0x67d   : > { %v2328_v62 = vmul.f32 %v2327_v60, %v2327_v60 }
 0x67f   : > { %2329 = vadd.xlane.f32.xlu1 %v2328_v62 }
 0x70c   : > { %v2330_v12 = vpop.xlane.xlu1 %2329 }
 0x70d   : > { %v2331_v13 = vmul.f32 0.03125, %v2330_v12 }
 0x70f   : > { %v2332_v14 = vadd.f32 1e-05, %v2331_v13 }
 0x711   : > { %3421 = vrsqrt.f32 %v2332_v14 }
 0x71b   : > { %v3422_v15 = vpop.eup %3421 }
 0x71c   : > { %v2334_v16 = vmul.f32 %v3422_v15, %v2327_v60 }
 0x71e   : > { %v2341_v18 = vmul.f32 %v2903_v0, %v2334_v16 }
 0x720   : > { %v2348_v20 = vadd.f32 %v2904_v17, %v2341_v18 }
 0x722   : > { %v2349_v22 = vpack.c.bf16 %v2348_v20, %v2348_v20 }
 0x724   : > { %3072 = vmatmul.mubr.bf16.vlgmr.msra.gmra.mrb[32].mxu0 %v2349_v22 }
 0x7f7   : > { %v2455_v27 = vpop.f32.mrb[32].mxu0 }
 0x7f8   : > { %v2456_v28 = vadd.f32 %v2905_v26, %v2455_v27  ;;  %v3073_v29 = vpop.f32.mrb[33].mxu0 }
 0x7f9   : > { %v2458_v30 = vpop.f32.mrb[34].mxu0 }
 0x7fa   : > { %v2461_v31 = vmax.f32 %v2456_v28, 0.0  ;;  %v3074_v32 = vpop.f32.mrb[35].mxu0 }
 0x7fc   : > { %v2462_v34 = vpack.c.bf16 %v2461_v31, %v2461_v31 }
 0x7fe   : > { %3092 = vmatmul.mubr.bf16.vlgmr.msra.gmra.mrb[32].mxu1 %v2462_v34 }
 0x8d1   : > { %v2568_v51 = vpop.f32.mrb[32].mxu1 }
 0x8d2   : > { %v2569_v19 = vadd.f32 %v2914_v35, %v2568_v51  ;;  %v3093_v25 = vpop.f32.mrb[33].mxu1 }
 0x8d3   : > { %v2571_v61 = vpop.f32.mrb[34].mxu1 }
 0x8d4   : > { %v3094_v36 = vpop.f32.mrb[35].mxu1  ;;  %v2574_v37 = vadd.f32 %v2569_v19, %v2348_v20 }
 0x8d6   : > { %2577 = vadd.xlane.f32.xlu0 %v2574_v37 }
 0x963   : > { %v2578_v38 = vpop.xlane.xlu0 %2577 }
 0x964   : > { %v2579_v39 = vmul.f32 0.03125, %v2578_v38 }
 0x966   : > { %v2580_v40 = vsub.f32 %v2574_v37, %v2579_v39 }
 0x968   : > { %v2581_v41 = vmul.f32 %v4202_v58, %v2580_v40 }
 0x96a   : > { %v2582_v42 = vmul.f32 %v2581_v41, %v2581_v41 }
 0x96c   : > { %2583 = vadd.xlane.f32.xlu1 %v2582_v42 }
 0x9f9   : > { %v2584_v43 = vpop.xlane.xlu1 %2583 }
 0x9fa   : > { %v2585_v44 = vmul.f32 0.03125, %v2584_v43 }
 0x9fc   : > { %v2586_v9 = vadd.f32 1e-05, %v2585_v44 }
 0x9fe   : > { %3423 = vrsqrt.f32 %v2586_v9 }
 0xa08   : > { %v3424_v21 = vpop.eup %3423 }
 0xa09   : > { %v2588_v47 = vmul.f32 %v3424_v21, %v2581_v41 }
 0xa0b   : > { %v2595_v49 = vmul.f32 %v2923_v46, %v2588_v47 }
 0xa0d   : > { %v2602_v33 = vadd.f32 %v2924_v48, %v2595_v49 }
 0xa0f   : > { %2603 = vst [vmem:[%s650_s1] sm:$0xff] %v2602_v33 }
 0xa10   : > { %3637 = shalt.err (!%p3634_p3)
}
 0xa11   : > { %s3638_s16 = scalar_lea.hbm %s4242_s2, 128  ;;  %s3642_s23 = scalar_lea.hbm %s4354_s10, 256 }
 0xa12   : > { %p3639_p7 = scmp.ne.s32.totalorder %s4242_s2, %s3638_s16  ;;  %p3643_p8 = scmp.lt.u32.totalorder %s4242_s2, %s4354_s10 }
 0xa13   : > { %p3644_p0 = scmp.lt.u32.totalorder %s3642_s23, %s3638_s16  ;;  %p3646_p6 = scmp.lt.u32.totalorder %s3638_s16, %s4242_s2 }
 0xa14   : > { %p3640_p9 = pnand %p3639_p7, %p4355_p5 }
 0xa15   : > { %p3645_p2 = por %p3644_p0, %p3643_p8 }
 0xa16   : > { %p3641_p4 = pneg %p3640_p9 }
 0xa17   : > { %p3647_p10 = por %p3646_p6, %p3645_p2 }
 0xa19   : > { %p3648_p1 = pnand %p3647_p10, %p3641_p4 }
 0xa1b   : > { %3651 = shalt.err (!%p3648_p1)
}
 0xa1c   : > { %3121 = dma.vmem_to_hbm [thread:$0]  (%p4355_p5), %s4244_s17, 128, %s4242_s2, %s2605_s12  }
 0xa1d PF: > { %s2630_s8 = sand.u32 1, %s3690_s24   ;;  %p4356_p11 = scmp.ne.s32.totalorder %s4336_s9, 0 }
 0xa1e   : > { %p4357_p12 = scmp.ge.s32.totalorder %s3702_s27, 2  ;;  %s2631_s29 = scalar_lea.sflag [#allocation5], %s2630_s8 }
 0xa20   : > { %p3147_p13 = pnand %p4357_p12, %p4356_p11 }
 0xa22   : > { %3685 = dma.done.wait (!%p3147_p13), %s2631_s29, 128  }
 0xa23   : > { %3687 = vsyncadd (!%p3147_p13), %s2631_s29, 4294967168  ;;  %p33_p3 = scmp.ge.s32.totalorder %s3999_s18, 4   ;;  %s4358_s24 = smov %s3694_s25 }
 0xa24   : > { %s4359_s25 = smov %s3698_s26  ;;  %s4360_s26 = smov %s4010_s14 }
 0xa25   : > { %s4361_s27 = smov %s3999_s18  ;;  %35 = sbr.rel (!%p33_p3) target bundleno = 21 (0x15), region = 157 }
 0xa2c   :  { %2636 = vsyncpa [#allocation4], 1 }
 0xa2d   :  { %2638 = vsyncpa [#allocation4 + $0x1], 1 }
 0xa2e   :  { %2639 = vsyncpa [#allocation7], 1 }
 0xa2f   :  { %2640 = vsyncpa [#allocation10], 1 }
 0xa30   :  { %2641 = vsyncpa [#allocation13], 1 }
 0xa31   :  { %2642 = vsyncpa [#allocation5], 1 }
 0xa32   :  { %2644 = vsyncpa [#allocation5 + $0x1], 1 }

// kernel: tpu_custom_call.1
= control target key start
LH: loop header
LB: loop body
LE: loop exit
PB: predicated region body
PF: predicated region fallthrough
CT: control target
= control target key end

     0   :  { %s4286_s0 = inlined_call_operand.hbm [shape: f32[2,8,128], index: 0, kind: input, shape index: {}]   ;;  %s4287_s1 = inlined_call_operand.hbm [shape: bf16[128,512], index: 1, kind: input, shape index: {}]   ;;  %s4288_s2 = inlined_call_operand.vmem [shape: f32[1,512], index: 2, kind: input, shape index: {}]   ;;  %s4289_s3 = inlined_call_operand.hbm [shape: bf16[128,512], index: 3, kind: input, shape index: {}]   ;;  %s4290_s4 = inlined_call_operand.vmem [shape: f32[1,512], index: 4, kind: input, shape index: {}]   ;;  %s4291_s5 = inlined_call_operand.hbm [shape: bf16[128,512], index: 5, kind: input, shape index: {}]   ;;  %s4292_s6 = inlined_call_operand.vmem [shape: f32[1,512], index: 6, kind: input, shape index: {}]   ;;  %s4293_s7 = inlined_call_operand.hbm [shape: bf16[512,128], index: 7, kind: input, shape index: {}]   ;;  %s4294_s8 = inlined_call_operand.vmem [shape: f32[1,128], index: 8, kind: input, shape index: {}]   ;;  %s4295_s9 = inlined_call_operand.vmem [shape: f32[1,128], index: 9, kind: input, shape index: {}]   ;;  %s4296_s10 = inlined_call_operand.vmem [shape: f32[1,128], index: 10, kind: input, shape index: {}]   ;;  %s4297_s11 = inlined_call_operand.hbm [shape: bf16[128,128], index: 11, kind: input, shape index: {}]   ;;  %s4298_s12 = inlined_call_operand.vmem [shape: f32[1,128], index: 12, kind: input, shape index: {}]   ;;  %s4299_s13 = inlined_call_operand.hbm [shape: bf16[128,128], index: 13, kind: input, shape index: {}]   ;;  %s4300_s14 = inlined_call_operand.vmem [shape: f32[1,128], index: 14, kind: input, shape index: {}]   ;;  %s4301_s15 = inlined_call_operand.vmem [shape: f32[1,128], index: 15, kind: input, shape index: {}]   ;;  %s4302_s16 = inlined_call_operand.vmem [shape: f32[1,128], index: 16, kind: input, shape index: {}]   ;;  %s4303_s17 = inlined_call_operand.hbm [shape: f32[2,8,128], index: 17, kind: output, shape index: {}]  }
   0x1   :  { %4313 = sst [smem:[#allocation21_spill]] %s4286_s0 }
   0x2   :  { %4314 = sst [smem:[#allocation22_spill]] %s4287_s1 }
   0x3   :  { %4315 = sst [smem:[#allocation23_spill]] %s4288_s2 }
   0x4   :  { %4316 = sst [smem:[#allocation24_spill]] %s4291_s5 }
   0x5   :  { %4317 = sst [smem:[#allocation25_spill]] %s4294_s8 }
   0x6   :  { %4318 = sst [smem:[#allocation26_spill]] %s4295_s9 }
   0x7   :  { %4319 = sst [smem:[#allocation27_spill]] %s4296_s10 }
   0x8   :  { %4320 = sst [smem:[#allocation28_spill]] %s4298_s12 }
   0x9   :  { %4321 = sst [smem:[#allocation29_spill]] %s4300_s14 }
   0xa   :  { %4322 = sst [smem:[#allocation30_spill]] %s4301_s15 }
   0xb   :  { %4323 = sst [smem:[#allocation31_spill]] %s4302_s16 }
   0xc   :  { %4324 = sst [smem:[#allocation32_spill]] %s4303_s17 }
   0xd   :  { %22 = vsyncpa [#allocation4], 0 }
   0xe   :  { %24 = vsyncpa [#allocation4 + $0x1], 0 }
   0xf   :  { %25 = vsyncpa [#allocation7], 0 }
  0x10   :  { %26 = vsyncpa [#allocation10], 0 }
  0x11   :  { %27 = vsyncpa [#allocation13], 0 }
  0x12   :  { %28 = vsyncpa [#allocation5], 0 }
  0x13   :  { %30 = vsyncpa [#allocation5 + $0x1], 0  ;;  %s3809_s24 = smov 0   ;;  %s3811_s25 = smov 0  }
  0x14   :  { %s3813_s26 = smov 0   ;;  %s3815_s27 = smov 0  }
  0x15 LB: > { %s3704_s28 = smov [#allocation6]   ;;  %s3830_s0 = sadd.s32 4294967295, %s3702_s27   ;;  %s3702_s27 = sphi %s3815_s27, %s4361_s27   ;;  %s3698_s26 = sphi %s3813_s26, %s4360_s26   ;;  %s3694_s25 = sphi %s3811_s25, %s4359_s25   ;;  %s3690_s24 = sphi %s3809_s24, %s4358_s24  }
  0x16   : > { %s441_s29 = sshll.u32 %s3704_s28, 4  ;;  %p2746_p0 = scmp.ge.s32.totalorder %s3702_s27, 1  ;;  %s3835_s29 = int_to_ptr.vmem [resolvable:$true] %s441_s29 }
  0x17   : > { %p4307_p1 = scmp.eq.s32.totalorder %s3830_s0, 0  ;;  %p429_p2 = scmp.lt.s32.totalorder %s3702_s27, 3 }
  0x18   : > { %s3705_s18 = smov [#allocation9]   ;;  %s3706_s20 = smov [#allocation12]  }
  0x19   : > { %p3837_p3 = pnand %p2746_p0, %p429_p2  ;;  %s473_s19 = sshll.u32 %s3705_s18, 4  ;;  %s3850_s19 = int_to_ptr.vmem [resolvable:$true] %s473_s19 }
  0x1a   : > { %s3852_s21 = sshll.u32 %s3706_s20, 4  ;;  %s4327_s28 = sld [smem:[#allocation22_spill]]  ;;  %s512_s21 = int_to_ptr.vmem [resolvable:$true] %s3852_s21 }
  0x1b   : > { %s4325_s30 = scalar_select %p3837_p3, 1, 0 }
  0x1c   : > { %p3123_p5 = pneg %p3837_p3 }
  0x1e   : > { %p3846_p6 = pnand %p3123_p5, %p4307_p1 }
  0x20   : > { %s3426_s17 = scalar_lea.hbm %s4327_s28, 4096  ;;  %p3862_p8 = pneg %p3846_p6 }
  0x21   : > { %p3427_p7 = scmp.ne.s32.totalorder %s4327_s28, %s3426_s17  ;;  %p3433_p11 = scmp.lt.u32.totalorder %s3426_s17, %s4327_s28 }
  0x23   : > { %p3429_p9 = pnand %p3862_p8, %p3427_p7 }
  0x25   : > { %p3430_p10 = pneg %p3429_p9 }
  0x27   : > { %p3435_p12 = pnand %p3433_p11, %p3430_p10 }
  0x29   : > { %3438 = shalt.err (!%p3435_p12)
}
  0x2a   : > { %s3439_s15 = scalar_lea.vmem %s3835_s29, 4096  ;;  %p3447_p5 = scmp.lt.s32.totalorder %s3835_s29, %s3835_s29 }
  0x2b   : > { %p3440_p13 = scmp.ne.s32.totalorder %s3835_s29, %s3439_s15  ;;  %p3448_p4 = scmp.lt.s32.totalorder %s3439_s15, %s3439_s15 }
  0x2d   : > { %p3442_p0 = pnand %p3440_p13, %p3862_p8  ;;  %p3449_p7 = por %p3448_p4, %p3447_p5 }
  0x2f   : > { %p3443_p2 = pneg %p3442_p0 }
  0x31   : > { %p3450_p9 = pnand %p3449_p7, %p3443_p2 }
  0x33   : > { %3453 = shalt.err (!%p3450_p9)
}
  0x34   : > { %s4309_s16 = smov 256   ;;  %s4310_s14 = smov 16  }
  0x35   : > { %3126 = dma.hbm_to_vmem [thread:$0]  (!%p3846_p6), %s4327_s28, 4096, %s3835_s29, [#allocation7], %s4309_s16, %s4309_s16, %s4310_s14  }
  0x36   : > { %s4329_s5 = sld [smem:[#allocation24_spill]] }
  0x3c   : > { %s3454_s15 = scalar_lea.hbm %s4329_s5, 4096 }
  0x3d   : > { %p3455_p4 = scmp.ne.s32.totalorder %s4329_s5, %s3454_s15  ;;  %p3461_p12 = scmp.lt.u32.totalorder %s3454_s15, %s4329_s5 }
  0x3f   : > { %p3457_p10 = pnand %p3455_p4, %p3862_p8 }
  0x41   : > { %p3458_p11 = pneg %p3457_p10 }
  0x43   : > { %p3463_p13 = pnand %p3461_p12, %p3458_p11 }
  0x45   : > { %3466 = shalt.err (!%p3463_p13)
}
  0x46   : > { %s3467_s29 = scalar_lea.vmem %s3850_s19, 4096  ;;  %p3475_p7 = scmp.lt.s32.totalorder %s3850_s19, %s3850_s19 }
  0x47   : > { %p3468_p0 = scmp.ne.s32.totalorder %s3850_s19, %s3467_s29  ;;  %p3476_p9 = scmp.lt.s32.totalorder %s3467_s29, %s3467_s29 }
  0x49   : > { %p3470_p2 = pnand %p3468_p0, %p3862_p8  ;;  %p3477_p4 = por %p3476_p9, %p3475_p7 }
  0x4b   : > { %p3471_p5 = pneg %p3470_p2 }
  0x4d   : > { %p3478_p10 = pnand %p3477_p4, %p3471_p5 }
  0x4f   : > { %3481 = shalt.err (!%p3478_p10)
}
  0x50   : > { %3132 = dma.hbm_to_vmem [thread:$0]  (!%p3846_p6), %s4329_s5, 4096, %s3850_s19, [#allocation10], %s4309_s16, %s4309_s16, %s4310_s14  }
  0x51   : > { %s3482_s17 = scalar_lea.hbm %s4297_s11, 1024 }
  0x52   : > { %p3483_p11 = scmp.ne.s32.totalorder %s4297_s11, %s3482_s17  ;;  %p3489_p0 = scmp.lt.u32.totalorder %s3482_s17, %s4297_s11 }
  0x54   : > { %p3485_p12 = pnand %p3483_p11, %p3862_p8 }
  0x56   : > { %p3486_p13 = pneg %p3485_p12 }
  0x58   : > { %p3491_p2 = pnand %p3489_p0, %p3486_p13 }
  0x5a   : > { %3494 = shalt.err (!%p3491_p2)
}
  0x5b   : > { %s3495_s29 = scalar_lea.vmem %s512_s21, 1024  ;;  %p3503_p4 = scmp.lt.s32.totalorder %s512_s21, %s512_s21 }
  0x5c   : > { %p3496_p5 = scmp.ne.s32.totalorder %s512_s21, %s3495_s29  ;;  %p3504_p10 = scmp.lt.s32.totalorder %s3495_s29, %s3495_s29 }
  0x5e   : > { %p3498_p7 = pnand %p3496_p5, %p3862_p8  ;;  %p3505_p1 = por %p3504_p10, %p3503_p4 }
  0x60   : > { %p3499_p9 = pneg %p3498_p7 }
  0x62   : > { %p3506_p3 = pnand %p3505_p1, %p3499_p9 }
  0x64   : > { %3509 = shalt.err (!%p3506_p3)
}
  0x65   : > { %s3709_s19 = smov 64   ;;  %s3710_s8 = smov 4  }
  0x66   : > { %3138 = dma.hbm_to_vmem [thread:$0]  (!%p3846_p6), %s4297_s11, 1024, %s512_s21, [#allocation13], %s3709_s19, %s3709_s19, %s3710_s8  }
  0x67   : > { %s3711_s12 = smov [#allocation8]   ;;  %s3712_s22 = smov [#allocation11]  }
  0x68   : > { %s457_s17 = sshll.u32 %s3711_s12, 4  ;;  %s489_s23 = sshll.u32 %s3712_s22, 4  ;;  %s458_s17 = int_to_ptr.vmem [resolvable:$true] %s457_s17  ;;  %s490_s23 = int_to_ptr.vmem [resolvable:$true] %s489_s23 }
  0x69   : > { %s3510_s29 = scalar_lea.hbm %s4289_s3, 4096 }
  0x6a   : > { %p3511_p1 = scmp.ne.s32.totalorder %s4289_s3, %s3510_s29  ;;  %p3517_p12 = scmp.lt.u32.totalorder %s3510_s29, %s4289_s3 }
  0x6c   : > { %p3513_p3 = pnand %p3511_p1, %p3862_p8 }
  0x6e   : > { %p3514_p11 = pneg %p3513_p3 }
  0x70   : > { %p3519_p13 = pnand %p3517_p12, %p3514_p11 }
  0x72   : > { %3522 = shalt.err (!%p3519_p13)
}
  0x73   : > { %s3523_s21 = scalar_lea.vmem %s458_s17, 4096  ;;  %p3531_p7 = scmp.lt.s32.totalorder %s458_s17, %s458_s17 }
  0x74   : > { %p3524_p0 = scmp.ne.s32.totalorder %s458_s17, %s3523_s21  ;;  %p3532_p9 = scmp.lt.s32.totalorder %s3523_s21, %s3523_s21 }
  0x76   : > { %p3526_p2 = pnand %p3524_p0, %p3862_p8  ;;  %p3533_p4 = por %p3532_p9, %p3531_p7 }
  0x78   : > { %p3527_p5 = pneg %p3526_p2 }
  0x7a   : > { %p3534_p10 = pnand %p3533_p4, %p3527_p5 }
  0x7c   : > { %3537 = shalt.err (!%p3534_p10)
}
  0x7d   : > { %s4330_s16 = smov 16   ;;  %s4331_s14 = smov 256  }
  0x7e   : > { %3129 = dma.hbm_to_vmem [thread:$0]  (!%p3846_p6), %s4289_s3, 4096, %s458_s17, [#allocation7], %s4331_s14, %s4331_s14, %s4330_s16  }
  0x7f   : > { %s3538_s12 = scalar_lea.hbm %s4293_s7, 4096 }
  0x80   : > { %p3539_p1 = scmp.ne.s32.totalorder %s4293_s7, %s3538_s12  ;;  %p3545_p12 = scmp.lt.u32.totalorder %s3538_s12, %s4293_s7 }
  0x82   : > { %p3541_p3 = pnand %p3539_p1, %p3862_p8 }
  0x84   : > { %p3542_p11 = pneg %p3541_p3 }
  0x86   : > { %p3547_p13 = pnand %p3545_p12, %p3542_p11 }
  0x88   : > { %3550 = shalt.err (!%p3547_p13)
}
  0x89   : > { %s3551_s21 = scalar_lea.vmem %s490_s23, 4096  ;;  %p3559_p7 = scmp.lt.s32.totalorder %s490_s23, %s490_s23 }
  0x8a   : > { %p3552_p0 = scmp.ne.s32.totalorder %s490_s23, %s3551_s21  ;;  %p3560_p9 = scmp.lt.s32.totalorder %s3551_s21, %s3551_s21 }
  0x8c   : > { %p3554_p2 = pnand %p3552_p0, %p3862_p8  ;;  %p3561_p4 = por %p3560_p9, %p3559_p7 }
  0x8e   : > { %p3555_p5 = pneg %p3554_p2 }
  0x90   : > { %p3562_p10 = pnand %p3561_p4, %p3555_p5 }
  0x92   : > { %3565 = shalt.err (!%p3562_p10)
}
  0x93   : > { %3135 = dma.hbm_to_vmem [thread:$0]  (!%p3846_p6), %s4293_s7, 4096, %s490_s23, [#allocation10], %s3709_s19, %s3709_s19, %s3710_s8  }
  0x94   : > { %s3713_s14 = smov [#allocation14]   ;;  %s3566_s10 = scalar_lea.hbm %s4299_s13, 1024 }
  0x95   : > { %s527_s5 = sshll.u32 %s3713_s14, 4  ;;  %p3567_p1 = scmp.ne.s32.totalorder %s4299_s13, %s3566_s10  ;;  %s528_s5 = int_to_ptr.vmem [resolvable:$true] %s527_s5 }
  0x96   : > { %p3573_p12 = scmp.lt.u32.totalorder %s3566_s10, %s4299_s13 }
  0x97   : > { %p3569_p3 = pnand %p3567_p1, %p3862_p8 }
  0x99   : > { %p3570_p11 = pneg %p3569_p3 }
  0x9b   : > { %p3575_p13 = pnand %p3573_p12, %p3570_p11 }
  0x9d   : > { %3578 = shalt.err (!%p3575_p13)
}
  0x9e   : > { %s3579_s23 = scalar_lea.vmem %s528_s5, 1024  ;;  %p3587_p7 = scmp.lt.s32.totalorder %s528_s5, %s528_s5 }
  0x9f   : > { %p3580_p0 = scmp.ne.s32.totalorder %s528_s5, %s3579_s23  ;;  %p3588_p9 = scmp.lt.s32.totalorder %s3579_s23, %s3579_s23 }
  0xa1   : > { %p3582_p2 = pnand %p3580_p0, %p3862_p8  ;;  %p3589_p4 = por %p3588_p9, %p3587_p7 }
  0xa3   : > { %p3583_p5 = pneg %p3582_p2 }
  0xa5   : > { %p3590_p10 = pnand %p3589_p4, %p3583_p5 }
  0xa7   : > { %3593 = shalt.err (!%p3590_p10)
}
  0xa8   : > { %3141 = dma.hbm_to_vmem [thread:$0]  (!%p3846_p6), %s4299_s13, 1024, %s528_s5, [#allocation13], %s3709_s19, %s3709_s19, %s3710_s8  }
  0xa9   : > { %s2745_s1 = sadd.s32 4294967294, %s3702_s27   ;;  %s3999_s18 = sadd.s32 1, %s3702_s27  }
  0xaa   : > { %s40_s17 = ssub.s32 %s3702_s27, %s3999_s18  ;;  %s43_s16 = sadd.s32 1, %s3698_s26 }
  0xab   : > { %p41_p8 = scmp.eq.s32.totalorder %s40_s17, 0  ;;  %p50_p1 = scmp.ne.s32.totalorder %s3698_s26, %s3694_s25 }
  0xac   : > { %p51_p3 = scmp.eq.s32.totalorder %s3702_s27, 0  ;;  %p56_p11 = scmp.ne.s32.totalorder %s3694_s25, %s3690_s24 }
  0xad   : > { %s4010_s14 = scalar_select %p41_p8, %s3698_s26, %s43_s16  }
  0xae   : > { %p4012_p12 = por %p51_p3, %p50_p1  ;;  %p4333_p13 = scmp.eq.s32.totalorder %s3830_s0, 0 }
  0xaf   : > { %p416_p0 = scmp.eq.s32.totalorder %s3830_s0, 1  ;;  %p422_p2 = scmp.eq.s32.totalorder %s2745_s1, 1 }
  0xb0   : > { %p4018_p6 = por %p4333_p13, %p56_p11  ;;  %p3156_p5 = scmp.lt.s32.totalorder %s3702_s27, 2 }
  0xb1   : > { %s550_s8 = sand.u32 1, %s3698_s26   ;;  %p4025_p7 = por %p416_p0, %p50_p1 }
  0xb2   : > { %p4029_p9 = por %p422_p2, %p56_p11  ;;  %s2754_s10 = sshll.u32 %s550_s8, 3 }
  0xb3   : > { %s4335_s5 = scalar_select %p4025_p7, 1, 0 }
  0xb4   : > { %s4336_s9 = scalar_select %p4029_p9, 1, 0 }
  0xb5   : > { %s2755_s12 = sshll.u32 %s3702_s27, 7  ;;  %s4337_s15 = sld [smem:[#allocation21_spill]] }
  0xb6   : > { %s554_s29 = scalar_lea.vmem [#allocation3], %s2754_s10  ;;  %p4043_p4 = pnand %p3156_p5, %p4012_p12 }
  0xb7   : > { %s561_s21 = sshll.u32 %s554_s29, 4  ;;  %s551_s17 = scalar_lea.sflag [#allocation4], %s550_s8  ;;  %s4039_s21 = int_to_ptr.vmem [resolvable:$true] %s561_s21 }
  0xb8   : > { %p3596_p8 = pneg %p4043_p4 }
  0xbb   : > { %s4037_s23 = scalar_lea.hbm %s4337_s15, %s2755_s12  ;;  %s3599_s22 = scalar_lea.hbm %s4337_s15, 256 }
  0xbc   : > { %s3594_s16 = scalar_lea.hbm %s4037_s23, 128  ;;  %p3600_p11 = scmp.lt.u32.totalorder %s4037_s23, %s4337_s15 }
  0xbd   : > { %p3595_p10 = scmp.ne.s32.totalorder %s4037_s23, %s3594_s16  ;;  %p3601_p12 = scmp.lt.u32.totalorder %s3599_s22, %s3594_s16 }
  0xbe   : > { %p3603_p0 = scmp.lt.u32.totalorder %s3594_s16, %s4037_s23 }
  0xbf   : > { %p3597_p1 = pnand %p3596_p8, %p3595_p10  ;;  %p3602_p13 = por %p3601_p12, %p3600_p11 }
  0xc1   : > { %p3598_p3 = pneg %p3597_p1  ;;  %p3604_p2 = por %p3603_p0, %p3602_p13 }
  0xc3   : > { %p3605_p5 = pnand %p3604_p2, %p3598_p3 }
  0xc5   : > { %3608 = shalt.err (!%p3605_p5)
}
  0xc6   : > { %s3609_s8 = scalar_lea.vmem %s4039_s21, 128  ;;  %s3714_s29 = smov [#allocation3]  }
  0xc7   : > { %p3610_p10 = scmp.ne.s32.totalorder %s4039_s21, %s3609_s8  ;;  %s3614_s10 = sshll.u32 %s3714_s29, 4  ;;  %s3615_s10 = int_to_ptr.vmem [resolvable:$false] %s3614_s10 }
  0xc8   : > { %s3616_s12 = scalar_lea.vmem %s3615_s10, 256  ;;  %p3617_p7 = scmp.lt.s32.totalorder %s4039_s21, %s3615_s10 }
  0xc9   : > { %p3612_p1 = pnand %p3610_p10, %p3596_p8  ;;  %p3618_p11 = scmp.lt.s32.totalorder %s3616_s12, %s3609_s8 }
  0xcb   : > { %p3613_p9 = pneg %p3612_p1  ;;  %p3619_p12 = por %p3618_p11, %p3617_p7 }
  0xcd   : > { %p3620_p13 = pnand %p3619_p12, %p3613_p9 }
  0xcf   : > { %3623 = shalt.err (!%p3620_p13)
}
  0xd0   : > { %3145 = dma.hbm_to_vmem [thread:$0]  (!%p4043_p4), %s4037_s23, 128, %s4039_s21, %s551_s17  }
  0xd1   : > { %p4339_p3 = scmp.ne.s32.totalorder %s4325_s30, 0 }
  0xd2   : > { %s4075_s16 = sand.u32 (!%p4339_p3), 1, %s3694_s25  }
  0xd3   : > { %570 = sbr.rel (%p4339_p3) target bundleno = 2589 (0xa1d), region = 88  ;;  %s2757_s22 = sshll.u32 (!%p4339_p3), %s4075_s16, 3 }
  0xd4   : > { %s573_s28 = scalar_lea.sflag (!%p4339_p3), [#allocation4], %s4075_s16  ;;  %s4081_s20 = scalar_lea.vmem (!%p4339_p3), [#allocation3], %s2757_s22 }
  0xda   : > { %3669 = dma.done.wait (%p4018_p6), %s573_s28, 128  }
  0xdb   : > { %3671 = vsyncadd (%p4018_p6), %s573_s28, 4294967168  ;;  %p4340_p7 = scmp.eq.s32.totalorder %s3830_s0, 0 }
  0xdd   : > { %3673 = dma.done.wait (%p4340_p7), [#allocation7], 8192   ;;  %p4341_p9 = pmov %p4340_p7 }
  0xde   : > { %p4342_p4 = pmov %p4340_p7 }
  0xdf   : > { %3675 = vsyncadd (%p4341_p9), [#allocation7], 4294959104 }
  0xe0   : > { %3677 = dma.done.wait (%p4342_p4), [#allocation10], 8192   ;;  %p4343_p8 = pmov %p4342_p4 }
  0xe1   : > { %p4344_p0 = pmov %p4342_p4 }
  0xe2   : > { %3679 = vsyncadd (%p4343_p8), [#allocation10], 4294959104 }
  0xe3   : > { %3681 = dma.done.wait (%p4344_p0), [#allocation13], 2048   ;;  %p4345_p2 = pmov %p4344_p0 }
  0xe4   : > { %v3715_v0 = vmov 0   ;;  %v3209_v1 = vld [vmem:[#allocation6 + $0x4] ss:$16 sps:$4 sm:$0xff]   ;;  %v3211_v2 = vld [vmem:[#allocation6] ss:$16 sps:$4 sm:$0xff]   ;;  %vm3717_vm0 = vmmov 0  }
  0xe5   : > { %3683 = vsyncadd (%p4345_p2), [#allocation13], 4294965248  ;;  %905 = vmatprep.mubr.bf16.mxu0 %v3715_v0  ;;  %946 = vmatprep.mubr.bf16.mxu1 %v3715_v0  ;;  %v3212_v3 = vld [vmem:[#allocation6 + $0x24] ss:$16 sps:$4 sm:$0xff]   ;;  %v3214_v4 = vld [vmem:[#allocation6 + $0x20] ss:$16 sps:$4 sm:$0xff]  }
  0xe6   : > { %873 = vmatprep.subr.bf16.mxu0 %v3209_v1  ;;  %v3215_v5 = vld [vmem:[#allocation6 + $0x44] ss:$16 sps:$4 sm:$0xff]   ;;  %v3221_v6 = vld [vmem:[#allocation6 + $0xc] ss:$16 sps:$4 sm:$0xff]   ;;  %v3223_v7 = vld [vmem:[#allocation6 + $0x8] ss:$16 sps:$4 sm:$0xff]  }
  0xe7   : > { %874 = vmatpush1.bf16.msra.mxu0 %v3211_v2  ;;  %v3217_v8 = vld [vmem:[#allocation6 + $0x40] ss:$16 sps:$4 sm:$0xff]   ;;  %v3218_v9 = vld [vmem:[#allocation6 + $0x64] ss:$16 sps:$4 sm:$0xff]   ;;  %914 = vmatprep.subr.bf16.mxu1 %v3221_v6  ;;  %v3227_v10 = vld [vmem:[#allocation6 + $0x2c] ss:$16 sps:$4 sm:$0xff]  }
  0xe8   : > { %875 = vmatprep.subr.bf16.mxu0 %v3212_v3  ;;  %915 = vmatpush1.bf16.msra.mxu1 %v3223_v7  ;;  %v3229_v11 = vld [vmem:[#allocation6 + $0x28] ss:$16 sps:$4 sm:$0xff]   ;;  %v3220_v12 = vld [vmem:[#allocation6 + $0x60] ss:$16 sps:$4 sm:$0xff]   ;;  %v3233_v13 = vld [vmem:[#allocation6 + $0x4c] ss:$16 sps:$4 sm:$0xff]  }
  0xe9   : > { %916 = vmatprep.subr.bf16.mxu1 %v3227_v10  ;;  %v3224_v14 = vld [vmem:[#allocation6 + $0x84] ss:$16 sps:$4 sm:$0xff]   ;;  %v3235_v15 = vld [vmem:[#allocation6 + $0x48] ss:$16 sps:$4 sm:$0xff]   ;;  %v3239_v16 = vld [vmem:[#allocation6 + $0x6c] ss:$16 sps:$4 sm:$0xff]  }
  0xea   : > { %v3226_v17 = vld [vmem:[#allocation6 + $0x80] ss:$16 sps:$4 sm:$0xff]   ;;  %v3230_v18 = vld [vmem:[#allocation6 + $0xa4] ss:$16 sps:$4 sm:$0xff]   ;;  %v3241_v19 = vld [vmem:[#allocation6 + $0x68] ss:$16 sps:$4 sm:$0xff]  }
  0xeb   : > { %876 = vmatpush1.bf16.msra.mxu0 %v3214_v4  ;;  %v3245_v20 = vld [vmem:[#allocation6 + $0x8c] ss:$16 sps:$4 sm:$0xff]   ;;  %v3232_v21 = vld [vmem:[#allocation6 + $0xa0] ss:$16 sps:$4 sm:$0xff]   ;;  %v3236_v22 = vld [vmem:[#allocation6 + $0xc4] ss:$16 sps:$4 sm:$0xff]  }
  0xec   : > { %877 = vmatprep.subr.bf16.mxu0 %v3215_v5  ;;  %917 = vmatpush1.bf16.msra.mxu1 %v3229_v11  ;;  %v3247_v23 = vld [vmem:[#allocation6 + $0x88] ss:$16 sps:$4 sm:$0xff]   ;;  %v3251_v24 = vld [vmem:[#allocation6 + $0xac] ss:$16 sps:$4 sm:$0xff]   ;;  %v3238_v25 = vld [vmem:[#allocation6 + $0xc0] ss:$16 sps:$4 sm:$0xff]  }
  0xed   : > { %918 = vmatprep.subr.bf16.mxu1 %v3233_v13  ;;  %v3242_v26 = vld [vmem:[#allocation6 + $0xe4] ss:$16 sps:$4 sm:$0xff]   ;;  %v3253_v27 = vld [vmem:[#allocation6 + $0xa8] ss:$16 sps:$4 sm:$0xff]   ;;  %v3244_v28 = vld [vmem:[#allocation6 + $0xe0] ss:$16 sps:$4 sm:$0xff]  }
  0xee   : > { %v3257_v29 = vld [vmem:[#allocation6 + $0xcc] ss:$16 sps:$4 sm:$0xff]   ;;  %v3250_v31 = vld [vmem:[#allocation8 + $0x4] ss:$16 sps:$4 sm:$0xff]   ;;  %v3259_v32 = vld [vmem:[#allocation6 + $0xc8] ss:$16 sps:$4 sm:$0xff]  }
  0xef   : > { %878 = vmatpush1.bf16.msra.mxu0 %v3217_v8  ;;  %v657_v30 = vld [vmem:[%s4081_s20] sm:$0xff]  ;;  %s4346_s2 = sld [smem:[#allocation23_spill]]  ;;  %vm1615_vm1 = vcmask 1043456   ;;  %vm1599_vm2 = vcmask 64512   ;;  %s4347_s10 = sld [smem:[#allocation25_spill]] }
  0xf0   : > { %879 = vmatprep.subr.bf16.mxu0 %v3218_v9  ;;  %919 = vmatpush1.bf16.msra.mxu1 %v3235_v15  ;;  %v4102_v33 = vpack.c.bf16 %v657_v30, %v657_v30  ;;  %v3263_v34 = vld [vmem:[#allocation6 + $0xec] ss:$16 sps:$4 sm:$0xff]   ;;  %v3248_v35 = vld [vmem:[#allocation8] ss:$16 sps:$4 sm:$0xff]   ;;  %v3256_v36 = vld [vmem:[#allocation8 + $0x24] ss:$16 sps:$4 sm:$0xff]  }
  0xf1   : > { %920 = vmatprep.subr.bf16.mxu1 %v3239_v16  ;;  %v3265_v37 = vld [vmem:[#allocation6 + $0xe8] ss:$16 sps:$4 sm:$0xff]   ;;  %v3271_v38 = vld [vmem:[#allocation8 + $0xc] ss:$16 sps:$4 sm:$0xff]   ;;  %v3254_v39 = vld [vmem:[#allocation8 + $0x20] ss:$16 sps:$4 sm:$0xff]  }
  0xf2   : > { %v3262_v40 = vld [vmem:[#allocation8 + $0x44] ss:$16 sps:$4 sm:$0xff]   ;;  %v3269_v41 = vld [vmem:[#allocation8 + $0x8] ss:$16 sps:$4 sm:$0xff]   ;;  %v3277_v42 = vld [vmem:[#allocation8 + $0x2c] ss:$16 sps:$4 sm:$0xff]  }
  0xf3   : > { %880 = vmatpush1.bf16.msra.mxu0 %v3220_v12  ;;  %v3260_v43 = vld [vmem:[#allocation8 + $0x40] ss:$16 sps:$4 sm:$0xff]   ;;  %v3268_v44 = vld [vmem:[#allocation8 + $0x64] ss:$16 sps:$4 sm:$0xff]   ;;  %v3275_v45 = vld [vmem:[#allocation8 + $0x28] ss:$16 sps:$4 sm:$0xff]  }
  0xf4   : > { %881 = vmatprep.subr.bf16.mxu0 %v3224_v14  ;;  %921 = vmatpush1.bf16.msra.mxu1 %v3241_v19  ;;  %v3266_v46 = vld [vmem:[#allocation8 + $0x60] ss:$16 sps:$4 sm:$0xff]   ;;  %v3283_v47 = vld [vmem:[#allocation8 + $0x4c] ss:$16 sps:$4 sm:$0xff]   ;;  %v3274_v48 = vld [vmem:[#allocation8 + $0x84] ss:$16 sps:$4 sm:$0xff]  }
  0xf5   : > { %922 = vmatprep.subr.bf16.mxu1 %v3245_v20  ;;  %v3281_v49 = vld [vmem:[#allocation8 + $0x48] ss:$16 sps:$4 sm:$0xff]   ;;  %v3289_v50 = vld [vmem:[#allocation8 + $0x6c] ss:$16 sps:$4 sm:$0xff]   ;;  %v3272_v51 = vld [vmem:[#allocation8 + $0x80] ss:$16 sps:$4 sm:$0xff]  }
  0xf6   : > { %v3280_v52 = vld [vmem:[#allocation8 + $0xa4] ss:$16 sps:$4 sm:$0xff]   ;;  %v3287_v53 = vld [vmem:[#allocation8 + $0x68] ss:$16 sps:$4 sm:$0xff]   ;;  %v3295_v54 = vld [vmem:[#allocation8 + $0x8c] ss:$16 sps:$4 sm:$0xff]  }
  0xf7   : > { %882 = vmatpush1.bf16.msra.mxu0 %v3226_v17  ;;  %v3278_v55 = vld [vmem:[#allocation8 + $0xa0] ss:$16 sps:$4 sm:$0xff]   ;;  %v3286_v56 = vld [vmem:[#allocation8 + $0xc4] ss:$16 sps:$4 sm:$0xff]   ;;  %v3293_v57 = vld [vmem:[#allocation8 + $0x88] ss:$16 sps:$4 sm:$0xff]  }
  0xf8   : > { %883 = vmatprep.subr.bf16.mxu0 %v3230_v18  ;;  %923 = vmatpush1.bf16.msra.mxu1 %v3247_v23  ;;  %v3298_v58 = vld [vmem:[#allocation8 + $0xac] ss:$16 sps:$4 sm:$0xff]   ;;  %v3284_v59 = vld [vmem:[#allocation8 + $0xc0] ss:$16 sps:$4 sm:$0xff]   ;;  %v3292_v60 = vld [vmem:[#allocation8 + $0xe4] ss:$16 sps:$4 sm:$0xff]  }
  0xf9   : > { %924 = vmatprep.subr.bf16.mxu1 %v3251_v24  ;;  %v3296_v61 = vld [vmem:[#allocation8 + $0xa8] ss:$16 sps:$4 sm:$0xff]   ;;  %v3301_v62 = vld [vmem:[#allocation8 + $0xcc] ss:$16 sps:$4 sm:$0xff]   ;;  %v3290_v63 = vld [vmem:[#allocation8 + $0xe0] ss:$16 sps:$4 sm:$0xff]  }
  0xfa   : > { %v3307_v1 = vld [vmem:[#allocation9 + $0x4] ss:$16 sps:$4 sm:$0xff]   ;;  %v3299_v2 = vld [vmem:[#allocation8 + $0xc8] ss:$16 sps:$4 sm:$0xff]   ;;  %v3304_v3 = vld [vmem:[#allocation8 + $0xec] ss:$16 sps:$4 sm:$0xff]  }
  0xfb   : > { %884 = vmatpush1.bf16.msra.mxu0 %v3232_v21  ;;  %v3305_v4 = vld [vmem:[#allocation9] ss:$16 sps:$4 sm:$0xff]   ;;  %v3302_v5 = vld [vmem:[#allocation8 + $0xe8] ss:$16 sps:$4 sm:$0xff]   ;;  %v3310_v6 = vld [vmem:[#allocation9 + $0x24] ss:$16 sps:$4 sm:$0xff]  }
  0xfc   : > { %885 = vmatprep.subr.bf16.mxu0 %v3236_v22  ;;  %925 = vmatpush1.bf16.msra.mxu1 %v3253_v27  ;;  %v3308_v7 = vld [vmem:[#allocation9 + $0x20] ss:$16 sps:$4 sm:$0xff]   ;;  %v3313_v9 = vld [vmem:[#allocation9 + $0x44] ss:$16 sps:$4 sm:$0xff]   ;;  %v3716_v19 = vmov 0.0   ;;  %s4349_s23 = sld [smem:[#allocation27_spill]] }
  0xfd   : > { %926 = vmatprep.subr.bf16.mxu1 %v3257_v29  ;;  %v3311_v8 = vld [vmem:[#allocation9 + $0x40] ss:$16 sps:$4 sm:$0xff]   ;;  %v3316_v10 = vld [vmem:[#allocation9 + $0x64] ss:$16 sps:$4 sm:$0xff]   ;;  %v3329_v20 = vld [vmem:[#allocation9 + $0x8] ss:$16 sps:$4 sm:$0xff]  }
  0xfe   : > { %v3314_v11 = vld [vmem:[#allocation9 + $0x60] ss:$16 sps:$4 sm:$0xff]   ;;  %v3319_v12 = vld [vmem:[#allocation9 + $0x84] ss:$16 sps:$4 sm:$0xff]   ;;  %v3331_v21 = vld [vmem:[#allocation9 + $0xc] ss:$16 sps:$4 sm:$0xff]  }
  0xff   : > { %886 = vmatpush1.bf16.msra.mxu0 %v3238_v25  ;;  %v3317_v13 = vld [vmem:[#allocation9 + $0x80] ss:$16 sps:$4 sm:$0xff]   ;;  %v3322_v14 = vld [vmem:[#allocation9 + $0xa4] ss:$16 sps:$4 sm:$0xff]   ;;  %v3334_v22 = vld [vmem:[#allocation9 + $0x2c] ss:$16 sps:$4 sm:$0xff]  }
 0x100   : > { %887 = vmatprep.subr.bf16.mxu0 %v3242_v26  ;;  %927 = vmatpush1.bf16.msra.mxu1 %v3259_v32  ;;  %v3320_v15 = vld [vmem:[#allocation9 + $0xa0] ss:$16 sps:$4 sm:$0xff]   ;;  %v3328_v17 = vld [vmem:[#allocation9 + $0xe4] ss:$16 sps:$4 sm:$0xff]   ;;  %v3332_v23 = vld [vmem:[#allocation9 + $0x28] ss:$16 sps:$4 sm:$0xff]  }
 0x101   : > { %928 = vmatprep.subr.bf16.mxu1 %v3263_v34  ;;  %v3323_v16 = vld [vmem:[#allocation9 + $0xc0] ss:$16 sps:$4 sm:$0xff]   ;;  %v3337_v24 = vld [vmem:[#allocation9 + $0x4c] ss:$16 sps:$4 sm:$0xff]   ;;  %v3335_v25 = vld [vmem:[#allocation9 + $0x48] ss:$16 sps:$4 sm:$0xff]  }
 0x102   : > { %v3326_v18 = vld [vmem:[#allocation9 + $0xe0] ss:$16 sps:$4 sm:$0xff]   ;;  %v3340_v26 = vld [vmem:[#allocation9 + $0x6c] ss:$16 sps:$4 sm:$0xff]   ;;  %v3338_v27 = vld [vmem:[#allocation9 + $0x68] ss:$16 sps:$4 sm:$0xff]  }
 0x103   : > { %888 = vmatpush1.bf16.msra.mxu0 %v3244_v28  ;;  %v3343_v28 = vld [vmem:[#allocation9 + $0x8c] ss:$16 sps:$4 sm:$0xff]   ;;  %v3341_v29 = vld [vmem:[#allocation9 + $0x88] ss:$16 sps:$4 sm:$0xff]   ;;  %s4350_s17 = sld [smem:[#allocation28_spill]]  ;;  %s2926_s21 = sshll.u32 %s3830_s0, 7 }
 0x104   : > { %1173 = vmatprep.subr.bf16.mxu0 %v3250_v31  ;;  %929 = vmatpush1.bf16.msra.mxu1 %v3265_v37  ;;  %v3346_v30 = vld [vmem:[#allocation9 + $0xac] ss:$16 sps:$4 sm:$0xff]   ;;  %v3344_v31 = vld [vmem:[#allocation9 + $0xa8] ss:$16 sps:$4 sm:$0xff]   ;;  %s650_s1 = scalar_lea.vmem [#allocation15], %s2757_s22  ;;  %s2605_s12 = scalar_lea.sflag [#allocation5], %s4075_s16 }
 0x105   : > { %1214 = vmatprep.subr.bf16.mxu1 %v3271_v38  ;;  %v3347_v32 = vld [vmem:[#allocation9 + $0xc8] ss:$16 sps:$4 sm:$0xff]   ;;  %v3349_v34 = vld [vmem:[#allocation9 + $0xcc] ss:$16 sps:$4 sm:$0xff]   ;;  %p4355_p5 = scmp.ne.s32.totalorder %s4335_s5, 0  ;;  %s3718_s0 = smov [#allocation15]  }
 0x106   : > { %906 = vmatmul.mubr.bf16.vlgmr.msra.gmra.mrb[0].mxu0 %v4102_v33  ;;  %s3628_s22 = sshll.u32 %s3718_s0, 4  ;;  %s3629_s22 = int_to_ptr.vmem [resolvable:$false] %s3628_s22 }
 0x107   : > { %1174 = vmatpush1.bf16.msra.mxu0 %v3248_v35  ;;  %1205 = vmatprep.mubr.bf16.mxu0 %v3715_v0  ;;  %v3352_v35 = vld [vmem:[#allocation9 + $0xec] ss:$16 sps:$4 sm:$0xff]  }
 0x108   : > { %1175 = vmatprep.subr.bf16.mxu0 %v3256_v36  ;;  %947 = vmatmul.mubr.bf16.vlgmr.msra.gmra.mrb[0].mxu1 %v4102_v33  ;;  %v3350_v36 = vld [vmem:[#allocation9 + $0xe8] ss:$16 sps:$4 sm:$0xff]  }
 0x109   : > { %1215 = vmatpush1.bf16.msra.mxu1 %v3269_v41  ;;  %1246 = vmatprep.mubr.bf16.mxu1 %v3715_v0 }
 0x10a   : > { %1216 = vmatprep.subr.bf16.mxu1 %v3277_v42 }
 0x10b   : > { %1176 = vmatpush1.bf16.msra.mxu0 %v3254_v39 }
 0x10c   : > { %1177 = vmatprep.subr.bf16.mxu0 %v3262_v40 }
 0x10d   : > { %1217 = vmatpush1.bf16.msra.mxu1 %v3275_v45  ;;  %v652_v45 = vlaneseq }
 0x10e   : > { %1218 = vmatprep.subr.bf16.mxu1 %v3283_v47  ;;  %v991_v47 = vld [vmem:[%s4290_s4] sm:$0xf] }
 0x10f   : > { %1178 = vmatpush1.bf16.msra.mxu0 %v3260_v43 }
 0x110   : > { %1179 = vmatprep.subr.bf16.mxu0 %v3268_v44 }
 0x111   : > { %1219 = vmatpush1.bf16.msra.mxu1 %v3281_v49 }
 0x112   : > { %1220 = vmatprep.subr.bf16.mxu1 %v3289_v50 }
 0x113   : > { %1180 = vmatpush1.bf16.msra.mxu0 %v3266_v46  ;;  %v694_v46 = vshrl.u32 %v652_v45, 7 }
 0x114   : > { %1181 = vmatprep.subr.bf16.mxu0 %v3274_v48 }
 0x115   : > { %1221 = vmatpush1.bf16.msra.mxu1 %v3287_v53  ;;  %v695_v48 = vsub.s32 0, %v694_v46 }
 0x116   : > { %1222 = vmatprep.subr.bf16.mxu1 %v3295_v54 }
 0x117   : > { %1182 = vmatpush1.bf16.msra.mxu0 %v3272_v51  ;;  %v996_v49 = vrot.slane %v991_v47, %v695_v48  ;;  %v4127_v51 = vsub.s32 1, %v694_v46 }
 0x118   : > { %1183 = vmatprep.subr.bf16.mxu0 %v3280_v52 }
 0x119   : > { %1223 = vmatpush1.bf16.msra.mxu1 %v3293_v57  ;;  %v1000_v57 = vrot.slane %v991_v47, %v4127_v51 }
 0x11a   : > { %1224 = vmatprep.subr.bf16.mxu1 %v3298_v58 }
 0x11b   : > { %1184 = vmatpush1.bf16.msra.mxu0 %v3278_v55 }
 0x11c   : > { %1185 = vmatprep.subr.bf16.mxu0 %v3286_v56 }
 0x11d   : > { %1225 = vmatpush1.bf16.msra.mxu1 %v3296_v61  ;;  %v4131_v61 = vsub.s32 2, %v694_v46 }
 0x11e   : > { %1226 = vmatprep.subr.bf16.mxu1 %v3301_v62 }
 0x11f   : > { %1186 = vmatpush1.bf16.msra.mxu0 %v3284_v59 }
 0x120   : > { %1187 = vmatprep.subr.bf16.mxu0 %v3292_v60 }
 0x121   : > { %1227 = vmatpush1.bf16.msra.mxu1 %v3299_v2  ;;  %v1004_v2 = vrot.slane %v991_v47, %v4131_v61 }
 0x122   : > { %1228 = vmatprep.subr.bf16.mxu1 %v3304_v3 }
 0x123   : > { %1188 = vmatpush1.bf16.msra.mxu0 %v3290_v63 }
 0x124   : > { %1473 = vmatprep.subr.bf16.mxu0 %v3307_v1 }
 0x125   : > { %1229 = vmatpush1.bf16.msra.mxu1 %v3302_v5 }
 0x126   : > { %1206 = vmatmul.mubr.bf16.vlgmr.msra.gmra.mrb[4].mxu0 %v4102_v33  ;;  %1514 = vmatprep.subr.bf16.mxu1 %v3331_v21  ;;  %v4151_v21 = vld [vmem:[%s4292_s6] sm:$0xf] }
 0x127   : > { %1474 = vmatpush1.bf16.msra.mxu0 %v3305_v4  ;;  %1505 = vmatprep.mubr.bf16.mxu0 %v3715_v0 }
 0x128   : > { %1247 = vmatmul.mubr.bf16.vlgmr.msra.gmra.mrb[4].mxu1 %v4102_v33  ;;  %1475 = vmatprep.subr.bf16.mxu0 %v3310_v6 }
 0x129   : > { %1546 = vmatprep.mubr.bf16.mxu1 %v3715_v0  ;;  %v3325_v0 = vld [vmem:[#allocation9 + $0xc4] ss:$16 sps:$4 sm:$0xff]   ;;  %1515 = vmatpush1.bf16.msra.mxu1 %v3329_v20 }
 0x12a   : > { %1516 = vmatprep.subr.bf16.mxu1 %v3334_v22  ;;  %v1296_v22 = vrot.slane %v4151_v21, %v695_v48 }
 0x12b   : > { %1476 = vmatpush1.bf16.msra.mxu0 %v3308_v7 }
 0x12c   : > { %1477 = vmatprep.subr.bf16.mxu0 %v3313_v9  ;;  %v4138_v9 = vsub.s32 3, %v694_v46 }
 0x12d   : > { %1517 = vmatpush1.bf16.msra.mxu1 %v3332_v23 }
 0x12e   : > { %1518 = vmatprep.subr.bf16.mxu1 %v3337_v24 }
 0x12f   : > { %1478 = vmatpush1.bf16.msra.mxu0 %v3311_v8 }
 0x130   : > { %1479 = vmatprep.subr.bf16.mxu0 %v3316_v10 }
 0x131   : > { %1519 = vmatpush1.bf16.msra.mxu1 %v3335_v25 }
 0x132   : > { %1520 = vmatprep.subr.bf16.mxu1 %v3340_v26 }
 0x133   : > { %1480 = vmatpush1.bf16.msra.mxu0 %v3314_v11 }
 0x134   : > { %1481 = vmatprep.subr.bf16.mxu0 %v3319_v12 }
 0x135   : > { %1521 = vmatpush1.bf16.msra.mxu1 %v3338_v27 }
 0x136   : > { %1522 = vmatprep.subr.bf16.mxu1 %v3343_v28 }
 0x137   : > { %1482 = vmatpush1.bf16.msra.mxu0 %v3317_v13  ;;  %v1008_v13 = vrot.slane %v991_v47, %v4138_v9 }
 0x138   : > { %1483 = vmatprep.subr.bf16.mxu0 %v3322_v14 }
 0x139   : > { %1523 = vmatpush1.bf16.msra.mxu1 %v3341_v29 }
 0x13a   : > { %1524 = vmatprep.subr.bf16.mxu1 %v3346_v30 }
 0x13b   : > { %1484 = vmatpush1.bf16.msra.mxu0 %v3320_v15 }
 0x13c   : > { %1485 = vmatprep.subr.bf16.mxu0 %v3325_v0 }
 0x13d   : > { %1525 = vmatpush1.bf16.msra.mxu1 %v3344_v31 }
 0x13e   : > { %1526 = vmatprep.subr.bf16.mxu1 %v3349_v34 }
 0x13f   : > { %1486 = vmatpush1.bf16.msra.mxu0 %v3323_v16 }
 0x140   : > { %1487 = vmatprep.subr.bf16.mxu0 %v3328_v17 }
 0x141   : > { %1527 = vmatpush1.bf16.msra.mxu1 %v3347_v32 }
 0x142   : > { %1528 = vmatprep.subr.bf16.mxu1 %v3352_v35 }
 0x143   : > { %1488 = vmatpush1.bf16.msra.mxu0 %v3326_v18 }
 0x144   : > { %3007 = vmatprep.subr.bf16.mxu0 %v3716_v19 }
 0x145   : > { %1529 = vmatpush1.bf16.msra.mxu1 %v3350_v36 }
 0x146   : > { %1506 = vmatmul.mubr.bf16.vlgmr.msra.gmra.mrb[8].mxu0 %v4102_v33  ;;  %3013 = vmatprep.subr.bf16.mxu1 %v3716_v19 }
 0x147   : > { %3009 = vmatprep.mubr.msk.bf16.mxu0 %vm3717_vm0, %v3716_v19 }
 0x148   : > { %1547 = vmatmul.mubr.bf16.vlgmr.msra.gmra.mrb[8].mxu1 %v4102_v33  ;;  %v691_v33 = vld [vmem:[%s4346_s2] sm:$0xf] }
 0x149   : > { %3015 = vmatprep.mubr.msk.bf16.mxu1 %vm3717_vm0, %v3716_v19  ;;  %v696_v54 = vrot.slane %v691_v33, %v695_v48  ;;  %v700_v5 = vrot.slane %v691_v33, %v4127_v51  ;;  %v704_v12 = vrot.slane %v691_v33, %v4131_v61  ;;  %v708_v16 = vrot.slane %v691_v33, %v4138_v9 }
 0x1d9   : > { %v907_v37 = vpop.f32.mrb[0].mxu0 }
 0x1da   : > { %v909_v38 = vpop.f32.mrb[1].mxu0  ;;  %v908_v59 = vadd.f32 %v907_v37, %v696_v54 }
 0x1db   : > { %v911_v39 = vpop.f32.mrb[2].mxu0  ;;  %v948_v41 = vpop.f32.mrb[0].mxu1  ;;  %v910_v8 = vadd.f32 %v909_v38, %v700_v5 }
 0x1dc   : > { %v912_v40 = vpop.f32.mrb[3].mxu0  ;;  %v950_v42 = vpop.f32.mrb[1].mxu1  ;;  %v955_v4 = vpack.c.bf16 %v908_v59, %v908_v59  ;;  %v949_v14 = vadd.f32 %v948_v41, %v704_v12 }
 0x1dd   : > { %v952_v43 = vpop.f32.mrb[2].mxu1  ;;  %v956_v11 = vpack.c.bf16 %v910_v8, %v910_v8  ;;  %v951_v18 = vadd.f32 %v950_v42, %v708_v16  ;;  %v3355_v16 = vld [vmem:[#allocation11 + $0x48] sm:$0xff]  }
 0x1de   : > { %v953_v44 = vpop.f32.mrb[3].mxu1  ;;  %v957_v0 = vpack.c.bf16 %v949_v14, %v949_v14 }
 0x1df   : > { %v958_v20 = vpack.c.bf16 %v951_v18, %v951_v18  ;;  %v3357_v18 = vld [vmem:[#allocation11 + $0x50] sm:$0xff]  }
 0x1f9   : > { %v1207_v50 = vpop.f32.mrb[4].mxu0 }
 0x1fa   : > { %v1208_v52 = vadd.f32 %v1207_v50, %v996_v49  ;;  %v1209_v53 = vpop.f32.mrb[5].mxu0 }
 0x1fb   : > { %v1211_v55 = vpop.f32.mrb[6].mxu0  ;;  %v1248_v60 = vpop.f32.mrb[4].mxu1  ;;  %v1210_v62 = vadd.f32 %v1209_v53, %v1000_v57 }
 0x1fc   : > { %v1255_v56 = vpack.c.bf16 %v1208_v52, %v1208_v52  ;;  %v1212_v58 = vpop.f32.mrb[7].mxu0  ;;  %v1250_v63 = vpop.f32.mrb[5].mxu1  ;;  %v1249_v7 = vadd.f32 %v1248_v60, %v1004_v2 }
 0x1fd   : > { %v1252_v1 = vpop.f32.mrb[6].mxu1  ;;  %v1256_v6 = vpack.c.bf16 %v1210_v62, %v1210_v62  ;;  %v1251_v15 = vadd.f32 %v1250_v63, %v1008_v13 }
 0x1fe   : > { %3008 = vmatpush3.bf16.xpose.msra.mxu0 %v1255_v56  ;;  %v1253_v3 = vpop.f32.mrb[7].mxu1  ;;  %v1257_v10 = vpack.c.bf16 %v1249_v7, %v1249_v7 }
 0x1ff   : > { %3019 = vmatprep.subr.bf16.mxu0 %v3716_v19  ;;  %v1258_v17 = vpack.c.bf16 %v1251_v15, %v1251_v15  ;;  %v3353_v15 = vld [vmem:[#allocation11 + $0x40] sm:$0xff]  }
 0x205   : > { %3010 = vmatmul.mubr.bf16.vlgmr.msra.gmra.mrb[12].mxu0 %v955_v4 }
 0x206   : > { %3020 = vmatpush3.bf16.xpose.msra.mxu0 %v1256_v6  ;;  %3021 = vmatprep.mubr.msk.bf16.mxu0 %vm3717_vm0, %v3716_v19 }
 0x207   : > { %3031 = vmatprep.subr.bf16.mxu0 %v3716_v19 }
 0x20d   : > { %3022 = vmatmul.mubr.bf16.vlgmr.msra.gmra.mrb[16].mxu0 %v956_v11 }
 0x20e   : > { %3032 = vmatpush3.bf16.xpose.msra.mxu0 %v1257_v10  ;;  %3033 = vmatprep.mubr.msk.bf16.mxu0 %vm3717_vm0, %v3716_v19 }
 0x20f   : > { %3043 = vmatprep.subr.bf16.mxu0 %v3716_v19 }
 0x215   : > { %3034 = vmatmul.mubr.bf16.vlgmr.msra.gmra.mrb[20].mxu0 %v957_v0  ;;  %v3354_v0 = vld [vmem:[#allocation11] sm:$0xff]  }
 0x216   : > { %3044 = vmatpush3.bf16.xpose.msra.mxu0 %v1258_v17  ;;  %3045 = vmatprep.mubr.msk.bf16.mxu0 %vm3717_vm0, %v3716_v19  ;;  %v3356_v17 = vld [vmem:[#allocation11 + $0x8] sm:$0xff]  }
 0x217   : > { %2945 = vmatprep.subr.bf16.mxu0 %v3353_v15 }
 0x219   : > { %v1507_v23 = vpop.f32.mrb[8].mxu0 }
 0x21a   : > { %v1508_v24 = vadd.f32 %v1507_v23, %v1296_v22  ;;  %v4154_v25 = vpop.f32.mrb[9].mxu0  ;;  %v1300_v23 = vrot.slane %v4151_v21, %v4127_v51 }
 0x21b   : > { %v1511_v26 = vpop.f32.mrb[10].mxu0  ;;  %v1548_v11 = vpop.f32.mrb[8].mxu1 }
 0x21c   : > { %v1555_v27 = vpack.c.bf16 %v1508_v24, %v1508_v24  ;;  %v1512_v28 = vpop.f32.mrb[11].mxu0  ;;  %v1550_v12 = vpop.f32.mrb[9].mxu1  ;;  %v1510_v24 = vadd.f32 %v4154_v25, %v1300_v23 }
 0x21d   : > { %3046 = vmatmul.mubr.bf16.vlgmr.msra.gmra.mrb[24].mxu0 %v958_v20  ;;  %v1552_v13 = vpop.f32.mrb[10].mxu1  ;;  %v3358_v20 = vld [vmem:[#allocation11 + $0x10] sm:$0xff]  }
 0x21e   : > { %v1617_v29 = vsel %vm1615_vm1, %v1555_v27, 0  ;;  %v1553_v14 = vpop.f32.mrb[11].mxu1  ;;  %2946 = vmatpush3.bf16.msra.mxu0 %v3354_v0  ;;  %v1304_v27 = vrot.slane %v4151_v21, %v4131_v61 }
 0x21f   : > { %3014 = vmatpush3.bf16.msra.mxu1 %v1617_v29  ;;  %2947 = vmatprep.subr.bf16.mxu0 %v3355_v16  ;;  %v1556_v29 = vpack.c.bf16 %v1510_v24, %v1510_v24 }
 0x220   : > { %3025 = vmatprep.subr.bf16.mxu1 %v3716_v19 }
 0x222   : > { %2948 = vmatpush3.bf16.msra.mxu0 %v3356_v17 }
 0x223   : > { %2949 = vmatprep.subr.bf16.mxu0 %v3357_v18 }
 0x226   : > { %2950 = vmatpush3.bf16.msra.mxu0 %v3358_v20 }
 0x2d8   : > { %v1593_v30 = vpop.f32.mrb[12].mxu0 }
 0x2d9   : > { %v3011_v31 = vpop.f32.mrb[13].mxu0  ;;  %v1600_v32 = vsel %vm1599_vm2, %v1593_v30, -inf }
 0x2da   : > { %1601 = vmax.xlane.f32.xlu0 %v1600_v32  ;;  %v1596_v34 = vpop.f32.mrb[14].mxu0  ;;  %v1549_v31 = vadd.f32 %v1548_v11, %v1304_v27  ;;  %v3385_v11 = vld [vmem:[#allocation11 + $0xf8] sm:$0xff]  }
 0x2db   : > { %v3012_v35 = vpop.f32.mrb[15].mxu0  ;;  %v1717_v34 = vsel %vm1615_vm1, %v1556_v29, 0 }
 0x2dc   : > { %v1557_v51 = vpack.c.bf16 %v1549_v31, %v1549_v31 }
 0x2e0   : > { %v1695_v36 = vpop.f32.mrb[16].mxu0 }
 0x2e1   : > { %v3023_v37 = vpop.f32.mrb[17].mxu0  ;;  %v1701_v38 = vsel %vm1599_vm2, %v1695_v36, -inf }
 0x2e2   : > { %1702 = vmax.xlane.f32.xlu0 %v1701_v38  ;;  %v1698_v39 = vpop.f32.mrb[18].mxu0  ;;  %v1817_v37 = vsel %vm1615_vm1, %v1557_v51, 0 }
 0x2e3   : > { %v3024_v40 = vpop.f32.mrb[19].mxu0 }
 0x2e8   : > { %v1795_v41 = vpop.f32.mrb[20].mxu0 }
 0x2e9   : > { %v3035_v42 = vpop.f32.mrb[21].mxu0  ;;  %v1801_v43 = vsel %vm1599_vm2, %v1795_v41, -inf }
 0x2ea   : > { %1802 = vmax.xlane.f32.xlu1 %v1801_v43  ;;  %v1798_v44 = vpop.f32.mrb[22].mxu0 }
 0x2eb   : > { %v3036_v46 = vpop.f32.mrb[23].mxu0 }
 0x2f0   : > { %v1895_v47 = vpop.f32.mrb[24].mxu0 }
 0x2f1   : > { %v3047_v48 = vpop.f32.mrb[25].mxu0  ;;  %v1901_v49 = vsel %vm1599_vm2, %v1895_v47, -inf }
 0x2f2   : > { %1902 = vmax.xlane.f32.xlu1 %v1901_v49  ;;  %v1898_v33 = vpop.f32.mrb[26].mxu0  ;;  %v3359_v48 = vld [vmem:[#allocation11 + $0x58] sm:$0xff]  }
 0x2f3   : > { %v3048_v50 = vpop.f32.mrb[27].mxu0  ;;  %v3360_v49 = vld [vmem:[#allocation11 + $0x18] sm:$0xff]   ;;  %2951 = vmatprep.subr.bf16.mxu0 %v3359_v48  ;;  %v3361_v33 = vld [vmem:[#allocation11 + $0x60] sm:$0xff]  }
 0x2f4   : > { %v3362_v50 = vld [vmem:[#allocation11 + $0xc0] sm:$0xff]   ;;  %2952 = vmatpush3.bf16.msra.mxu0 %v3360_v49 }
 0x2f5   : > { %2953 = vmatprep.subr.bf16.mxu0 %v3361_v33 }
 0x367   : > { %v1602_v52 = vpop.xlane.xlu0 %1601 }
 0x368   : > { %v1603_v53 = vsub.f32 %v1593_v30, %v1602_v52  ;;  %v3363_v52 = vld [vmem:[#allocation11 + $0x20] sm:$0xff]  }
 0x369   : > { %2954 = vmatpush3.bf16.msra.mxu0 %v3363_v52 }
 0x36a   : > { %v1604_v54 = vmul.f32 1.442695, %v1603_v53  ;;  %v3364_v53 = vld [vmem:[#allocation11 + $0x80] sm:$0xff]  }
 0x36c   : > { %3405 = vpow2.f32 %v1604_v54  ;;  %v3365_v54 = vld [vmem:[#allocation11 + $0x68] sm:$0xff]  }
 0x36d   : > { %2955 = vmatprep.subr.bf16.mxu0 %v3365_v54  ;;  %v3390_v54 = vld [vmem:[#allocation12 + $0x8] sm:$0xff]  }
 0x36f   : > { %v1703_v55 = vpop.xlane.xlu0 %1702 }
 0x370   : > { %v1704_v56 = vsub.f32 %v1695_v36, %v1703_v55  ;;  %v1308_v36 = vrot.slane %v4151_v21, %v4138_v9  ;;  %v3366_v55 = vld [vmem:[#allocation11 + $0xc8] sm:$0xff]  }
 0x372   : > { %v1705_v57 = vmul.f32 1.442695, %v1704_v56  ;;  %v1551_v39 = vadd.f32 %v1550_v12, %v1308_v36  ;;  %v3367_v56 = vld [vmem:[#allocation11 + $0x28] sm:$0xff]   ;;  %v3386_v12 = vld [vmem:[#allocation11 + $0xb8] sm:$0xff]  }
 0x373   : > { %2956 = vmatpush3.bf16.msra.mxu0 %v3367_v56 }
 0x374   : > { %3407 = vpow2.f32 %v1705_v57  ;;  %v1558_v43 = vpack.c.bf16 %v1551_v39, %v1551_v39  ;;  %v3368_v57 = vld [vmem:[#allocation11 + $0x88] sm:$0xff]  }
 0x376   : > { %v3406_v58 = vpop.eup %3405  ;;  %v1917_v9 = vsel %vm1615_vm1, %v1558_v43, 0 }
 0x377   : > { %v1803_v59 = vpop.xlane.xlu1 %1802  ;;  %v1606_v60 = vsel %vm1599_vm2, %v3406_v58, 0.0 }
 0x378   : > { %v1804_v62 = vsub.f32 %v1795_v41, %v1803_v59  ;;  %1607 = vadd.xlane.f32.xlu0 %v1606_v60  ;;  %v3370_v59 = vld [vmem:[#allocation11 + $0xd0] sm:$0xff]  }
 0x379   : > { %v3371_v60 = vld [vmem:[#allocation11 + $0x30] sm:$0xff]  }
 0x37a   : > { %v1805_v63 = vmul.f32 1.442695, %v1804_v62  ;;  %v3372_v62 = vld [vmem:[#allocation11 + $0x90] sm:$0xff]  }
 0x37c   : > { %3409 = vpow2.f32 %v1805_v63  ;;  %v3373_v63 = vld [vmem:[#allocation11 + $0x78] sm:$0xff]  }
 0x37e   : > { %v3408_v1 = vpop.eup %3407 }
 0x37f   : > { %v1903_v2 = vpop.xlane.xlu1 %1902  ;;  %v1707_v3 = vsel %vm1599_vm2, %v3408_v1, 0.0 }
 0x380   : > { %v1904_v4 = vsub.f32 %v1895_v47, %v1903_v2  ;;  %1708 = vadd.xlane.f32.xlu1 %v1707_v3  ;;  %v3375_v2 = vld [vmem:[#allocation11 + $0x38] sm:$0xff]  }
 0x381   : > { %v3376_v3 = vld [vmem:[#allocation11 + $0x98] sm:$0xff]  }
 0x382   : > { %v1905_v5 = vmul.f32 1.442695, %v1904_v4  ;;  %v3379_v4 = vld [vmem:[#allocation11 + $0xe0] sm:$0xff]  }
 0x384   : > { %3411 = vpow2.f32 %v1905_v5  ;;  %v3380_v5 = vld [vmem:[#allocation11 + $0xa0] sm:$0xff]  }
 0x386   : > { %v3410_v6 = vpop.eup %3409 }
 0x387   : > { %v1807_v7 = vsel %vm1599_vm2, %v3410_v6, 0.0 }
 0x388   : > { %1808 = vadd.xlane.f32.xlu0 %v1807_v7  ;;  %v3382_v7 = vld [vmem:[#allocation11 + $0xa8] sm:$0xff]  }
 0x38e   : > { %v3412_v8 = vpop.eup %3411 }
 0x38f   : > { %v1907_v10 = vsel %vm1599_vm2, %v3412_v8, 0.0 }
 0x390   : > { %1908 = vadd.xlane.f32.xlu1 %v1907_v10  ;;  %v3384_v10 = vld [vmem:[#allocation11 + $0xb0] sm:$0xff]  }
 0x405   : > { %v1608_v22 = vpop.xlane.xlu0 %1607 }
 0x406   : > { %3413 = vrcp.f32 %v1608_v22 }
 0x40d   : > { %v1709_v26 = vpop.xlane.xlu1 %1708 }
 0x40e   : > { %3415 = vrcp.f32 %v1709_v26 }
 0x410   : > { %v3414_v28 = vpop.eup %3413 }
 0x411   : > { %v1610_v30 = vmul.f32 %v3414_v28, %v3406_v58  ;;  %v3369_v58 = vld [vmem:[#allocation11 + $0x70] sm:$0xff]  }
 0x412   : > { %2957 = vmatprep.subr.bf16.mxu0 %v3369_v58 }
 0x413   : > { %v1611_v32 = vpack.c.bf16 %v1610_v30, %v1610_v30  ;;  %2958 = vmatpush3.bf16.msra.mxu0 %v3371_v60 }
 0x414   : > { %2959 = vmatprep.subr.bf16.mxu0 %v3373_v63  ;;  %v3391_v63 = vld [vmem:[#allocation12 + $0x10] sm:$0xff]  }
 0x415   : > { %3016 = vmatmul.mubr.msk.bf16.vlgmr.msra.gmra.mrb[12].mxu1 %vm1599_vm2, %v1611_v32  ;;  %v1809_v35 = vpop.xlane.xlu0 %1808 }
 0x416   : > { %3026 = vmatpush3.bf16.msra.mxu1 %v1717_v34  ;;  %3417 = vrcp.f32 %v1809_v35  ;;  %3027 = vmatprep.mubr.msk.bf16.mxu1 %vm3717_vm0, %v3716_v19 }
 0x417   : > { %3037 = vmatprep.subr.bf16.mxu1 %v3716_v19  ;;  %2960 = vmatpush3.bf16.msra.mxu0 %v3375_v2  ;;  %v3394_v2 = vld [vmem:[#allocation12 + $0x28] sm:$0xff]  }
 0x418   : > { %v3416_v25 = vpop.eup %3415  ;;  %3055 = vmatprep.subr.bf16.mxu0 %v3716_v19 }
 0x419   : > { %v1711_v61 = vmul.f32 %v3416_v25, %v3408_v1  ;;  %v3374_v1 = vld [vmem:[#allocation11 + $0xd8] sm:$0xff]  }
 0x41b   : > { %v1712_v38 = vpack.c.bf16 %v1711_v61, %v1711_v61 }
 0x41d   : > { %3028 = vmatmul.mubr.msk.bf16.vlgmr.msra.gmra.mrb[16].mxu1 %vm1599_vm2, %v1712_v38  ;;  %v1909_v40 = vpop.xlane.xlu1 %1908 }
 0x41e   : > { %3419 = vrcp.f32 %v1909_v40  ;;  %3038 = vmatpush3.bf16.msra.mxu1 %v1817_v37  ;;  %3039 = vmatprep.mubr.msk.bf16.mxu1 %vm3717_vm0, %v3716_v19 }
 0x41f   : > { %3049 = vmatprep.subr.bf16.mxu1 %v3716_v19 }
 0x420   : > { %v3418_v41 = vpop.eup %3417 }
 0x421   : > { %v1811_v42 = vmul.f32 %v3418_v41, %v3410_v6  ;;  %v3381_v6 = vld [vmem:[#allocation11 + $0xe8] sm:$0xff]  }
 0x423   : > { %v1812_v44 = vpack.c.bf16 %v1811_v42, %v1811_v42 }
 0x425   : > { %3040 = vmatmul.mubr.msk.bf16.vlgmr.msra.gmra.mrb[20].mxu1 %vm1599_vm2, %v1812_v44  ;;  %v2866_v44 = vld [vmem:[%s4347_s10] ss:$0 sm:$0xff]  ;;  %s4351_s10 = sld [smem:[#allocation29_spill]] }
 0x426   : > { %3050 = vmatpush3.bf16.msra.mxu1 %v1917_v9  ;;  %3051 = vmatprep.mubr.msk.bf16.mxu1 %vm3717_vm0, %v3716_v19 }
 0x427   : > { %2967 = vmatprep.subr.bf16.mxu1 %v3362_v50  ;;  %v3425_v50 = vld [vmem:[%s4081_s20] sm:$0xff]  ;;  %s4348_s20 = sld [smem:[#allocation26_spill]] }
 0x428   : > { %v3420_v21 = vpop.eup %3419 }
 0x429   : > { %v1911_v46 = vmul.f32 %v3420_v21, %v3412_v8  ;;  %v3383_v8 = vld [vmem:[#allocation11 + $0xf0] sm:$0xff]  }
 0x42b   : > { %v1912_v47 = vpack.c.bf16 %v1911_v46, %v1911_v46 }
 0x42d   : > { %3052 = vmatmul.mubr.msk.bf16.vlgmr.msra.gmra.mrb[24].mxu1 %vm1599_vm2, %v1912_v47 }
 0x42e   : > { %2968 = vmatpush3.bf16.msra.mxu1 %v3364_v53  ;;  %v3389_v53 = vld [vmem:[#allocation12] sm:$0xff]  }
 0x42f   : > { %2969 = vmatprep.subr.bf16.mxu1 %v3366_v55  ;;  %v653_v55 = vand.u32 127, %v652_v45  ;;  %v3393_v45 = vld [vmem:[#allocation12 + $0x20] sm:$0xff]  }
 0x431   : > { %vm654_vm3 = vcmp.lt.s32.totalorder %v653_v55, 32 }
 0x432   : > { %2970 = vmatpush3.bf16.msra.mxu1 %v3368_v57  ;;  %v4202_v58 = vsel %vm654_vm3, 1.0, %v3716_v19 }
 0x433   : > { %2971 = vmatprep.subr.bf16.mxu1 %v3370_v59 }
 0x436   : > { %2972 = vmatpush3.bf16.msra.mxu1 %v3372_v62 }
 0x437   : > { %2973 = vmatprep.subr.bf16.mxu1 %v3374_v1  ;;  %v3392_v1 = vld [vmem:[#allocation12 + $0x18] sm:$0xff]  }
 0x43a   : > { %2974 = vmatpush3.bf16.msra.mxu1 %v3376_v3  ;;  %v3395_v3 = vld [vmem:[#allocation12 + $0x30] sm:$0xff]  }
 0x43b   : > { %2975 = vmatprep.subr.bf16.mxu1 %v3379_v4  ;;  %v3396_v4 = vld [vmem:[#allocation12 + $0x38] sm:$0xff]  }
 0x43e   : > { %2976 = vmatpush3.bf16.msra.mxu1 %v3380_v5  ;;  %v3397_v5 = vld [vmem:[#allocation14] sm:$0xff]  }
 0x43f   : > { %2977 = vmatprep.subr.bf16.mxu1 %v3381_v6  ;;  %v3398_v6 = vld [vmem:[#allocation14 + $0x8] sm:$0xff]  }
 0x442   : > { %2978 = vmatpush3.bf16.msra.mxu1 %v3382_v7  ;;  %v3399_v7 = vld [vmem:[#allocation14 + $0x10] sm:$0xff]  }
 0x443   : > { %2979 = vmatprep.subr.bf16.mxu1 %v3383_v8  ;;  %v3400_v8 = vld [vmem:[#allocation14 + $0x18] sm:$0xff]  }
 0x446   : > { %2980 = vmatpush3.bf16.msra.mxu1 %v3384_v10  ;;  %v3401_v10 = vld [vmem:[#allocation14 + $0x20] sm:$0xff]  }
 0x447   : > { %2981 = vmatprep.subr.bf16.mxu1 %v3385_v11  ;;  %v3402_v11 = vld [vmem:[#allocation14 + $0x28] sm:$0xff]  }
 0x44a   : > { %2982 = vmatpush3.bf16.msra.mxu1 %v3386_v12 }
 0x44b   : > { %3075 = vmatprep.subr.bf16.mxu1 %v3716_v19 }
 0x4e8   : > { %v1653_v13 = vpop.f32.mrb[12].mxu1 }
 0x4e9   : > { %v1659_v14 = vpack.c.bf16 %v1653_v13, %v1653_v13  ;;  %v3017_v15 = vpop.f32.mrb[13].mxu1 }
 0x4ea   : > { %v1656_v0 = vpop.f32.mrb[14].mxu1 }
 0x4eb   : > { %1660 = vst [vmem:[#allocation2] sm:$0xf] %v1659_v14  ;;  %v3018_v16 = vpop.f32.mrb[15].mxu1  ;;  %v2903_v0 = vld [vmem:[%s4348_s20] ss:$0 sm:$0xff]  ;;  %s4352_s20 = sld [smem:[#allocation30_spill]] }
 0x4f0   : > { %v1753_v17 = vpop.f32.mrb[16].mxu1 }
 0x4f1   : > { %v1759_v18 = vpack.c.bf16 %v1753_v17, %v1753_v17  ;;  %v3029_v20 = vpop.f32.mrb[17].mxu1  ;;  %v2904_v17 = vld [vmem:[%s4349_s23] ss:$0 sm:$0xff]  ;;  %s4353_s23 = sld [smem:[#allocation31_spill]] }
 0x4f2   : > { %v1756_v22 = vpop.f32.mrb[18].mxu1 }
 0x4f3   : > { %1760 = vst [vmem:[#allocation2 + $0x4] sm:$0xf] %v1759_v18  ;;  %v3030_v23 = vpop.f32.mrb[19].mxu1 }
 0x4f4   : > { %v3403_v23 = vld [vmem:[#allocation14 + $0x30] sm:$0xff]  }
 0x4f8   : > { %v1853_v24 = vpop.f32.mrb[20].mxu1 }
 0x4f9   : > { %v1859_v26 = vpack.c.bf16 %v1853_v24, %v1853_v24  ;;  %v3041_v27 = vpop.f32.mrb[21].mxu1  ;;  %v3404_v24 = vld [vmem:[#allocation14 + $0x38] sm:$0xff]  }
 0x4fa   : > { %v1856_v28 = vpop.f32.mrb[22].mxu1  ;;  %v1961_v29 = vld [vmem:[#allocation2] sm:$0xff] }
 0x4fb   : > { %1860 = vst [vmem:[#allocation2 + $0x8] sm:$0xf] %v1859_v26  ;;  %v3042_v30 = vpop.f32.mrb[23].mxu1  ;;  %v2867_v31 = vcombine.low %v1961_v29, %v1961_v29  ;;  %v2868_v32 = vcombine.high %v1961_v29, %v1961_v29  ;;  %v2905_v26 = vld [vmem:[%s4350_s17] ss:$0 sm:$0xff]  ;;  %s2618_s17 = sshll.u32 %s650_s1, 4  ;;  %s4244_s17 = int_to_ptr.vmem [resolvable:$true] %s2618_s17 }
 0x4fc   : > { %s3624_s28 = scalar_lea.vmem %s4244_s17, 128  ;;  %p3631_p11 = scmp.lt.s32.totalorder %s4244_s17, %s3629_s22 }
 0x4fd   : > { %2272 = vmatprep.mubr.bf16.mxu0 %v2868_v32  ;;  %p3625_p6 = scmp.ne.s32.totalorder %s4244_s17, %s3624_s28 }
 0x4fe   : > { %2273 = vmatmul.mubr.bf16.vlgmr.msra.gmra.mrb[28].mxu0 %v2867_v31 }
 0x4ff   : > { %3071 = vmatprep.mubr.msk.bf16.mxu0 %vm3717_vm0, %v3716_v19  ;;  %3056 = vmatpush3.bf16.msra.mxu0 %v3389_v53  ;;  %p3626_p10 = pnand %p3625_p6, %p4355_p5 }
 0x500   : > { %v1953_v34 = vpop.f32.mrb[24].mxu1  ;;  %3057 = vmatprep.subr.bf16.mxu0 %v3716_v19 }
 0x501   : > { %v1959_v35 = vpack.c.bf16 %v1953_v34, %v1953_v34  ;;  %v3053_v51 = vpop.f32.mrb[25].mxu1  ;;  %p3627_p1 = pneg %p3626_p10 }
 0x502   : > { %v1956_v25 = vpop.f32.mrb[26].mxu1 }
 0x503   : > { %1960 = vst [vmem:[#allocation2 + $0xc] sm:$0xf] %v1959_v35  ;;  %v3054_v61 = vpop.f32.mrb[27].mxu1  ;;  %3058 = vmatpush3.bf16.msra.mxu0 %v3390_v54  ;;  %v2914_v35 = vld [vmem:[%s4351_s10] ss:$0 sm:$0xff]  ;;  %s4354_s10 = sld [smem:[#allocation32_spill]] }
 0x504   : > { %3059 = vmatprep.subr.bf16.mxu0 %v3716_v19 }
 0x507   : > { %3060 = vmatpush3.bf16.msra.mxu0 %v3391_v63 }
 0x508   : > { %3061 = vmatprep.subr.bf16.mxu0 %v3716_v19 }
 0x509   : > { %s4242_s2 = scalar_lea.hbm %s4354_s10, %s2926_s21 }
 0x50a   : > { %v1962_v36 = vld [vmem:[#allocation2 + $0x8] sm:$0xff] }
 0x50b   : > { %v2869_v37 = vcombine.low %v1962_v36, %v1962_v36  ;;  %v2870_v38 = vcombine.high %v1962_v36, %v1962_v36  ;;  %3062 = vmatpush3.bf16.msra.mxu0 %v3392_v1 }
 0x50c   : > { %3063 = vmatprep.subr.bf16.mxu0 %v3716_v19 }
 0x50d   : > { %2312 = vmatprep.mubr.bf16.mxu1 %v2870_v38 }
 0x50e   : > { %2313 = vmatmul.mubr.bf16.vlgmr.msra.gmra.mrb[28].mxu1 %v2869_v37 }
 0x50f   : > { %3091 = vmatprep.mubr.msk.bf16.mxu1 %vm3717_vm0, %v3716_v19  ;;  %3064 = vmatpush3.bf16.msra.mxu0 %v3393_v45 }
 0x510   : > { %3065 = vmatprep.subr.bf16.mxu0 %v3716_v19  ;;  %3076 = vmatpush3.bf16.msra.mxu1 %v3397_v5 }
 0x511   : > { %3077 = vmatprep.subr.bf16.mxu1 %v3716_v19 }
 0x513   : > { %3066 = vmatpush3.bf16.msra.mxu0 %v3394_v2 }
 0x514   : > { %3067 = vmatprep.subr.bf16.mxu0 %v3716_v19  ;;  %3078 = vmatpush3.bf16.msra.mxu1 %v3398_v6 }
 0x515   : > { %3079 = vmatprep.subr.bf16.mxu1 %v3716_v19 }
 0x517   : > { %3068 = vmatpush3.bf16.msra.mxu0 %v3395_v3 }
 0x518   : > { %3069 = vmatprep.subr.bf16.mxu0 %v3716_v19  ;;  %3080 = vmatpush3.bf16.msra.mxu1 %v3399_v7 }
 0x519   : > { %3081 = vmatprep.subr.bf16.mxu1 %v3716_v19 }
 0x51b   : > { %3070 = vmatpush3.bf16.msra.mxu0 %v3396_v4 }
 0x51c   : > { %3082 = vmatpush3.bf16.msra.mxu1 %v3400_v8 }
 0x51d   : > { %3083 = vmatprep.subr.bf16.mxu1 %v3716_v19 }
 0x520   : > { %3084 = vmatpush3.bf16.msra.mxu1 %v3401_v10 }
 0x521   : > { %3085 = vmatprep.subr.bf16.mxu1 %v3716_v19 }
 0x524   : > { %3086 = vmatpush3.bf16.msra.mxu1 %v3402_v11 }
 0x525   : > { %3087 = vmatprep.subr.bf16.mxu1 %v3716_v19 }
 0x528   : > { %3088 = vmatpush3.bf16.msra.mxu1 %v3403_v23 }
 0x529   : > { %3089 = vmatprep.subr.bf16.mxu1 %v3716_v19 }
 0x52c   : > { %3090 = vmatpush3.bf16.msra.mxu1 %v3404_v24 }
 0x5d1   : > { %v2961_v39 = vpop.f32.mrb[28].mxu0 }
 0x5d2   : > { %v2962_v40 = vpop.f32.mrb[29].mxu0 }
 0x5d3   : > { %v2963_v41 = vadd.f32 %v2962_v40, %v2961_v39  ;;  %v2964_v42 = vpop.f32.mrb[30].mxu0 }
 0x5d4   : > { %v2965_v43 = vpop.f32.mrb[31].mxu0 }
 0x5d5   : > { %v2275_v46 = vadd.f32 %v2963_v41, %v2866_v44 }
 0x5e1   : > { %v2983_v9 = vpop.f32.mrb[28].mxu1 }
 0x5e2   : > { %v2984_v21 = vpop.f32.mrb[29].mxu1 }
 0x5e3   : > { %v2985_v47 = vadd.f32 %v2984_v21, %v2983_v9  ;;  %v2986_v48 = vpop.f32.mrb[30].mxu1 }
 0x5e4   : > { %v2987_v49 = vpop.f32.mrb[31].mxu1  ;;  %v2924_v48 = vld [vmem:[%s4353_s23] ss:$0 sm:$0xff] }
 0x5e5   : > { %v2315_v33 = vadd.f32 %v2985_v47, %v2275_v46  ;;  %v2923_v46 = vld [vmem:[%s4352_s20] ss:$0 sm:$0xff]  ;;  %s3630_s20 = scalar_lea.vmem %s3629_s22, 256 }
 0x5e6   : > { %p3632_p12 = scmp.lt.s32.totalorder %s3630_s20, %s3624_s28 }
 0x5e7   : > { %v2320_v52 = vadd.f32 %v3425_v50, %v2315_v33 }
 0x5e8   : > { %p3633_p13 = por %p3632_p12, %p3631_p11 }
 0x5e9   : > { %2323 = vadd.xlane.f32.xlu0 %v2320_v52 }
 0x5ea   : > { %p3634_p3 = pnand %p3633_p13, %p3627_p1 }
 0x676   : > { %v2324_v56 = vpop.xlane.xlu0 %2323 }
 0x677   : > { %v2325_v57 = vmul.f32 0.03125, %v2324_v56 }
 0x679   : > { %v2326_v59 = vsub.f32 %v2320_v52, %v2325_v57 }
 0x67b   : > { %v2327_v60 = vmul.f32 %v4202_v58, %v2326_v59 }
 0x67d   : > { %v2328_v62 = vmul.f32 %v2327_v60, %v2327_v60 }
 0x67f   : > { %2329 = vadd.xlane.f32.xlu1 %v2328_v62 }
 0x70c   : > { %v2330_v12 = vpop.xlane.xlu1 %2329 }
 0x70d   : > { %v2331_v13 = vmul.f32 0.03125, %v2330_v12 }
 0x70f   : > { %v2332_v14 = vadd.f32 1e-05, %v2331_v13 }
 0x711   : > { %3421 = vrsqrt.f32 %v2332_v14 }
 0x71b   : > { %v3422_v15 = vpop.eup %3421 }
 0x71c   : > { %v2334_v16 = vmul.f32 %v3422_v15, %v2327_v60 }
 0x71e   : > { %v2341_v18 = vmul.f32 %v2903_v0, %v2334_v16 }
 0x720   : > { %v2348_v20 = vadd.f32 %v2904_v17, %v2341_v18 }
 0x722   : > { %v2349_v22 = vpack.c.bf16 %v2348_v20, %v2348_v20 }
 0x724   : > { %3072 = vmatmul.mubr.bf16.vlgmr.msra.gmra.mrb[32].mxu0 %v2349_v22 }
 0x7f7   : > { %v2455_v27 = vpop.f32.mrb[32].mxu0 }
 0x7f8   : > { %v2456_v28 = vadd.f32 %v2905_v26, %v2455_v27  ;;  %v3073_v29 = vpop.f32.mrb[33].mxu0 }
 0x7f9   : > { %v2458_v30 = vpop.f32.mrb[34].mxu0 }
 0x7fa   : > { %v2461_v31 = vmax.f32 %v2456_v28, 0.0  ;;  %v3074_v32 = vpop.f32.mrb[35].mxu0 }
 0x7fc   : > { %v2462_v34 = vpack.c.bf16 %v2461_v31, %v2461_v31 }
 0x7fe   : > { %3092 = vmatmul.mubr.bf16.vlgmr.msra.gmra.mrb[32].mxu1 %v2462_v34 }
 0x8d1   : > { %v2568_v51 = vpop.f32.mrb[32].mxu1 }
 0x8d2   : > { %v2569_v19 = vadd.f32 %v2914_v35, %v2568_v51  ;;  %v3093_v25 = vpop.f32.mrb[33].mxu1 }
 0x8d3   : > { %v2571_v61 = vpop.f32.mrb[34].mxu1 }
 0x8d4   : > { %v3094_v36 = vpop.f32.mrb[35].mxu1  ;;  %v2574_v37 = vadd.f32 %v2569_v19, %v2348_v20 }
 0x8d6   : > { %2577 = vadd.xlane.f32.xlu0 %v2574_v37 }
 0x963   : > { %v2578_v38 = vpop.xlane.xlu0 %2577 }
 0x964   : > { %v2579_v39 = vmul.f32 0.03125, %v2578_v38 }
 0x966   : > { %v2580_v40 = vsub.f32 %v2574_v37, %v2579_v39 }
 0x968   : > { %v2581_v41 = vmul.f32 %v4202_v58, %v2580_v40 }
 0x96a   : > { %v2582_v42 = vmul.f32 %v2581_v41, %v2581_v41 }
 0x96c   : > { %2583 = vadd.xlane.f32.xlu1 %v2582_v42 }
 0x9f9   : > { %v2584_v43 = vpop.xlane.xlu1 %2583 }
 0x9fa   : > { %v2585_v44 = vmul.f32 0.03125, %v2584_v43 }
 0x9fc   : > { %v2586_v9 = vadd.f32 1e-05, %v2585_v44 }
 0x9fe   : > { %3423 = vrsqrt.f32 %v2586_v9 }
 0xa08   : > { %v3424_v21 = vpop.eup %3423 }
 0xa09   : > { %v2588_v47 = vmul.f32 %v3424_v21, %v2581_v41 }
 0xa0b   : > { %v2595_v49 = vmul.f32 %v2923_v46, %v2588_v47 }
 0xa0d   : > { %v2602_v33 = vadd.f32 %v2924_v48, %v2595_v49 }
 0xa0f   : > { %2603 = vst [vmem:[%s650_s1] sm:$0xff] %v2602_v33 }
 0xa10   : > { %3637 = shalt.err (!%p3634_p3)
}
 0xa11   : > { %s3638_s16 = scalar_lea.hbm %s4242_s2, 128  ;;  %s3642_s23 = scalar_lea.hbm %s4354_s10, 256 }
 0xa12   : > { %p3639_p7 = scmp.ne.s32.totalorder %s4242_s2, %s3638_s16  ;;  %p3643_p8 = scmp.lt.u32.totalorder %s4242_s2, %s4354_s10 }
 0xa13   : > { %p3644_p0 = scmp.lt.u32.totalorder %s3642_s23, %s3638_s16  ;;  %p3646_p6 = scmp.lt.u32.totalorder %s3638_s16, %s4242_s2 }
 0xa14   : > { %p3640_p9 = pnand %p3639_p7, %p4355_p5 }
 0xa15   : > { %p3645_p2 = por %p3644_p0, %p3643_p8 }
 0xa16   : > { %p3641_p4 = pneg %p3640_p9 }
 0xa17   : > { %p3647_p10 = por %p3646_p6, %p3645_p2 }
 0xa19   : > { %p3648_p1 = pnand %p3647_p10, %p3641_p4 }
 0xa1b   : > { %3651 = shalt.err (!%p3648_p1)
}
 0xa1c   : > { %3121 = dma.vmem_to_hbm [thread:$0]  (%p4355_p5), %s4244_s17, 128, %s4242_s2, %s2605_s12  }
 0xa1d PF: > { %s2630_s8 = sand.u32 1, %s3690_s24   ;;  %p4356_p11 = scmp.ne.s32.totalorder %s4336_s9, 0 }
 0xa1e   : > { %p4357_p12 = scmp.ge.s32.totalorder %s3702_s27, 2  ;;  %s2631_s29 = scalar_lea.sflag [#allocation5], %s2630_s8 }
 0xa20   : > { %p3147_p13 = pnand %p4357_p12, %p4356_p11 }
 0xa22   : > { %3685 = dma.done.wait (!%p3147_p13), %s2631_s29, 128  }
 0xa23   : > { %3687 = vsyncadd (!%p3147_p13), %s2631_s29, 4294967168  ;;  %p33_p3 = scmp.ge.s32.totalorder %s3999_s18, 4   ;;  %s4358_s24 = smov %s3694_s25 }
 0xa24   : > { %s4359_s25 = smov %s3698_s26  ;;  %s4360_s26 = smov %s4010_s14 }
 0xa25   : > { %s4361_s27 = smov %s3999_s18  ;;  %35 = sbr.rel (!%p33_p3) target bundleno = 21 (0x15), region = 157 }
 0xa2c   :  { %2636 = vsyncpa [#allocation4], 1 }
 0xa2d   :  { %2638 = vsyncpa [#allocation4 + $0x1], 1 }
 0xa2e   :  { %2639 = vsyncpa [#allocation7], 1 }
 0xa2f   :  { %2640 = vsyncpa [#allocation10], 1 }
 0xa30   :  { %2641 = vsyncpa [#allocation13], 1 }
 0xa31   :  { %2642 = vsyncpa [#allocation5], 1 }
 0xa32   :  { %2644 = vsyncpa [#allocation5 + $0x1], 1 }

</bundles_post_ra>
